<compile_context>
chip_gen: v7x
topology: tpu7x:2x2x1
jax: 0.10.0
libtpu: 0.0.40
codegen_flags: <defaults>
</compile_context>

<pallas_src>
import numpy as np

import jax
import jax.numpy as jnp
from jax import lax
from jax.experimental import pallas as pl
from jax.experimental.pallas import tpu as pltpu

EPS = 1e-5
LEAKY_SLOPE = 0.01
OUT_LANES = 128          # lane-dense head output width (real value in lane 0)


def _ceil_to(n, m):
    return ((n + m - 1) // m) * m


# ----------------------------- fused Pallas kernel -------------------------- #
def fused_forward_kernel(
    e_ref, sel_ref,
    m0_ref, av0_ref, bc0_ref, g0_ref, b0_ref,
    m1_ref, av1_ref, bc1_ref, g1_ref, b1_ref,
    m2_ref, av2_ref, bc2_ref, g2_ref, b2_ref,
    wh_ref, bh_ref, o_ref,
):
    bt = o_ref.shape[0]                    # batch tile (samples per grid step)
    v = e_ref.shape[0] // bt               # variable_count (rows are v-major)
    dd = sel_ref.shape[1] // 2             # emb_dim ** 2

    # ---- per-sample gram = embs.T @ embs, flattened row-major -> (bt, dd) ---
    # sel = [ri | rj] selectors: a[r, i*D+j] = e[r, i] / e[r, j].
    a = jnp.dot(e_ref[...], sel_ref[...], preferred_element_type=jnp.float32)
    prod = a[:, :dd] * a[:, dd:]                       # (v*bt, dd)
    x = prod[0:bt]
    for i in range(1, v):                              # exact VPU adds over v
        x = x + prod[i * bt:(i + 1) * bt]              # (bt, dd)

    def conv_bn_lrelu(x, m_ref, av_ref, bc_ref, g_ref, b_ref):
        # Conv2d (bias absorbed by BN) folded into one dense matmul;
        # output is channel-major flat (== PyTorch NCHW flatten order).
        a = jnp.dot(x, m_ref[...], preferred_element_type=jnp.float32)   # (bt, Cq)
        # Per-sample, per-channel training-mode batch stats in ONE MXU push.
        stats = jnp.dot(jnp.concatenate([a, a * a], axis=0), av_ref[...],
                        preferred_element_type=jnp.float32)              # (2bt, C)
        mean, msq = stats[:bt], stats[bt:]
        var = msq - mean * mean            # one-pass E[x^2]-E[x]^2 (see notes)
        s = lax.rsqrt(var + EPS) * g_ref[...]          # fused scale
        t = b_ref[...] - mean * s                      # fused shift
        st = jnp.dot(jnp.concatenate([s, t], axis=0), bc_ref[...],
                     preferred_element_type=jnp.float32)                 # (2bt, Cq)
        z = a * st[:bt] + st[bt:]
        return jnp.where(z > 0, z, LEAKY_SLOPE * z)    # LeakyReLU(0.01)

    x = conv_bn_lrelu(x, m0_ref, av0_ref, bc0_ref, g0_ref, b0_ref)
    x = conv_bn_lrelu(x, m1_ref, av1_ref, bc1_ref, g1_ref, b1_ref)
    x = conv_bn_lrelu(x, m2_ref, av2_ref, bc2_ref, g2_ref, b2_ref)

    # Channel-major flat == PyTorch view(N, -1) order -> Linear -> Sigmoid.
    z = jnp.dot(x, wh_ref[...], preferred_element_type=jnp.float32) + bh_ref[...]
    o_ref[...] = jax.nn.sigmoid(z)


# ----------------------------- host-side parameter folding ------------------ #
def _gather_tensor(h):
    """G[s, p, k]=1 iff spatial input s feeds output p at tap k for
    Conv2d(kernel=4, stride=2, pad=1) on an (h, h) image."""
    oh = h // 2
    g = np.zeros((h * h, oh * oh, 16), np.float32)
    for ph in range(oh):
        for pw in range(oh):
            for kh in range(4):
                for kw in range(4):
                    ih, iw = 2 * ph + kh - 1, 2 * pw + kw - 1
                    if 0 <= ih < h and 0 <= iw < h:
                        g[ih * h + iw, ph * oh + pw, kh * 4 + kw] = 1.0
    return g


def prepare_fused_params(params, emb_dim):
    """One-time host-side fold of conv/BN/linear params into the dense
    operands used by the fused kernel (per-call forward is one pallas_call)."""
    d = emb_dim
    assert d % 8 == 0, "emb_dim must be divisible by 8 (three stride-2 convs)"
    dd = d * d
    r = np.arange(dd)
    ri = (r[None, :] // d == np.arange(d)[:, None]).astype(np.float32)  # (D, DD)
    rj = (r[None, :] % d == np.arange(d)[:, None]).astype(np.float32)   # (D, DD)
    fused = {"sel": jnp.asarray(np.concatenate([ri, rj], axis=1))}      # (D, 2DD)

    h = d
    in_dim = in_real = dd
    for l in range(3):
        w = np.asarray(params[f"conv{l}_w"])          # (Cout, Cin, 4, 4) OIHW
        cout, cin = int(w.shape[0]), int(w.shape[1])
        oh = h // 2
        q = oh * oh
        out_real = cout * q
        out_dim = _ceil_to(out_real, 128)             # lane-dense activation width
        assert in_real == cin * h * h
        g = _gather_tensor(h)                         # (h*h, q, 16)
        wk = w.reshape(cout, cin, 16)
        # m[c*h*h + s, o*q + p] = sum_k G[s, p, k] * w[o, c, k]
        m = np.zeros((in_dim, out_dim), np.float32)
        m[:in_real, :out_real] = np.einsum("spk,ock->csop", g, wk).reshape(in_real, out_real)
        # Conv bias intentionally omitted: train-mode BN subtracts the batch
        # mean, so a constant per-channel bias cancels exactly.
        avg = np.zeros((out_dim, cout), np.float32)
        avg[:out_real] = np.kron(np.eye(cout, dtype=np.float32),
                                 np.full((q, 1), 1.0 / q, np.float32))
        bc = np.zeros((cout, out_dim), np.float32)
        bc[:, :out_real] = np.kron(np.eye(cout, dtype=np.float32),
                                   np.ones((1, q), np.float32))
        fused[f"m{l}"] = jnp.asarray(m)
        fused[f"avg{l}"] = jnp.asarray(avg)
        fused[f"bcast{l}"] = jnp.asarray(bc)
        fused[f"gamma{l}"] = jnp.asarray(params[f"bn{l}_gamma"]).reshape(1, -1)
        fused[f"beta{l}"] = jnp.asarray(params[f"bn{l}_beta"]).reshape(1, -1)
        h, in_dim, in_real = oh, out_dim, out_real

    wh = np.zeros((in_dim, OUT_LANES), np.float32)
    wh[:in_real, 0] = np.asarray(params["lin_w"]).reshape(-1)
    bh = np.zeros((1, OUT_LANES), np.float32)
    bh[0, 0] = float(np.asarray(params["lin_b"]).reshape(-1)[0])
    fused["wh"] = jnp.asarray(wh)
    fused["bh"] = jnp.asarray(bh)

    const_bytes = sum(int(np.prod(a.shape)) * 4 for a in fused.values())
    assert const_bytes < (24 << 20), "folded constants too large for resident-VMEM path"
    return fused


# ------------------------------- batched wrapper ----------------------------- #
def cltn_gpredicate_forward(embs_batch, fused, negation=False, block_b=128):
    """Batched CLTN_GPredicate forward.  embs_batch is (B, variable_count,
    emb_dim): B independent predicate evaluations; returns (B, 1).  Each sample
    uses its own BatchNorm batch statistics, exactly like B separate calls of
    the original module.  block_b=128 suits all generations (use 256 on v6e/v7x
    for slightly better MXU fill)."""
    b, v, d = embs_batch.shape
    bp = _ceil_to(max(b, block_b), block_b)
    nb = bp // block_b
    if bp != b:  # zero-padding is numerically safe through the whole pipeline
        embs_batch = jnp.concatenate(
            [embs_batch, jnp.zeros((bp - b, v, d), embs_batch.dtype)], axis=0)
    # Arrange rows so each grid block holds its block_b samples in v-major
    # order: flat row = block*(v*block_b) + var*block_b + sample_in_block.
    e2 = (embs_batch.reshape(nb, block_b, v, d)
          .transpose(0, 2, 1, 3)
          .reshape(nb * v * block_b, d))

    operands = (
        e2, fused["sel"],
        fused["m0"], fused["avg0"], fused["bcast0"], fused["gamma0"], fused["beta0"],
        fused["m1"], fused["avg1"], fused["bcast1"], fused["gamma1"], fused["beta1"],
        fused["m2"], fused["avg2"], fused["bcast2"], fused["gamma2"], fused["beta2"],
        fused["wh"], fused["bh"],
    )
    # Embedding/output tiles advance with the grid; every folded constant keeps
    # block index (0, 0) so it is DMA'd once and stays VMEM-resident.
    in_specs = [pl.BlockSpec((v * block_b, d), lambda i: (i, 0))]
    in_specs += [pl.BlockSpec(op.shape, lambda i: (0, 0)) for op in operands[1:]]
    out_specs = pl.BlockSpec((block_b, OUT_LANES), lambda i: (i, 0))

    out = pl.pallas_call(
        fused_forward_kernel,
        out_shape=jax.ShapeDtypeStruct((bp, OUT_LANES), jnp.float32),
        grid_spec=pltpu.PrefetchScalarGridSpec(
            num_scalar_prefetch=0, grid=(nb,),
            in_specs=in_specs, out_specs=out_specs),
        compiler_params=pltpu.CompilerParams(dimension_semantics=("parallel",)),
    )(*operands)

    out = out[:b, :1]                       # real value lives in lane 0
    return 1.0 - out if negation else out   # negation handled outside the kernel


# --------------------------- reference (pure JAX) ---------------------------- #
def reference_forward(embs, params):
    """Single-sample reference, embs is (variable_count, emb_dim)."""
    gram = jnp.dot(embs.T, embs, precision=lax.Precision.HIGHEST)
    x = gram[None, None]
    for i in range(3):
        w = params[f"conv{i}_w"]
        b = params[f"conv{i}_b"]
        g = params[f"bn{i}_gamma"]
        bb = params[f"bn{i}_beta"]
        x = lax.conv_general_dilated(
            x, w, (2, 2), ((1, 1), (1, 1)),
            dimension_numbers=("NCHW", "OIHW", "NCHW"),
            precision=lax.Precision.HIGHEST,
        ) + b.reshape(1, -1, 1, 1)
        mean = x.mean(axis=(0, 2, 3), keepdims=True)
        var = ((x - mean) ** 2).mean(axis=(0, 2, 3), keepdims=True)
        x = (x - mean) / jnp.sqrt(var + EPS) * g.reshape(1, -1, 1, 1) + bb.reshape(1, -1, 1, 1)
        x = jnp.where(x > 0, x, LEAKY_SLOPE * x)
    flat = x.reshape(1, -1)
    return jax.nn.sigmoid(
        jnp.dot(flat, params["lin_w"].T, precision=lax.Precision.HIGHEST)
        + params["lin_b"].reshape(1, 1))


# ------------------------------- main ---------------------------------------- #
def init_params(key, emb_dim):
    keys = jax.random.split(key, 14)
    f = 16 * (emb_dim // 8) ** 2
    params = {
        "conv0_w": 0.1 * jax.random.normal(keys[0], (4, 1, 4, 4), jnp.float32),
        "conv0_b": 0.1 * jax.random.normal(keys[1], (4,), jnp.float32),
        "conv1_w": 0.1 * jax.random.normal(keys[2], (8, 4, 4, 4), jnp.float32),
        "conv1_b": 0.1 * jax.random.normal(keys[3], (8,), jnp.float32),
        "conv2_w": 0.1 * jax.random.normal(keys[4], (16, 8, 4, 4), jnp.float32),
        "conv2_b": 0.1 * jax.random.normal(keys[5], (16,), jnp.float32),
        "lin_w": 0.1 * jax.random.normal(keys[6], (1, f), jnp.float32),
        "lin_b": 0.1 * jax.random.normal(keys[7], (1,), jnp.float32),
    }
    # Non-trivial BN affine params to exercise the fused scale/shift path.
    for i, c in enumerate((4, 8, 16)):
        params[f"bn{i}_gamma"] = 1.0 + 0.1 * jax.random.normal(keys[8 + 2 * i], (c,), jnp.float32)
        params[f"bn{i}_beta"] = 0.1 * jax.random.normal(keys[9 + 2 * i], (c,), jnp.float32)
    return params


if __name__ == "__main__":
    variable_count, emb_dim, batch = 4, 16, 256
    key = jax.random.PRNGKey(0)
    k_emb, k_par = jax.random.split(key)
    embs = jax.random.normal(k_emb, (batch, variable_count, emb_dim), jnp.float32)
    params = init_params(k_par, emb_dim)
    fused = prepare_fused_params(params, emb_dim)     # one-time host-side folding

    out = jax.block_until_ready(
        cltn_gpredicate_forward(embs, fused, negation=False, block_b=128))
    out_neg = jax.block_until_ready(
        cltn_gpredicate_forward(embs, fused, negation=True, block_b=128))

    ref = jax.vmap(lambda e: reference_forward(e, params)[0, 0])(embs)[:, None]
    assert out.shape == (batch, 1)
    assert jnp.allclose(out, ref, atol=2e-3, rtol=2e-3), float(jnp.abs(out - ref).max())
    assert jnp.allclose(out_neg, 1.0 - ref, atol=2e-3, rtol=2e-3)
    print("KERNEL_OK")
</pallas_src>

<mosaic_0001>
module attributes {stable_mosaic.version = 11 : i64} {
  func.func @fused_forward_kernel(%arg0: i32, %arg1: memref<512x16xf32, #tpu.memory_space<vmem>>, %arg2: memref<16x512xf32, #tpu.memory_space<vmem>>, %arg3: memref<256x256xf32, #tpu.memory_space<vmem>>, %arg4: memref<256x4xf32, #tpu.memory_space<vmem>>, %arg5: memref<4x256xf32, #tpu.memory_space<vmem>>, %arg6: memref<1x4xf32, #tpu.memory_space<vmem>>, %arg7: memref<1x4xf32, #tpu.memory_space<vmem>>, %arg8: memref<256x128xf32, #tpu.memory_space<vmem>>, %arg9: memref<128x8xf32, #tpu.memory_space<vmem>>, %arg10: memref<8x128xf32, #tpu.memory_space<vmem>>, %arg11: memref<1x8xf32, #tpu.memory_space<vmem>>, %arg12: memref<1x8xf32, #tpu.memory_space<vmem>>, %arg13: memref<128x128xf32, #tpu.memory_space<vmem>>, %arg14: memref<128x16xf32, #tpu.memory_space<vmem>>, %arg15: memref<16x128xf32, #tpu.memory_space<vmem>>, %arg16: memref<1x16xf32, #tpu.memory_space<vmem>>, %arg17: memref<1x16xf32, #tpu.memory_space<vmem>>, %arg18: memref<128x128xf32, #tpu.memory_space<vmem>>, %arg19: memref<1x128xf32, #tpu.memory_space<vmem>>, %arg20: memref<128x128xf32, #tpu.memory_space<vmem>>) attributes {dimension_semantics = [#tpu.dimension_semantics<parallel>], iteration_bounds = array<i64: 2>, scalar_prefetch = 0 : i64, scratch_operands = 0 : i64, tpu.core_type = #tpu.core_type<tc>, window_params = [{transform_indices = @transform_0, window_bounds = array<i64: 512, 16>}, {pipeline_mode = #tpu.pipeline_mode<synchronous>, transform_indices = @transform_1, window_bounds = array<i64: 16, 512>}, {pipeline_mode = #tpu.pipeline_mode<synchronous>, transform_indices = @transform_2, window_bounds = array<i64: 256, 256>}, {pipeline_mode = #tpu.pipeline_mode<synchronous>, transform_indices = @transform_3, window_bounds = array<i64: 256, 4>}, {pipeline_mode = #tpu.pipeline_mode<synchronous>, transform_indices = @transform_4, window_bounds = array<i64: 4, 256>}, {pipeline_mode = #tpu.pipeline_mode<synchronous>, transform_indices = @transform_5, window_bounds = array<i64: 1, 4>}, {pipeline_mode = #tpu.pipeline_mode<synchronous>, transform_indices = @transform_6, window_bounds = array<i64: 1, 4>}, {pipeline_mode = #tpu.pipeline_mode<synchronous>, transform_indices = @transform_7, window_bounds = array<i64: 256, 128>}, {pipeline_mode = #tpu.pipeline_mode<synchronous>, transform_indices = @transform_8, window_bounds = array<i64: 128, 8>}, {pipeline_mode = #tpu.pipeline_mode<synchronous>, transform_indices = @transform_9, window_bounds = array<i64: 8, 128>}, {pipeline_mode = #tpu.pipeline_mode<synchronous>, transform_indices = @transform_10, window_bounds = array<i64: 1, 8>}, {pipeline_mode = #tpu.pipeline_mode<synchronous>, transform_indices = @transform_11, window_bounds = array<i64: 1, 8>}, {pipeline_mode = #tpu.pipeline_mode<synchronous>, transform_indices = @transform_12, window_bounds = array<i64: 128, 128>}, {pipeline_mode = #tpu.pipeline_mode<synchronous>, transform_indices = @transform_13, window_bounds = array<i64: 128, 16>}, {pipeline_mode = #tpu.pipeline_mode<synchronous>, transform_indices = @transform_14, window_bounds = array<i64: 16, 128>}, {pipeline_mode = #tpu.pipeline_mode<synchronous>, transform_indices = @transform_15, window_bounds = array<i64: 1, 16>}, {pipeline_mode = #tpu.pipeline_mode<synchronous>, transform_indices = @transform_16, window_bounds = array<i64: 1, 16>}, {pipeline_mode = #tpu.pipeline_mode<synchronous>, transform_indices = @transform_17, window_bounds = array<i64: 128, 128>}, {pipeline_mode = #tpu.pipeline_mode<synchronous>, transform_indices = @transform_18, window_bounds = array<i64: 1, 128>}, {transform_indices = @transform_19, window_bounds = array<i64: 128, 128>}]} {
    %c0 = arith.constant 0 : index
    %c0_0 = arith.constant 0 : index
    %0 = vector.load %arg1[%c0, %c0_0] : memref<512x16xf32, #tpu.memory_space<vmem>>, vector<512x16xf32>
    %c0_1 = arith.constant 0 : index
    %c0_2 = arith.constant 0 : index
    %1 = vector.load %arg2[%c0_1, %c0_2] : memref<16x512xf32, #tpu.memory_space<vmem>>, vector<16x512xf32>
    %cst = arith.constant dense<0.000000e+00> : vector<512x512xf32>
    %2 = tpu.matmul %0, %1, %cst {dimension_numbers = #tpu.dot_dimension_numbers<[1], [0], [0], [1], [0, 0, 1, 1], [], []>} : vector<512x16xf32>, vector<16x512xf32>, vector<512x512xf32> -> vector<512x512xf32>
    %3 = vector.extract_strided_slice %2 {offsets = [0, 0], sizes = [512, 256], strides = [1, 1]} : vector<512x512xf32> to vector<512x256xf32>
    %4 = vector.extract_strided_slice %2 {offsets = [0, 256], sizes = [512, 256], strides = [1, 1]} : vector<512x512xf32> to vector<512x256xf32>
    %5 = arith.mulf %3, %4 : vector<512x256xf32>
    %6 = vector.extract_strided_slice %5 {offsets = [0, 0], sizes = [128, 256], strides = [1, 1]} : vector<512x256xf32> to vector<128x256xf32>
    %7 = vector.extract_strided_slice %5 {offsets = [128, 0], sizes = [128, 256], strides = [1, 1]} : vector<512x256xf32> to vector<128x256xf32>
    %8 = arith.addf %6, %7 : vector<128x256xf32>
    %9 = vector.extract_strided_slice %5 {offsets = [256, 0], sizes = [128, 256], strides = [1, 1]} : vector<512x256xf32> to vector<128x256xf32>
    %10 = arith.addf %8, %9 : vector<128x256xf32>
    %11 = vector.extract_strided_slice %5 {offsets = [384, 0], sizes = [128, 256], strides = [1, 1]} : vector<512x256xf32> to vector<128x256xf32>
    %12 = arith.addf %10, %11 : vector<128x256xf32>
    %c0_3 = arith.constant 0 : index
    %c0_4 = arith.constant 0 : index
    %13 = vector.load %arg3[%c0_3, %c0_4] : memref<256x256xf32, #tpu.memory_space<vmem>>, vector<256x256xf32>
    %cst_5 = arith.constant dense<0.000000e+00> : vector<128x256xf32>
    %14 = tpu.matmul %12, %13, %cst_5 {dimension_numbers = #tpu.dot_dimension_numbers<[1], [0], [0], [1], [0, 0, 1, 1], [], []>} : vector<128x256xf32>, vector<256x256xf32>, vector<128x256xf32> -> vector<128x256xf32>
    %15 = arith.mulf %14, %14 : vector<128x256xf32>
    %16 = tpu.concatenate %14, %15 in 0 : vector<128x256xf32>, vector<128x256xf32> -> vector<256x256xf32>
    %c0_6 = arith.constant 0 : index
    %c0_7 = arith.constant 0 : index
    %17 = vector.load %arg4[%c0_6, %c0_7] : memref<256x4xf32, #tpu.memory_space<vmem>>, vector<256x4xf32>
    %cst_8 = arith.constant dense<0.000000e+00> : vector<256x4xf32>
    %18 = tpu.matmul %16, %17, %cst_8 {dimension_numbers = #tpu.dot_dimension_numbers<[1], [0], [0], [1], [0, 0, 1, 1], [], []>} : vector<256x256xf32>, vector<256x4xf32>, vector<256x4xf32> -> vector<256x4xf32>
    %19 = vector.extract_strided_slice %18 {offsets = [0, 0], sizes = [128, 4], strides = [1, 1]} : vector<256x4xf32> to vector<128x4xf32>
    %20 = vector.extract_strided_slice %18 {offsets = [128, 0], sizes = [128, 4], strides = [1, 1]} : vector<256x4xf32> to vector<128x4xf32>
    %21 = arith.mulf %19, %19 : vector<128x4xf32>
    %22 = arith.subf %20, %21 : vector<128x4xf32>
    %cst_9 = arith.constant 9.99999974E-6 : f32
    %23 = vector.broadcast %cst_9 : f32 to vector<128x4xf32>
    %24 = arith.addf %22, %23 : vector<128x4xf32>
    %25 = math.rsqrt %24 : vector<128x4xf32>
    %c0_10 = arith.constant 0 : index
    %c0_11 = arith.constant 0 : index
    %26 = vector.load %arg6[%c0_10, %c0_11] : memref<1x4xf32, #tpu.memory_space<vmem>>, vector<1x4xf32>
    %27 = vector.broadcast %26 : vector<1x4xf32> to vector<128x4xf32>
    %28 = arith.mulf %25, %27 : vector<128x4xf32>
    %c0_12 = arith.constant 0 : index
    %c0_13 = arith.constant 0 : index
    %29 = vector.load %arg7[%c0_12, %c0_13] : memref<1x4xf32, #tpu.memory_space<vmem>>, vector<1x4xf32>
    %30 = arith.mulf %19, %28 : vector<128x4xf32>
    %31 = vector.broadcast %29 : vector<1x4xf32> to vector<128x4xf32>
    %32 = arith.subf %31, %30 : vector<128x4xf32>
    %33 = tpu.concatenate %28, %32 in 0 : vector<128x4xf32>, vector<128x4xf32> -> vector<256x4xf32>
    %c0_14 = arith.constant 0 : index
    %c0_15 = arith.constant 0 : index
    %34 = vector.load %arg5[%c0_14, %c0_15] : memref<4x256xf32, #tpu.memory_space<vmem>>, vector<4x256xf32>
    %cst_16 = arith.constant dense<0.000000e+00> : vector<256x256xf32>
    %35 = tpu.matmul %33, %34, %cst_16 {dimension_numbers = #tpu.dot_dimension_numbers<[1], [0], [0], [1], [0, 0, 1, 1], [], []>} : vector<256x4xf32>, vector<4x256xf32>, vector<256x256xf32> -> vector<256x256xf32>
    %36 = vector.extract_strided_slice %35 {offsets = [0, 0], sizes = [128, 256], strides = [1, 1]} : vector<256x256xf32> to vector<128x256xf32>
    %37 = arith.mulf %14, %36 : vector<128x256xf32>
    %38 = vector.extract_strided_slice %35 {offsets = [128, 0], sizes = [128, 256], strides = [1, 1]} : vector<256x256xf32> to vector<128x256xf32>
    %39 = arith.addf %37, %38 : vector<128x256xf32>
    %cst_17 = arith.constant 0.000000e+00 : f32
    %40 = vector.broadcast %cst_17 : f32 to vector<128x256xf32>
    %41 = arith.cmpf ogt, %39, %40 : vector<128x256xf32>
    %cst_18 = arith.constant 0.00999999977 : f32
    %42 = vector.broadcast %cst_18 : f32 to vector<128x256xf32>
    %43 = arith.mulf %42, %39 : vector<128x256xf32>
    %44 = arith.select %41, %39, %43 : vector<128x256xi1>, vector<128x256xf32>
    %c0_19 = arith.constant 0 : index
    %c0_20 = arith.constant 0 : index
    %45 = vector.load %arg8[%c0_19, %c0_20] : memref<256x128xf32, #tpu.memory_space<vmem>>, vector<256x128xf32>
    %cst_21 = arith.constant dense<0.000000e+00> : vector<128x128xf32>
    %46 = tpu.matmul %44, %45, %cst_21 {dimension_numbers = #tpu.dot_dimension_numbers<[1], [0], [0], [1], [0, 0, 1, 1], [], []>} : vector<128x256xf32>, vector<256x128xf32>, vector<128x128xf32> -> vector<128x128xf32>
    %47 = arith.mulf %46, %46 : vector<128x128xf32>
    %48 = tpu.concatenate %46, %47 in 0 : vector<128x128xf32>, vector<128x128xf32> -> vector<256x128xf32>
    %c0_22 = arith.constant 0 : index
    %c0_23 = arith.constant 0 : index
    %49 = vector.load %arg9[%c0_22, %c0_23] : memref<128x8xf32, #tpu.memory_space<vmem>>, vector<128x8xf32>
    %cst_24 = arith.constant dense<0.000000e+00> : vector<256x8xf32>
    %50 = tpu.matmul %48, %49, %cst_24 {dimension_numbers = #tpu.dot_dimension_numbers<[1], [0], [0], [1], [0, 0, 1, 1], [], []>} : vector<256x128xf32>, vector<128x8xf32>, vector<256x8xf32> -> vector<256x8xf32>
    %51 = vector.extract_strided_slice %50 {offsets = [0, 0], sizes = [128, 8], strides = [1, 1]} : vector<256x8xf32> to vector<128x8xf32>
    %52 = vector.extract_strided_slice %50 {offsets = [128, 0], sizes = [128, 8], strides = [1, 1]} : vector<256x8xf32> to vector<128x8xf32>
    %53 = arith.mulf %51, %51 : vector<128x8xf32>
    %54 = arith.subf %52, %53 : vector<128x8xf32>
    %cst_25 = arith.constant 9.99999974E-6 : f32
    %55 = vector.broadcast %cst_25 : f32 to vector<128x8xf32>
    %56 = arith.addf %54, %55 : vector<128x8xf32>
    %57 = math.rsqrt %56 : vector<128x8xf32>
    %c0_26 = arith.constant 0 : index
    %c0_27 = arith.constant 0 : index
    %58 = vector.load %arg11[%c0_26, %c0_27] : memref<1x8xf32, #tpu.memory_space<vmem>>, vector<1x8xf32>
    %59 = vector.broadcast %58 : vector<1x8xf32> to vector<128x8xf32>
    %60 = arith.mulf %57, %59 : vector<128x8xf32>
    %c0_28 = arith.constant 0 : index
    %c0_29 = arith.constant 0 : index
    %61 = vector.load %arg12[%c0_28, %c0_29] : memref<1x8xf32, #tpu.memory_space<vmem>>, vector<1x8xf32>
    %62 = arith.mulf %51, %60 : vector<128x8xf32>
    %63 = vector.broadcast %61 : vector<1x8xf32> to vector<128x8xf32>
    %64 = arith.subf %63, %62 : vector<128x8xf32>
    %65 = tpu.concatenate %60, %64 in 0 : vector<128x8xf32>, vector<128x8xf32> -> vector<256x8xf32>
    %c0_30 = arith.constant 0 : index
    %c0_31 = arith.constant 0 : index
    %66 = vector.load %arg10[%c0_30, %c0_31] : memref<8x128xf32, #tpu.memory_space<vmem>>, vector<8x128xf32>
    %cst_32 = arith.constant dense<0.000000e+00> : vector<256x128xf32>
    %67 = tpu.matmul %65, %66, %cst_32 {dimension_numbers = #tpu.dot_dimension_numbers<[1], [0], [0], [1], [0, 0, 1, 1], [], []>} : vector<256x8xf32>, vector<8x128xf32>, vector<256x128xf32> -> vector<256x128xf32>
    %68 = vector.extract_strided_slice %67 {offsets = [0, 0], sizes = [128, 128], strides = [1, 1]} : vector<256x128xf32> to vector<128x128xf32>
    %69 = arith.mulf %46, %68 : vector<128x128xf32>
    %70 = vector.extract_strided_slice %67 {offsets = [128, 0], sizes = [128, 128], strides = [1, 1]} : vector<256x128xf32> to vector<128x128xf32>
    %71 = arith.addf %69, %70 : vector<128x128xf32>
    %cst_33 = arith.constant 0.000000e+00 : f32
    %72 = vector.broadcast %cst_33 : f32 to vector<128x128xf32>
    %73 = arith.cmpf ogt, %71, %72 : vector<128x128xf32>
    %cst_34 = arith.constant 0.00999999977 : f32
    %74 = vector.broadcast %cst_34 : f32 to vector<128x128xf32>
    %75 = arith.mulf %74, %71 : vector<128x128xf32>
    %76 = arith.select %73, %71, %75 : vector<128x128xi1>, vector<128x128xf32>
    %c0_35 = arith.constant 0 : index
    %c0_36 = arith.constant 0 : index
    %77 = vector.load %arg13[%c0_35, %c0_36] : memref<128x128xf32, #tpu.memory_space<vmem>>, vector<128x128xf32>
    %cst_37 = arith.constant dense<0.000000e+00> : vector<128x128xf32>
    %78 = tpu.matmul %76, %77, %cst_37 {dimension_numbers = #tpu.dot_dimension_numbers<[1], [0], [0], [1], [0, 0, 1, 1], [], []>} : vector<128x128xf32>, vector<128x128xf32>, vector<128x128xf32> -> vector<128x128xf32>
    %79 = arith.mulf %78, %78 : vector<128x128xf32>
    %80 = tpu.concatenate %78, %79 in 0 : vector<128x128xf32>, vector<128x128xf32> -> vector<256x128xf32>
    %c0_38 = arith.constant 0 : index
    %c0_39 = arith.constant 0 : index
    %81 = vector.load %arg14[%c0_38, %c0_39] : memref<128x16xf32, #tpu.memory_space<vmem>>, vector<128x16xf32>
    %cst_40 = arith.constant dense<0.000000e+00> : vector<256x16xf32>
    %82 = tpu.matmul %80, %81, %cst_40 {dimension_numbers = #tpu.dot_dimension_numbers<[1], [0], [0], [1], [0, 0, 1, 1], [], []>} : vector<256x128xf32>, vector<128x16xf32>, vector<256x16xf32> -> vector<256x16xf32>
    %83 = vector.extract_strided_slice %82 {offsets = [0, 0], sizes = [128, 16], strides = [1, 1]} : vector<256x16xf32> to vector<128x16xf32>
    %84 = vector.extract_strided_slice %82 {offsets = [128, 0], sizes = [128, 16], strides = [1, 1]} : vector<256x16xf32> to vector<128x16xf32>
    %85 = arith.mulf %83, %83 : vector<128x16xf32>
    %86 = arith.subf %84, %85 : vector<128x16xf32>
    %cst_41 = arith.constant 9.99999974E-6 : f32
    %87 = vector.broadcast %cst_41 : f32 to vector<128x16xf32>
    %88 = arith.addf %86, %87 : vector<128x16xf32>
    %89 = math.rsqrt %88 : vector<128x16xf32>
    %c0_42 = arith.constant 0 : index
    %c0_43 = arith.constant 0 : index
    %90 = vector.load %arg16[%c0_42, %c0_43] : memref<1x16xf32, #tpu.memory_space<vmem>>, vector<1x16xf32>
    %91 = vector.broadcast %90 : vector<1x16xf32> to vector<128x16xf32>
    %92 = arith.mulf %89, %91 : vector<128x16xf32>
    %c0_44 = arith.constant 0 : index
    %c0_45 = arith.constant 0 : index
    %93 = vector.load %arg17[%c0_44, %c0_45] : memref<1x16xf32, #tpu.memory_space<vmem>>, vector<1x16xf32>
    %94 = arith.mulf %83, %92 : vector<128x16xf32>
    %95 = vector.broadcast %93 : vector<1x16xf32> to vector<128x16xf32>
    %96 = arith.subf %95, %94 : vector<128x16xf32>
    %97 = tpu.concatenate %92, %96 in 0 : vector<128x16xf32>, vector<128x16xf32> -> vector<256x16xf32>
    %c0_46 = arith.constant 0 : index
    %c0_47 = arith.constant 0 : index
    %98 = vector.load %arg15[%c0_46, %c0_47] : memref<16x128xf32, #tpu.memory_space<vmem>>, vector<16x128xf32>
    %cst_48 = arith.constant dense<0.000000e+00> : vector<256x128xf32>
    %99 = tpu.matmul %97, %98, %cst_48 {dimension_numbers = #tpu.dot_dimension_numbers<[1], [0], [0], [1], [0, 0, 1, 1], [], []>} : vector<256x16xf32>, vector<16x128xf32>, vector<256x128xf32> -> vector<256x128xf32>
    %100 = vector.extract_strided_slice %99 {offsets = [0, 0], sizes = [128, 128], strides = [1, 1]} : vector<256x128xf32> to vector<128x128xf32>
    %101 = arith.mulf %78, %100 : vector<128x128xf32>
    %102 = vector.extract_strided_slice %99 {offsets = [128, 0], sizes = [128, 128], strides = [1, 1]} : vector<256x128xf32> to vector<128x128xf32>
    %103 = arith.addf %101, %102 : vector<128x128xf32>
    %cst_49 = arith.constant 0.000000e+00 : f32
    %104 = vector.broadcast %cst_49 : f32 to vector<128x128xf32>
    %105 = arith.cmpf ogt, %103, %104 : vector<128x128xf32>
    %cst_50 = arith.constant 0.00999999977 : f32
    %106 = vector.broadcast %cst_50 : f32 to vector<128x128xf32>
    %107 = arith.mulf %106, %103 : vector<128x128xf32>
    %108 = arith.select %105, %103, %107 : vector<128x128xi1>, vector<128x128xf32>
    %c0_51 = arith.constant 0 : index
    %c0_52 = arith.constant 0 : index
    %109 = vector.load %arg18[%c0_51, %c0_52] : memref<128x128xf32, #tpu.memory_space<vmem>>, vector<128x128xf32>
    %cst_53 = arith.constant dense<0.000000e+00> : vector<128x128xf32>
    %110 = tpu.matmul %108, %109, %cst_53 {dimension_numbers = #tpu.dot_dimension_numbers<[1], [0], [0], [1], [0, 0, 1, 1], [], []>} : vector<128x128xf32>, vector<128x128xf32>, vector<128x128xf32> -> vector<128x128xf32>
    %c0_54 = arith.constant 0 : index
    %c0_55 = arith.constant 0 : index
    %111 = vector.load %arg19[%c0_54, %c0_55] : memref<1x128xf32, #tpu.memory_space<vmem>>, vector<1x128xf32>
    %112 = vector.broadcast %111 : vector<1x128xf32> to vector<128x128xf32>
    %113 = arith.addf %110, %112 : vector<128x128xf32>
    %114 = arith.negf %113 : vector<128x128xf32>
    %115 = math.exp %114 : vector<128x128xf32>
    %cst_56 = arith.constant 1.000000e+00 : f32
    %116 = vector.broadcast %cst_56 : f32 to vector<128x128xf32>
    %117 = arith.addf %116, %115 : vector<128x128xf32>
    %118 = arith.divf %116, %117 : vector<128x128xf32>
    %c0_57 = arith.constant 0 : index
    %c0_58 = arith.constant 0 : index
    %119 = vector.load %arg20[%c0_57, %c0_58] : memref<128x128xf32, #tpu.memory_space<vmem>>, vector<128x128xf32>
    tpu.vector_store %arg20[%c0_57, %c0_58], %118 {strides = array<i32>} : memref<128x128xf32, #tpu.memory_space<vmem>>, vector<128x128xf32>,
    return
  }
  func.func @transform_0(%arg0: i32) -> (i32, i32) {
    %c0_i32 = arith.constant 0 : i32
    %c0_i32_0 = arith.constant 0 : i32
    return %arg0, %c0_i32 : i32, i32
  }
  func.func @transform_1(%arg0: i32) -> (i32, i32) {
    %c0_i32 = arith.constant 0 : i32
    %c0_i32_0 = arith.constant 0 : i32
    %c0_i32_1 = arith.constant 0 : i32
    return %c0_i32, %c0_i32_0 : i32, i32
  }
  func.func @transform_2(%arg0: i32) -> (i32, i32) {
    %c0_i32 = arith.constant 0 : i32
    %c0_i32_0 = arith.constant 0 : i32
    %c0_i32_1 = arith.constant 0 : i32
    return %c0_i32, %c0_i32_0 : i32, i32
  }
  func.func @transform_3(%arg0: i32) -> (i32, i32) {
    %c0_i32 = arith.constant 0 : i32
    %c0_i32_0 = arith.constant 0 : i32
    %c0_i32_1 = arith.constant 0 : i32
    return %c0_i32, %c0_i32_0 : i32, i32
  }
  func.func @transform_4(%arg0: i32) -> (i32, i32) {
    %c0_i32 = arith.constant 0 : i32
    %c0_i32_0 = arith.constant 0 : i32
    %c0_i32_1 = arith.constant 0 : i32
    return %c0_i32, %c0_i32_0 : i32, i32
  }
  func.func @transform_5(%arg0: i32) -> (i32, i32) {
    %c0_i32 = arith.constant 0 : i32
    %c0_i32_0 = arith.constant 0 : i32
    %c0_i32_1 = arith.constant 0 : i32
    return %c0_i32, %c0_i32_0 : i32, i32
  }
  func.func @transform_6(%arg0: i32) -> (i32, i32) {
    %c0_i32 = arith.constant 0 : i32
    %c0_i32_0 = arith.constant 0 : i32
    %c0_i32_1 = arith.constant 0 : i32
    return %c0_i32, %c0_i32_0 : i32, i32
  }
  func.func @transform_7(%arg0: i32) -> (i32, i32) {
    %c0_i32 = arith.constant 0 : i32
    %c0_i32_0 = arith.constant 0 : i32
    %c0_i32_1 = arith.constant 0 : i32
    return %c0_i32, %c0_i32_0 : i32, i32
  }
  func.func @transform_8(%arg0: i32) -> (i32, i32) {
    %c0_i32 = arith.constant 0 : i32
    %c0_i32_0 = arith.constant 0 : i32
    %c0_i32_1 = arith.constant 0 : i32
    return %c0_i32, %c0_i32_0 : i32, i32
  }
  func.func @transform_9(%arg0: i32) -> (i32, i32) {
    %c0_i32 = arith.constant 0 : i32
    %c0_i32_0 = arith.constant 0 : i32
    %c0_i32_1 = arith.constant 0 : i32
    return %c0_i32, %c0_i32_0 : i32, i32
  }
  func.func @transform_10(%arg0: i32) -> (i32, i32) {
    %c0_i32 = arith.constant 0 : i32
    %c0_i32_0 = arith.constant 0 : i32
    %c0_i32_1 = arith.constant 0 : i32
    return %c0_i32, %c0_i32_0 : i32, i32
  }
  func.func @transform_11(%arg0: i32) -> (i32, i32) {
    %c0_i32 = arith.constant 0 : i32
    %c0_i32_0 = arith.constant 0 : i32
    %c0_i32_1 = arith.constant 0 : i32
    return %c0_i32, %c0_i32_0 : i32, i32
  }
  func.func @transform_12(%arg0: i32) -> (i32, i32) {
    %c0_i32 = arith.constant 0 : i32
    %c0_i32_0 = arith.constant 0 : i32
    %c0_i32_1 = arith.constant 0 : i32
    return %c0_i32, %c0_i32_0 : i32, i32
  }
  func.func @transform_13(%arg0: i32) -> (i32, i32) {
    %c0_i32 = arith.constant 0 : i32
    %c0_i32_0 = arith.constant 0 : i32
    %c0_i32_1 = arith.constant 0 : i32
    return %c0_i32, %c0_i32_0 : i32, i32
  }
  func.func @transform_14(%arg0: i32) -> (i32, i32) {
    %c0_i32 = arith.constant 0 : i32
    %c0_i32_0 = arith.constant 0 : i32
    %c0_i32_1 = arith.constant 0 : i32
    return %c0_i32, %c0_i32_0 : i32, i32
  }
  func.func @transform_15(%arg0: i32) -> (i32, i32) {
    %c0_i32 = arith.constant 0 : i32
    %c0_i32_0 = arith.constant 0 : i32
    %c0_i32_1 = arith.constant 0 : i32
    return %c0_i32, %c0_i32_0 : i32, i32
  }
  func.func @transform_16(%arg0: i32) -> (i32, i32) {
    %c0_i32 = arith.constant 0 : i32
    %c0_i32_0 = arith.constant 0 : i32
    %c0_i32_1 = arith.constant 0 : i32
    return %c0_i32, %c0_i32_0 : i32, i32
  }
  func.func @transform_17(%arg0: i32) -> (i32, i32) {
    %c0_i32 = arith.constant 0 : i32
    %c0_i32_0 = arith.constant 0 : i32
    %c0_i32_1 = arith.constant 0 : i32
    return %c0_i32, %c0_i32_0 : i32, i32
  }
  func.func @transform_18(%arg0: i32) -> (i32, i32) {
    %c0_i32 = arith.constant 0 : i32
    %c0_i32_0 = arith.constant 0 : i32
    %c0_i32_1 = arith.constant 0 : i32
    return %c0_i32, %c0_i32_0 : i32, i32
  }
  func.func @transform_19(%arg0: i32) -> (i32, i32) {
    %c0_i32 = arith.constant 0 : i32
    %c0_i32_0 = arith.constant 0 : i32
    return %arg0, %c0_i32 : i32, i32
  }
}

</mosaic_0001>

<bundles_post_ra>
// kernel: tpu_custom_call.1
= control target key start
LH: loop header
LB: loop body
LE: loop exit
PB: predicated region body
PF: predicated region fallthrough
CT: control target
= control target key end

     0   :  { %s9461_s0 = inlined_call_operand.vmem [shape: f32[1024,16], index: 0, kind: input, shape index: {}]   ;;  %s9462_s1 = inlined_call_operand.vmem [shape: f32[16,512], index: 1, kind: input, shape index: {}]   ;;  %s9463_s2 = inlined_call_operand.vmem [shape: f32[256,256], index: 2, kind: input, shape index: {}]   ;;  %s9464_s3 = inlined_call_operand.vmem [shape: f32[256,4], index: 3, kind: input, shape index: {}]   ;;  %s9465_s4 = inlined_call_operand.vmem [shape: f32[4,256], index: 4, kind: input, shape index: {}]   ;;  %s9466_s5 = inlined_call_operand.vmem [shape: f32[1,4], index: 5, kind: input, shape index: {}]   ;;  %s9467_s6 = inlined_call_operand.vmem [shape: f32[1,4], index: 6, kind: input, shape index: {}]   ;;  %s9468_s7 = inlined_call_operand.vmem [shape: f32[256,128], index: 7, kind: input, shape index: {}]   ;;  %s9469_s8 = inlined_call_operand.vmem [shape: f32[128,8], index: 8, kind: input, shape index: {}]   ;;  %s9470_s9 = inlined_call_operand.vmem [shape: f32[8,128], index: 9, kind: input, shape index: {}]   ;;  %s9471_s10 = inlined_call_operand.vmem [shape: f32[1,8], index: 10, kind: input, shape index: {}]   ;;  %s9472_s11 = inlined_call_operand.vmem [shape: f32[1,8], index: 11, kind: input, shape index: {}]   ;;  %s9473_s12 = inlined_call_operand.vmem [shape: f32[128,128], index: 12, kind: input, shape index: {}]   ;;  %s9474_s13 = inlined_call_operand.vmem [shape: f32[128,16], index: 13, kind: input, shape index: {}]   ;;  %s9475_s14 = inlined_call_operand.vmem [shape: f32[16,128], index: 14, kind: input, shape index: {}]   ;;  %s9476_s15 = inlined_call_operand.vmem [shape: f32[1,16], index: 15, kind: input, shape index: {}]   ;;  %s9477_s16 = inlined_call_operand.vmem [shape: f32[1,16], index: 16, kind: input, shape index: {}]   ;;  %s9478_s17 = inlined_call_operand.vmem [shape: f32[128,128], index: 17, kind: input, shape index: {}]   ;;  %s9479_s18 = inlined_call_operand.vmem [shape: f32[1,128], index: 18, kind: input, shape index: {}]   ;;  %s9480_s19 = inlined_call_operand.hbm [shape: f32[256,128], index: 19, kind: output, shape index: {}]  }
   0x1   :  { %9496 = sst [smem:[#allocation15_spill]] %s9461_s0 }
   0x2   :  { %9497 = sst [smem:[#allocation16_spill]] %s9462_s1 }
   0x3   :  { %9498 = sst [smem:[#allocation17_spill]] %s9463_s2 }
   0x4   :  { %9499 = sst [smem:[#allocation18_spill]] %s9464_s3 }
   0x5   :  { %9500 = sst [smem:[#allocation19_spill]] %s9465_s4 }
   0x6   :  { %9501 = sst [smem:[#allocation20_spill]] %s9466_s5 }
   0x7   :  { %24 = vsyncpa [#allocation3], 0 }
   0x8   :  { %26 = vsyncpa [#allocation3 + $0x1], 0  ;;  %s7019_s0 = smov 0   ;;  %s7021_s30 = smov 0  }
   0x9   :  { %s7023_s20 = smov 0   ;;  %s7025_s21 = smov 0  }
   0xa LB: > { %9502 = sst [smem:[#allocation5_spill]] %s6900_s0  ;;  %s7040_s1 = sadd.s32 4294967295, %s6912_s21   ;;  %s6912_s21 = sphi %s7025_s21, %s9529_s21   ;;  %s6908_s20 = sphi %s7023_s20, %s9531_s20   ;;  %s6904_s30 = sphi %s7021_s30, %s9533_s30   ;;  %s6900_s0 = sphi %s7019_s0, %s9532_s0  }
   0xb   : > { %9503 = sst [smem:[#allocation6_spill]] %s6908_s20  ;;  %s5419_s22 = sadd.s32 4294967294, %s6912_s21  }
   0xc   : > { %9504 = sst [smem:[#allocation7_spill]] %s6912_s21  ;;  %s7044_s2 = sadd.s32 1, %s6912_s21  }
   0xd   : > { %9505 = sst [smem:[#allocation8_spill]] %s7044_s2  ;;  %s443_s23 = sadd.s32 1, %s6908_s20 }
   0xe   : > { %s440_s24 = ssub.s32 %s6912_s21, %s7044_s2  ;;  %p453_p0 = scmp.ne.s32.totalorder %s6908_s20, %s6904_s30 }
   0xf   : > { %p441_p1 = scmp.eq.s32.totalorder %s440_s24, 0  ;;  %p454_p2 = scmp.eq.s32.totalorder %s7040_s1, 1 }
  0x10   : > { %p459_p3 = scmp.ne.s32.totalorder %s6904_s30, %s6900_s0  ;;  %p460_p4 = scmp.eq.s32.totalorder %s5419_s22, 1 }
  0x11   : > { %s7055_s25 = scalar_select %p441_p1, %s6908_s20, %s443_s23  }
  0x12   : > { %p7057_p5 = por %p454_p2, %p453_p0  ;;  %p7061_p6 = por %p460_p4, %p459_p3 }
  0x13   : > { %9506 = sst [smem:[#allocation9_spill]] %s7055_s25  ;;  %p5422_p7 = scmp.ge.s32.totalorder %s6912_s21, 1 }
  0x14   : > { %s9508_s26 = scalar_select %p7061_p6, 1, 0 }
  0x15   : > { %p541_p8 = scmp.lt.s32.totalorder %s6912_s21, 3 }
  0x16   : > { %9509 = sst [smem:[#allocation10_spill]] %s9508_s26 }
  0x17   : > { %p542_p9 = pnand %p5422_p7, %p541_p8 }
  0x19   : > { %545 = sbr.rel (%p542_p9) target bundleno = 3022 (0xbce), region = 96 }
  0x20   : > { %s9510_s29 = sld [smem:[#allocation16_spill]]  ;;  %s5424_s20 = sshll.u32 %s7040_s1, 6  ;;  %v9490_v7 = vmov 0.0   ;;  %vm676_vm0 = vcmask 130048   ;;  %vm2731_vm1 = vcmask 1043456   ;;  %vm2634_vm2 = vcmask 31744  }
  0x21   : > { %933 = vmatprep.mubr.f32.mxu0 %v9490_v7  ;;  %1382 = vmatprep.mubr.f32.mxu1 %v9490_v7  ;;  %p598_p10 = scmp.lt.s32.totalorder %s5424_s20, 127  ;;  %s9511_s24 = sld [smem:[#allocation15_spill]] }
  0x22   : > { %s9512_s25 = sld [smem:[#allocation17_spill]]  ;;  %s9513_s21 = sld [smem:[#allocation18_spill]] }
  0x23   : > { %s9535_s20 = smov (!%p598_p10, %s5424_s20), 127  ;;  %s9519_s4 = sld [smem:[#allocation19_spill]] }
  0x24   : > { %s5425_s0 = sshll.u32 %s9535_s20, 3  ;;  %s9520_s5 = sld [smem:[#allocation20_spill]] }
  0x25   : > { %s6916_s26 = smov [#allocation2]  }
  0x26   : > { %v669_v0 = vld [vmem:[%s9510_s29 + $0x8] sm:$0xff]  ;;  %v671_v2 = vld [vmem:[%s9510_s29 + $0x18] sm:$0xff]  ;;  %v668_v5 = vld [vmem:[%s9510_s29] sm:$0xff] }
  0x27   : > { %v673_v1 = vld [vmem:[%s9510_s29 + $0x28] sm:$0xff]  ;;  %v675_v4 = vld [vmem:[%s9510_s29 + $0x38] sm:$0xff]  ;;  %v672_v6 = vld [vmem:[%s9510_s29 + $0x20] sm:$0xff]  ;;  %s7097_s27 = scalar_lea.vmem %s9511_s24, %s5425_s0  ;;  %s594_s0 = sand.u32 1, %s6904_s30  }
  0x28   : > { %v6362_v3 = vpack.c.bf16 %v673_v1, %v669_v0  ;;  %v6366_v8 = vpack.c.bf16 %v675_v4, %v671_v2  ;;  %v6364_v9 = vpack.c.bf16 %v672_v6, %v668_v5  ;;  %v670_v10 = vld [vmem:[%s9510_s29 + $0x10] sm:$0xff]  ;;  %v604_v13 = vld [vmem:[%s7097_s27] sm:$0xff]  ;;  %v605_v14 = vld [vmem:[%s7097_s27 + $0x8] sm:$0xff]  ;;  %s9514_s23 = smov %s9513_s21  ;;  %s5680_s24 = sshll.u32 %s7040_s1, 11 }
  0x29   : > { %v674_v11 = vld [vmem:[%s9510_s29 + $0x30] sm:$0xff]  ;;  %v607_v16 = vld [vmem:[%s7097_s27 + $0x18] sm:$0xff]  ;;  %v608_v17 = vld [vmem:[%s7097_s27 + $0x20] sm:$0xff]  ;;  %s9412_s2 = scalar_lea.hbm %s9480_s19, %s5680_s24 }
  0x2a   : > { %6363 = vmatprep.subr.bf16.mxu0 %v6362_v3  ;;  %v6368_v12 = vpack.c.bf16 %v674_v11, %v670_v10  ;;  %6367 = vmatprep.subr.bf16.mxu1 %v6366_v8  ;;  %v606_v15 = vld [vmem:[%s7097_s27 + $0x10] sm:$0xff]  ;;  %v609_v18 = vld [vmem:[%s7097_s27 + $0x28] sm:$0xff]  ;;  %v1994_v21 = vld [vmem:[%s9512_s25 + $0x18] sm:$0xff] }
  0x2b   : > { %6365 = vmatpush1.bf16.msra.mxu0 %v6364_v9  ;;  %v610_v19 = vld [vmem:[%s7097_s27 + $0x30] sm:$0xff]  ;;  %v1992_v20 = vld [vmem:[%s9512_s25 + $0x8] sm:$0xff]  ;;  %v1991_v22 = vld [vmem:[%s9512_s25] sm:$0xff] }
  0x2c   : > { %6369 = vmatpush1.bf16.msra.mxu1 %v6368_v12  ;;  %v611_v23 = vld [vmem:[%s7097_s27 + $0x38] sm:$0xff]  ;;  %v6370_v24 = vpack.c.bf16 %v1994_v21, %v1992_v20  ;;  %v1993_v25 = vld [vmem:[%s9512_s25 + $0x10] sm:$0xff]  ;;  %v612_v27 = vld [vmem:[%s7097_s27 + $0x40] sm:$0xff] }
  0x2d   : > { %v6372_v26 = vpack.c.bf16 %v1993_v25, %v1991_v22  ;;  %v613_v28 = vld [vmem:[%s7097_s27 + $0x48] sm:$0xff]  ;;  %v614_v29 = vld [vmem:[%s7097_s27 + $0x50] sm:$0xff]  ;;  %v1998_v31 = vld [vmem:[%s9512_s25 + $0x38] sm:$0xff] }
  0x2e   : > { %5426 = vmatmul.mubr.msk.f32.vlgmr.msra.gmra.mrb[0].mxu0 %vm676_vm0, %v604_v13  ;;  %6371 = vmatprep.subr.bf16.mxu0 %v6370_v24  ;;  %v1996_v30 = vld [vmem:[%s9512_s25 + $0x28] sm:$0xff]  ;;  %v1995_v32 = vld [vmem:[%s9512_s25 + $0x20] sm:$0xff]  ;;  %v615_v33 = vld [vmem:[%s7097_s27 + $0x58] sm:$0xff] }
  0x2f   : > { %5490 = vmatmul.mubr.msk.f32.vlgmr.msra.gmra.mrb[0].mxu1 %vm676_vm0, %v604_v13  ;;  %939 = vmatprep.mubr.f32.mxu0 %v9490_v7  ;;  %v6374_v34 = vpack.c.bf16 %v1998_v31, %v1996_v30  ;;  %v1997_v35 = vld [vmem:[%s9512_s25 + $0x30] sm:$0xff]  ;;  %v616_v37 = vld [vmem:[%s7097_s27 + $0x60] sm:$0xff]  ;;  %v617_v38 = vld [vmem:[%s7097_s27 + $0x68] sm:$0xff] }
  0x30   : > { %1388 = vmatprep.mubr.f32.mxu1 %v9490_v7  ;;  %6373 = vmatpush1.bf16.msra.mxu0 %v6372_v26  ;;  %v6376_v36 = vpack.c.bf16 %v1997_v35, %v1995_v32  ;;  %v618_v39 = vld [vmem:[%s7097_s27 + $0x70] sm:$0xff]  ;;  %v2000_v40 = vld [vmem:[%s9512_s25 + $0x48] sm:$0xff]  ;;  %v2002_v41 = vld [vmem:[%s9512_s25 + $0x58] sm:$0xff] }
  0x31   : > { %6375 = vmatprep.subr.bf16.mxu0 %v6374_v34  ;;  %v1999_v42 = vld [vmem:[%s9512_s25 + $0x40] sm:$0xff]  ;;  %v619_v43 = vld [vmem:[%s7097_s27 + $0x78] sm:$0xff]  ;;  %v6378_v44 = vpack.c.bf16 %v2002_v41, %v2000_v40  ;;  %v2001_v45 = vld [vmem:[%s9512_s25 + $0x50] sm:$0xff] }
  0x32   : > { %5427 = vmatmul.mubr.msk.f32.gmra.mrb[2].mxu0 %vm676_vm0, %v605_v14  ;;  %v6380_v46 = vpack.c.bf16 %v2001_v45, %v1999_v42  ;;  %v620_v47 = vld [vmem:[%s7097_s27 + $0x80] sm:$0xff]  ;;  %v621_v48 = vld [vmem:[%s7097_s27 + $0x88] sm:$0xff]  ;;  %v622_v49 = vld [vmem:[%s7097_s27 + $0x90] sm:$0xff] }
  0x33   : > { %5491 = vmatmul.mubr.msk.f32.gmra.mrb[2].mxu1 %vm676_vm0, %v605_v14  ;;  %945 = vmatprep.mubr.f32.mxu0 %v9490_v7  ;;  %v2004_v50 = vld [vmem:[%s9512_s25 + $0x68] sm:$0xff]  ;;  %v2006_v51 = vld [vmem:[%s9512_s25 + $0x78] sm:$0xff]  ;;  %v2003_v52 = vld [vmem:[%s9512_s25 + $0x60] sm:$0xff] }
  0x34   : > { %1394 = vmatprep.mubr.f32.mxu1 %v9490_v7  ;;  %6377 = vmatpush1.bf16.msra.mxu0 %v6376_v36  ;;  %v623_v53 = vld [vmem:[%s7097_s27 + $0x98] sm:$0xff]  ;;  %v6382_v54 = vpack.c.bf16 %v2006_v51, %v2004_v50  ;;  %v2005_v55 = vld [vmem:[%s9512_s25 + $0x70] sm:$0xff]  ;;  %v624_v57 = vld [vmem:[%s7097_s27 + $0xa0] sm:$0xff] }
  0x35   : > { %6379 = vmatprep.subr.bf16.mxu0 %v6378_v44  ;;  %v6384_v56 = vpack.c.bf16 %v2005_v55, %v2003_v52  ;;  %v625_v58 = vld [vmem:[%s7097_s27 + $0xa8] sm:$0xff]  ;;  %v626_v59 = vld [vmem:[%s7097_s27 + $0xb0] sm:$0xff]  ;;  %v627_v60 = vld [vmem:[%s7097_s27 + $0xb8] sm:$0xff] }
  0x36   : > { %5428 = vmatmul.mubr.msk.f32.gmra.mrb[4].mxu0 %vm676_vm0, %v606_v15  ;;  %v2008_v61 = vld [vmem:[%s9512_s25 + $0x88] sm:$0xff]  ;;  %v2010_v62 = vld [vmem:[%s9512_s25 + $0x98] sm:$0xff]  ;;  %v2007_v63 = vld [vmem:[%s9512_s25 + $0x80] sm:$0xff] }
  0x37   : > { %5492 = vmatmul.mubr.msk.f32.gmra.mrb[4].mxu1 %vm676_vm0, %v606_v15  ;;  %951 = vmatprep.mubr.f32.mxu0 %v9490_v7  ;;  %v6386_v0 = vpack.c.bf16 %v2010_v62, %v2008_v61  ;;  %v2009_v1 = vld [vmem:[%s9512_s25 + $0x90] sm:$0xff]  ;;  %v628_v3 = vld [vmem:[%s7097_s27 + $0xc0] sm:$0xff]  ;;  %v629_v4 = vld [vmem:[%s7097_s27 + $0xc8] sm:$0xff] }
  0x38   : > { %1400 = vmatprep.mubr.f32.mxu1 %v9490_v7  ;;  %6381 = vmatpush1.bf16.msra.mxu0 %v6380_v46  ;;  %v6388_v2 = vpack.c.bf16 %v2009_v1, %v2007_v63  ;;  %v630_v5 = vld [vmem:[%s7097_s27 + $0xd0] sm:$0xff]  ;;  %v631_v6 = vld [vmem:[%s7097_s27 + $0xd8] sm:$0xff]  ;;  %v2012_v8 = vld [vmem:[%s9512_s25 + $0xa8] sm:$0xff] }
  0x39   : > { %6383 = vmatprep.subr.bf16.mxu0 %v6382_v54  ;;  %v2014_v9 = vld [vmem:[%s9512_s25 + $0xb8] sm:$0xff]  ;;  %v2011_v10 = vld [vmem:[%s9512_s25 + $0xa0] sm:$0xff]  ;;  %v2013_v12 = vld [vmem:[%s9512_s25 + $0xb0] sm:$0xff] }
  0x3a   : > { %5429 = vmatmul.mubr.msk.f32.gmra.mrb[6].mxu0 %vm676_vm0, %v607_v16  ;;  %v6390_v11 = vpack.c.bf16 %v2014_v9, %v2012_v8  ;;  %v6392_v13 = vpack.c.bf16 %v2013_v12, %v2011_v10  ;;  %v632_v14 = vld [vmem:[%s7097_s27 + $0xe0] sm:$0xff]  ;;  %v633_v15 = vld [vmem:[%s7097_s27 + $0xe8] sm:$0xff]  ;;  %v2017_v22 = vld [vmem:[%s9512_s25 + $0xd0] sm:$0xff] }
  0x3b   : > { %5493 = vmatmul.mubr.msk.f32.gmra.mrb[6].mxu1 %vm676_vm0, %v607_v16  ;;  %957 = vmatprep.mubr.f32.mxu0 %v9490_v7  ;;  %v634_v16 = vld [vmem:[%s7097_s27 + $0xf0] sm:$0xff]  ;;  %v2015_v20 = vld [vmem:[%s9512_s25 + $0xc0] sm:$0xff]  ;;  %v637_v25 = vld [vmem:[%s7097_s27 + $0x108] sm:$0xff] }
  0x3c   : > { %1406 = vmatprep.mubr.f32.mxu1 %v9490_v7  ;;  %6385 = vmatpush1.bf16.msra.mxu0 %v6384_v56  ;;  %v636_v24 = vld [vmem:[%s7097_s27 + $0x100] sm:$0xff]  ;;  %v638_v26 = vld [vmem:[%s7097_s27 + $0x110] sm:$0xff]  ;;  %v641_v35 = vld [vmem:[%s7097_s27 + $0x128] sm:$0xff] }
  0x3d   : > { %6387 = vmatprep.subr.bf16.mxu0 %v6386_v0  ;;  %v2019_v30 = vld [vmem:[%s9512_s25 + $0xe0] sm:$0xff]  ;;  %v2021_v32 = vld [vmem:[%s9512_s25 + $0xf0] sm:$0xff]  ;;  %v645_v45 = vld [vmem:[%s7097_s27 + $0x148] sm:$0xff] }
  0x3e   : > { %5430 = vmatmul.mubr.msk.f32.gmra.mrb[8].mxu0 %vm676_vm0, %v608_v17  ;;  %v640_v34 = vld [vmem:[%s7097_s27 + $0x120] sm:$0xff]  ;;  %v642_v36 = vld [vmem:[%s7097_s27 + $0x130] sm:$0xff]  ;;  %v649_v55 = vld [vmem:[%s7097_s27 + $0x168] sm:$0xff] }
  0x3f   : > { %5494 = vmatmul.mubr.msk.f32.gmra.mrb[8].mxu1 %vm676_vm0, %v608_v17  ;;  %963 = vmatprep.mubr.f32.mxu0 %v9490_v7  ;;  %v635_v17 = vld [vmem:[%s7097_s27 + $0xf8] sm:$0xff]  ;;  %v2023_v40 = vld [vmem:[%s9512_s25 + $0x100] sm:$0xff]  ;;  %v2025_v42 = vld [vmem:[%s9512_s25 + $0x110] sm:$0xff] }
  0x40   : > { %1412 = vmatprep.mubr.f32.mxu1 %v9490_v7  ;;  %6389 = vmatpush1.bf16.msra.mxu0 %v6388_v2  ;;  %v644_v44 = vld [vmem:[%s7097_s27 + $0x140] sm:$0xff]  ;;  %v646_v46 = vld [vmem:[%s7097_s27 + $0x150] sm:$0xff]  ;;  %v653_v1 = vld [vmem:[%s7097_s27 + $0x188] sm:$0xff] }
  0x41   : > { %6391 = vmatprep.subr.bf16.mxu0 %v6390_v11  ;;  %v2027_v50 = vld [vmem:[%s9512_s25 + $0x120] sm:$0xff]  ;;  %v2029_v52 = vld [vmem:[%s9512_s25 + $0x130] sm:$0xff]  ;;  %v657_v12 = vld [vmem:[%s7097_s27 + $0x1a8] sm:$0xff] }
  0x42   : > { %5431 = vmatmul.mubr.msk.f32.gmra.mrb[10].mxu0 %vm676_vm0, %v609_v18  ;;  %v648_v54 = vld [vmem:[%s7097_s27 + $0x160] sm:$0xff]  ;;  %v650_v56 = vld [vmem:[%s7097_s27 + $0x170] sm:$0xff] }
  0x43   : > { %5495 = vmatmul.mubr.msk.f32.gmra.mrb[10].mxu1 %vm676_vm0, %v609_v18  ;;  %969 = vmatprep.mubr.f32.mxu0 %v9490_v7  ;;  %v2016_v18 = vld [vmem:[%s9512_s25 + $0xc8] sm:$0xff]  ;;  %v2033_v62 = vld [vmem:[%s9512_s25 + $0x150] sm:$0xff]  ;;  %v652_v63 = vld [vmem:[%s7097_s27 + $0x180] sm:$0xff] }
  0x44   : > { %1418 = vmatprep.mubr.f32.mxu1 %v9490_v7  ;;  %6393 = vmatpush1.bf16.msra.mxu0 %v6392_v13  ;;  %v654_v2 = vld [vmem:[%s7097_s27 + $0x190] sm:$0xff]  ;;  %v656_v10 = vld [vmem:[%s7097_s27 + $0x1a0] sm:$0xff] }
  0x45   : > { %v2037_v9 = vld [vmem:[%s9512_s25 + $0x170] sm:$0xff] }
  0x46   : > { %5432 = vmatmul.mubr.msk.f32.gmra.mrb[12].mxu0 %vm676_vm0, %v610_v19 }
  0x47   : > { %5496 = vmatmul.mubr.msk.f32.gmra.mrb[12].mxu1 %vm676_vm0, %v610_v19  ;;  %975 = vmatprep.mubr.f32.mxu0 %v9490_v7  ;;  %v2018_v19 = vld [vmem:[%s9512_s25 + $0xd8] sm:$0xff] }
  0x48   : > { %1424 = vmatprep.mubr.f32.mxu1 %v9490_v7  ;;  %v6394_v21 = vpack.c.bf16 %v2018_v19, %v2016_v18  ;;  %v658_v19 = vld [vmem:[%s7097_s27 + $0x1b0] sm:$0xff] }
  0x4a   : > { %5433 = vmatmul.mubr.msk.f32.gmra.mrb[14].mxu0 %vm676_vm0, %v611_v23  ;;  %6395 = vmatprep.subr.bf16.mxu0 %v6394_v21 }
  0x4b   : > { %5497 = vmatmul.mubr.msk.f32.gmra.mrb[14].mxu1 %vm676_vm0, %v611_v23  ;;  %981 = vmatprep.mubr.f32.mxu0 %v9490_v7  ;;  %v6396_v23 = vpack.c.bf16 %v2017_v22, %v2015_v20 }
  0x4c   : > { %1430 = vmatprep.mubr.f32.mxu1 %v9490_v7 }
  0x4d   : > { %6397 = vmatpush1.bf16.msra.mxu0 %v6396_v23 }
  0x4e   : > { %5434 = vmatmul.mubr.msk.f32.gmra.mrb[16].mxu0 %vm676_vm0, %v612_v27 }
  0x4f   : > { %5498 = vmatmul.mubr.msk.f32.gmra.mrb[16].mxu1 %vm676_vm0, %v612_v27  ;;  %987 = vmatprep.mubr.f32.mxu0 %v9490_v7  ;;  %v639_v27 = vld [vmem:[%s7097_s27 + $0x118] sm:$0xff] }
  0x50   : > { %1436 = vmatprep.mubr.f32.mxu1 %v9490_v7 }
  0x52   : > { %5435 = vmatmul.mubr.msk.f32.gmra.mrb[18].mxu0 %vm676_vm0, %v613_v28 }
  0x53   : > { %5499 = vmatmul.mubr.msk.f32.gmra.mrb[18].mxu1 %vm676_vm0, %v613_v28  ;;  %993 = vmatprep.mubr.f32.mxu0 %v9490_v7  ;;  %v2020_v28 = vld [vmem:[%s9512_s25 + $0xe8] sm:$0xff] }
  0x54   : > { %1442 = vmatprep.mubr.f32.mxu1 %v9490_v7 }
  0x56   : > { %5436 = vmatmul.mubr.msk.f32.gmra.mrb[20].mxu0 %vm676_vm0, %v614_v29 }
  0x57   : > { %5500 = vmatmul.mubr.msk.f32.gmra.mrb[20].mxu1 %vm676_vm0, %v614_v29  ;;  %999 = vmatprep.mubr.f32.mxu0 %v9490_v7  ;;  %v2022_v29 = vld [vmem:[%s9512_s25 + $0xf8] sm:$0xff] }
  0x58   : > { %1448 = vmatprep.mubr.f32.mxu1 %v9490_v7  ;;  %v6398_v31 = vpack.c.bf16 %v2022_v29, %v2020_v28  ;;  %v2040_v29 = vld [vmem:[%s9512_s25 + $0x188] sm:$0xff] }
  0x5a   : > { %5437 = vmatmul.mubr.msk.f32.gmra.mrb[22].mxu0 %vm676_vm0, %v615_v33  ;;  %6399 = vmatprep.subr.bf16.mxu0 %v6398_v31  ;;  %v2039_v31 = vld [vmem:[%s9512_s25 + $0x180] sm:$0xff] }
  0x5b   : > { %5501 = vmatmul.mubr.msk.f32.gmra.mrb[22].mxu1 %vm676_vm0, %v615_v33  ;;  %1005 = vmatprep.mubr.f32.mxu0 %v9490_v7  ;;  %v6400_v33 = vpack.c.bf16 %v2021_v32, %v2019_v30  ;;  %v2042_v30 = vld [vmem:[%s9512_s25 + $0x198] sm:$0xff] }
  0x5c   : > { %1454 = vmatprep.mubr.f32.mxu1 %v9490_v7 }
  0x5d   : > { %6401 = vmatpush1.bf16.msra.mxu0 %v6400_v33 }
  0x5e   : > { %5438 = vmatmul.mubr.msk.f32.gmra.mrb[24].mxu0 %vm676_vm0, %v616_v37 }
  0x5f   : > { %5502 = vmatmul.mubr.msk.f32.gmra.mrb[24].mxu1 %vm676_vm0, %v616_v37  ;;  %1011 = vmatprep.mubr.f32.mxu0 %v9490_v7  ;;  %v643_v37 = vld [vmem:[%s7097_s27 + $0x138] sm:$0xff] }
  0x60   : > { %1460 = vmatprep.mubr.f32.mxu1 %v9490_v7 }
  0x62   : > { %5439 = vmatmul.mubr.msk.f32.gmra.mrb[26].mxu0 %vm676_vm0, %v617_v38 }
  0x63   : > { %5503 = vmatmul.mubr.msk.f32.gmra.mrb[26].mxu1 %vm676_vm0, %v617_v38  ;;  %1017 = vmatprep.mubr.f32.mxu0 %v9490_v7  ;;  %v2024_v38 = vld [vmem:[%s9512_s25 + $0x108] sm:$0xff] }
  0x64   : > { %1466 = vmatprep.mubr.f32.mxu1 %v9490_v7 }
  0x66   : > { %5440 = vmatmul.mubr.msk.f32.gmra.mrb[28].mxu0 %vm676_vm0, %v618_v39 }
  0x67   : > { %5504 = vmatmul.mubr.msk.f32.gmra.mrb[28].mxu1 %vm676_vm0, %v618_v39  ;;  %1023 = vmatprep.mubr.f32.mxu0 %v9490_v7  ;;  %v2026_v39 = vld [vmem:[%s9512_s25 + $0x118] sm:$0xff] }
  0x68   : > { %1472 = vmatprep.mubr.f32.mxu1 %v9490_v7  ;;  %v6402_v41 = vpack.c.bf16 %v2026_v39, %v2024_v38  ;;  %v660_v38 = vld [vmem:[%s7097_s27 + $0x1c0] sm:$0xff] }
  0x6a   : > { %5441 = vmatmul.mubr.msk.f32.gmra.mrb[30].mxu0 %vm676_vm0, %v619_v43  ;;  %6403 = vmatprep.subr.bf16.mxu0 %v6402_v41 }
  0x6b   : > { %5505 = vmatmul.mubr.msk.f32.gmra.mrb[30].mxu1 %vm676_vm0, %v619_v43  ;;  %1029 = vmatprep.mubr.f32.mxu0 %v9490_v7  ;;  %v6404_v43 = vpack.c.bf16 %v2025_v42, %v2023_v40 }
  0x6c   : > { %1478 = vmatprep.mubr.f32.mxu1 %v9490_v7 }
  0x6d   : > { %6405 = vmatpush1.bf16.msra.mxu0 %v6404_v43 }
  0x6e   : > { %5442 = vmatmul.mubr.msk.f32.gmra.mrb[32].mxu0 %vm676_vm0, %v620_v47 }
  0x6f   : > { %5506 = vmatmul.mubr.msk.f32.gmra.mrb[32].mxu1 %vm676_vm0, %v620_v47  ;;  %1035 = vmatprep.mubr.f32.mxu0 %v9490_v7  ;;  %v647_v47 = vld [vmem:[%s7097_s27 + $0x158] sm:$0xff] }
  0x70   : > { %1484 = vmatprep.mubr.f32.mxu1 %v9490_v7 }
  0x72   : > { %5443 = vmatmul.mubr.msk.f32.gmra.mrb[34].mxu0 %vm676_vm0, %v621_v48 }
  0x73   : > { %5507 = vmatmul.mubr.msk.f32.gmra.mrb[34].mxu1 %vm676_vm0, %v621_v48  ;;  %1041 = vmatprep.mubr.f32.mxu0 %v9490_v7  ;;  %v2028_v48 = vld [vmem:[%s9512_s25 + $0x128] sm:$0xff] }
  0x74   : > { %1490 = vmatprep.mubr.f32.mxu1 %v9490_v7 }
  0x76   : > { %5444 = vmatmul.mubr.msk.f32.gmra.mrb[36].mxu0 %vm676_vm0, %v622_v49 }
  0x77   : > { %5508 = vmatmul.mubr.msk.f32.gmra.mrb[36].mxu1 %vm676_vm0, %v622_v49  ;;  %1047 = vmatprep.mubr.f32.mxu0 %v9490_v7  ;;  %v2030_v49 = vld [vmem:[%s9512_s25 + $0x138] sm:$0xff] }
  0x78   : > { %1496 = vmatprep.mubr.f32.mxu1 %v9490_v7  ;;  %v6406_v51 = vpack.c.bf16 %v2030_v49, %v2028_v48 }
  0x7a   : > { %5445 = vmatmul.mubr.msk.f32.gmra.mrb[38].mxu0 %vm676_vm0, %v623_v53  ;;  %6407 = vmatprep.subr.bf16.mxu0 %v6406_v51 }
  0x7b   : > { %5509 = vmatmul.mubr.msk.f32.gmra.mrb[38].mxu1 %vm676_vm0, %v623_v53  ;;  %1053 = vmatprep.mubr.f32.mxu0 %v9490_v7  ;;  %v6408_v53 = vpack.c.bf16 %v2029_v52, %v2027_v50 }
  0x7c   : > { %1502 = vmatprep.mubr.f32.mxu1 %v9490_v7 }
  0x7d   : > { %6409 = vmatpush1.bf16.msra.mxu0 %v6408_v53  ;;  %v662_v53 = vld [vmem:[%s7097_s27 + $0x1d0] sm:$0xff] }
  0x7e   : > { %5446 = vmatmul.mubr.msk.f32.gmra.mrb[40].mxu0 %vm676_vm0, %v624_v57 }
  0x7f   : > { %5510 = vmatmul.mubr.msk.f32.gmra.mrb[40].mxu1 %vm676_vm0, %v624_v57  ;;  %1059 = vmatprep.mubr.f32.mxu0 %v9490_v7  ;;  %v651_v57 = vld [vmem:[%s7097_s27 + $0x178] sm:$0xff] }
  0x80   : > { %1508 = vmatprep.mubr.f32.mxu1 %v9490_v7 }
  0x82   : > { %5447 = vmatmul.mubr.msk.f32.gmra.mrb[42].mxu0 %vm676_vm0, %v625_v58 }
  0x83   : > { %5511 = vmatmul.mubr.msk.f32.gmra.mrb[42].mxu1 %vm676_vm0, %v625_v58  ;;  %1065 = vmatprep.mubr.f32.mxu0 %v9490_v7  ;;  %v2032_v58 = vld [vmem:[%s9512_s25 + $0x148] sm:$0xff] }
  0x84   : > { %1514 = vmatprep.mubr.f32.mxu1 %v9490_v7 }
  0x86   : > { %5448 = vmatmul.mubr.msk.f32.gmra.mrb[44].mxu0 %vm676_vm0, %v626_v59 }
  0x87   : > { %5512 = vmatmul.mubr.msk.f32.gmra.mrb[44].mxu1 %vm676_vm0, %v626_v59  ;;  %1071 = vmatprep.mubr.f32.mxu0 %v9490_v7  ;;  %v2034_v59 = vld [vmem:[%s9512_s25 + $0x158] sm:$0xff] }
  0x88   : > { %1520 = vmatprep.mubr.f32.mxu1 %v9490_v7  ;;  %v6410_v61 = vpack.c.bf16 %v2034_v59, %v2032_v58 }
  0x8a   : > { %5449 = vmatmul.mubr.msk.f32.gmra.mrb[46].mxu0 %vm676_vm0, %v627_v60  ;;  %6411 = vmatprep.subr.bf16.mxu0 %v6410_v61 }
  0x8b   : > { %5513 = vmatmul.mubr.msk.f32.gmra.mrb[46].mxu1 %vm676_vm0, %v627_v60  ;;  %1077 = vmatprep.mubr.f32.mxu0 %v9490_v7  ;;  %v2031_v60 = vld [vmem:[%s9512_s25 + $0x140] sm:$0xff] }
  0x8c   : > { %1526 = vmatprep.mubr.f32.mxu1 %v9490_v7  ;;  %v6412_v0 = vpack.c.bf16 %v2033_v62, %v2031_v60  ;;  %v663_v60 = vld [vmem:[%s7097_s27 + $0x1d8] sm:$0xff] }
  0x8e   : > { %5450 = vmatmul.mubr.msk.f32.gmra.mrb[48].mxu0 %vm676_vm0, %v628_v3 }
  0x8f   : > { %5514 = vmatmul.mubr.msk.f32.gmra.mrb[48].mxu1 %vm676_vm0, %v628_v3  ;;  %1083 = vmatprep.mubr.f32.mxu0 %v9490_v7  ;;  %v655_v3 = vld [vmem:[%s7097_s27 + $0x198] sm:$0xff] }
  0x90   : > { %1532 = vmatprep.mubr.f32.mxu1 %v9490_v7  ;;  %6413 = vmatpush1.bf16.msra.mxu0 %v6412_v0  ;;  %v2046_v0 = vld [vmem:[%s9512_s25 + $0x1b8] sm:$0xff] }
  0x92   : > { %5451 = vmatmul.mubr.msk.f32.gmra.mrb[50].mxu0 %vm676_vm0, %v629_v4 }
  0x93   : > { %5515 = vmatmul.mubr.msk.f32.gmra.mrb[50].mxu1 %vm676_vm0, %v629_v4  ;;  %1089 = vmatprep.mubr.f32.mxu0 %v9490_v7  ;;  %v2036_v4 = vld [vmem:[%s9512_s25 + $0x168] sm:$0xff] }
  0x94   : > { %1538 = vmatprep.mubr.f32.mxu1 %v9490_v7 }
  0x96   : > { %5452 = vmatmul.mubr.msk.f32.gmra.mrb[52].mxu0 %vm676_vm0, %v630_v5 }
  0x97   : > { %5516 = vmatmul.mubr.msk.f32.gmra.mrb[52].mxu1 %vm676_vm0, %v630_v5  ;;  %1095 = vmatprep.mubr.f32.mxu0 %v9490_v7  ;;  %v2038_v5 = vld [vmem:[%s9512_s25 + $0x178] sm:$0xff] }
  0x98   : > { %1544 = vmatprep.mubr.f32.mxu1 %v9490_v7  ;;  %v6414_v8 = vpack.c.bf16 %v2038_v5, %v2036_v4 }
  0x9a   : > { %5453 = vmatmul.mubr.msk.f32.gmra.mrb[54].mxu0 %vm676_vm0, %v631_v6  ;;  %6415 = vmatprep.subr.bf16.mxu0 %v6414_v8 }
  0x9b   : > { %5517 = vmatmul.mubr.msk.f32.gmra.mrb[54].mxu1 %vm676_vm0, %v631_v6  ;;  %1101 = vmatprep.mubr.f32.mxu0 %v9490_v7  ;;  %v2035_v6 = vld [vmem:[%s9512_s25 + $0x160] sm:$0xff] }
  0x9c   : > { %1550 = vmatprep.mubr.f32.mxu1 %v9490_v7  ;;  %v6416_v11 = vpack.c.bf16 %v2037_v9, %v2035_v6  ;;  %v2045_v6 = vld [vmem:[%s9512_s25 + $0x1b0] sm:$0xff]  ;;  %v664_v9 = vld [vmem:[%s7097_s27 + $0x1e0] sm:$0xff] }
  0x9e   : > { %5454 = vmatmul.mubr.msk.f32.gmra.mrb[56].mxu0 %vm676_vm0, %v632_v14 }
  0x9f   : > { %5518 = vmatmul.mubr.msk.f32.gmra.mrb[56].mxu1 %vm676_vm0, %v632_v14  ;;  %1107 = vmatprep.mubr.f32.mxu0 %v9490_v7 }
  0xa0   : > { %1556 = vmatprep.mubr.f32.mxu1 %v9490_v7  ;;  %6417 = vmatpush1.bf16.msra.mxu0 %v6416_v11 }
  0xa2   : > { %5455 = vmatmul.mubr.msk.f32.gmra.mrb[58].mxu0 %vm676_vm0, %v633_v15 }
  0xa3   : > { %5519 = vmatmul.mubr.msk.f32.gmra.mrb[58].mxu1 %vm676_vm0, %v633_v15  ;;  %1113 = vmatprep.mubr.f32.mxu0 %v9490_v7 }
  0xa4   : > { %1562 = vmatprep.mubr.f32.mxu1 %v9490_v7 }
  0xa6   : > { %5456 = vmatmul.mubr.msk.f32.gmra.mrb[60].mxu0 %vm676_vm0, %v634_v16 }
  0xa7   : > { %5520 = vmatmul.mubr.msk.f32.gmra.mrb[60].mxu1 %vm676_vm0, %v634_v16  ;;  %1119 = vmatprep.mubr.f32.mxu0 %v9490_v7 }
  0xa8   : > { %1568 = vmatprep.mubr.f32.mxu1 %v9490_v7 }
  0xaa   : > { %5457 = vmatmul.mubr.msk.f32.gmra.mrb[62].mxu0 %vm676_vm0, %v635_v17 }
  0xab   : > { %5521 = vmatmul.mubr.msk.f32.gmra.mrb[62].mxu1 %vm676_vm0, %v635_v17  ;;  %1125 = vmatprep.mubr.f32.mxu0 %v9490_v7 }
  0xac   : > { %1574 = vmatprep.mubr.f32.mxu1 %v9490_v7 }
  0xae   : > { %5458 = vmatmul.mubr.msk.f32.gmra.mrb[64].mxu0 %vm676_vm0, %v636_v24 }
  0xaf   : > { %5522 = vmatmul.mubr.msk.f32.gmra.mrb[64].mxu1 %vm676_vm0, %v636_v24  ;;  %1131 = vmatprep.mubr.f32.mxu0 %v9490_v7 }
  0xb0   : > { %1580 = vmatprep.mubr.f32.mxu1 %v9490_v7 }
  0xb2   : > { %5459 = vmatmul.mubr.msk.f32.gmra.mrb[66].mxu0 %vm676_vm0, %v637_v25 }
  0xb3   : > { %5523 = vmatmul.mubr.msk.f32.gmra.mrb[66].mxu1 %vm676_vm0, %v637_v25  ;;  %1137 = vmatprep.mubr.f32.mxu0 %v9490_v7 }
  0xb4   : > { %1586 = vmatprep.mubr.f32.mxu1 %v9490_v7 }
  0xb6   : > { %5460 = vmatmul.mubr.msk.f32.gmra.mrb[68].mxu0 %vm676_vm0, %v638_v26 }
  0xb7   : > { %5524 = vmatmul.mubr.msk.f32.gmra.mrb[68].mxu1 %vm676_vm0, %v638_v26  ;;  %1143 = vmatprep.mubr.f32.mxu0 %v9490_v7  ;;  %v659_v26 = vld [vmem:[%s7097_s27 + $0x1b8] sm:$0xff] }
  0xb8   : > { %1592 = vmatprep.mubr.f32.mxu1 %v9490_v7 }
  0xba   : > { %5461 = vmatmul.mubr.msk.f32.gmra.mrb[70].mxu0 %vm676_vm0, %v639_v27 }
  0xbb   : > { %5525 = vmatmul.mubr.msk.f32.gmra.mrb[70].mxu1 %vm676_vm0, %v639_v27  ;;  %1149 = vmatprep.mubr.f32.mxu0 %v9490_v7 }
  0xbc   : > { %1598 = vmatprep.mubr.f32.mxu1 %v9490_v7 }
  0xbe   : > { %5462 = vmatmul.mubr.msk.f32.gmra.mrb[72].mxu0 %vm676_vm0, %v640_v34 }
  0xbf   : > { %5526 = vmatmul.mubr.msk.f32.gmra.mrb[72].mxu1 %vm676_vm0, %v640_v34  ;;  %1155 = vmatprep.mubr.f32.mxu0 %v9490_v7 }
  0xc0   : > { %1604 = vmatprep.mubr.f32.mxu1 %v9490_v7 }
  0xc2   : > { %5463 = vmatmul.mubr.msk.f32.gmra.mrb[74].mxu0 %vm676_vm0, %v641_v35 }
  0xc3   : > { %5527 = vmatmul.mubr.msk.f32.gmra.mrb[74].mxu1 %vm676_vm0, %v641_v35  ;;  %1161 = vmatprep.mubr.f32.mxu0 %v9490_v7  ;;  %v6418_v35 = vpack.c.bf16 %v2042_v30, %v2040_v29 }
  0xc4   : > { %1610 = vmatprep.mubr.f32.mxu1 %v9490_v7 }
  0xc5   : > { %6419 = vmatprep.subr.bf16.mxu0 %v6418_v35 }
  0xc6   : > { %5464 = vmatmul.mubr.msk.f32.gmra.mrb[76].mxu0 %vm676_vm0, %v642_v36 }
  0xc7   : > { %5528 = vmatmul.mubr.msk.f32.gmra.mrb[76].mxu1 %vm676_vm0, %v642_v36  ;;  %1167 = vmatprep.mubr.f32.mxu0 %v9490_v7  ;;  %v2041_v36 = vld [vmem:[%s9512_s25 + $0x190] sm:$0xff] }
  0xc8   : > { %1616 = vmatprep.mubr.f32.mxu1 %v9490_v7  ;;  %v6420_v39 = vpack.c.bf16 %v2041_v36, %v2039_v31 }
  0xca   : > { %5465 = vmatmul.mubr.msk.f32.gmra.mrb[78].mxu0 %vm676_vm0, %v643_v37 }
  0xcb   : > { %5529 = vmatmul.mubr.msk.f32.gmra.mrb[78].mxu1 %vm676_vm0, %v643_v37  ;;  %1173 = vmatprep.mubr.f32.mxu0 %v9490_v7 }
  0xcc   : > { %1622 = vmatprep.mubr.f32.mxu1 %v9490_v7  ;;  %6421 = vmatpush1.bf16.msra.mxu0 %v6420_v39 }
  0xce   : > { %5466 = vmatmul.mubr.msk.f32.gmra.mrb[80].mxu0 %vm676_vm0, %v644_v44 }
  0xcf   : > { %5530 = vmatmul.mubr.msk.f32.gmra.mrb[80].mxu1 %vm676_vm0, %v644_v44  ;;  %1179 = vmatprep.mubr.f32.mxu0 %v9490_v7 }
  0xd0   : > { %1628 = vmatprep.mubr.f32.mxu1 %v9490_v7 }
  0xd2   : > { %5467 = vmatmul.mubr.msk.f32.gmra.mrb[82].mxu0 %vm676_vm0, %v645_v45 }
  0xd3   : > { %5531 = vmatmul.mubr.msk.f32.gmra.mrb[82].mxu1 %vm676_vm0, %v645_v45  ;;  %1185 = vmatprep.mubr.f32.mxu0 %v9490_v7 }
  0xd4   : > { %1634 = vmatprep.mubr.f32.mxu1 %v9490_v7 }
  0xd6   : > { %5468 = vmatmul.mubr.msk.f32.gmra.mrb[84].mxu0 %vm676_vm0, %v646_v46 }
  0xd7   : > { %5532 = vmatmul.mubr.msk.f32.gmra.mrb[84].mxu1 %vm676_vm0, %v646_v46  ;;  %1191 = vmatprep.mubr.f32.mxu0 %v9490_v7  ;;  %v661_v46 = vld [vmem:[%s7097_s27 + $0x1c8] sm:$0xff] }
  0xd8   : > { %1640 = vmatprep.mubr.f32.mxu1 %v9490_v7 }
  0xda   : > { %5469 = vmatmul.mubr.msk.f32.gmra.mrb[86].mxu0 %vm676_vm0, %v647_v47 }
  0xdb   : > { %5533 = vmatmul.mubr.msk.f32.gmra.mrb[86].mxu1 %vm676_vm0, %v647_v47  ;;  %1197 = vmatprep.mubr.f32.mxu0 %v9490_v7 }
  0xdc   : > { %1646 = vmatprep.mubr.f32.mxu1 %v9490_v7 }
  0xde   : > { %5470 = vmatmul.mubr.msk.f32.gmra.mrb[88].mxu0 %vm676_vm0, %v648_v54 }
  0xdf   : > { %5534 = vmatmul.mubr.msk.f32.gmra.mrb[88].mxu1 %vm676_vm0, %v648_v54  ;;  %1203 = vmatprep.mubr.f32.mxu0 %v9490_v7 }
  0xe0   : > { %1652 = vmatprep.mubr.f32.mxu1 %v9490_v7 }
  0xe2   : > { %5471 = vmatmul.mubr.msk.f32.gmra.mrb[90].mxu0 %vm676_vm0, %v649_v55 }
  0xe3   : > { %5535 = vmatmul.mubr.msk.f32.gmra.mrb[90].mxu1 %vm676_vm0, %v649_v55  ;;  %1209 = vmatprep.mubr.f32.mxu0 %v9490_v7 }
  0xe4   : > { %1658 = vmatprep.mubr.f32.mxu1 %v9490_v7 }
  0xe6   : > { %5472 = vmatmul.mubr.msk.f32.gmra.mrb[92].mxu0 %vm676_vm0, %v650_v56 }
  0xe7   : > { %5536 = vmatmul.mubr.msk.f32.gmra.mrb[92].mxu1 %vm676_vm0, %v650_v56  ;;  %1215 = vmatprep.mubr.f32.mxu0 %v9490_v7 }
  0xe8   : > { %1664 = vmatprep.mubr.f32.mxu1 %v9490_v7 }
  0xea   : > { %5473 = vmatmul.mubr.msk.f32.gmra.mrb[94].mxu0 %vm676_vm0, %v651_v57 }
  0xeb   : > { %5537 = vmatmul.mubr.msk.f32.gmra.mrb[94].mxu1 %vm676_vm0, %v651_v57  ;;  %1221 = vmatprep.mubr.f32.mxu0 %v9490_v7 }
  0xec   : > { %1670 = vmatprep.mubr.f32.mxu1 %v9490_v7 }
  0xee   : > { %5474 = vmatmul.mubr.msk.f32.gmra.mrb[96].mxu0 %vm676_vm0, %v652_v63 }
  0xef   : > { %5538 = vmatmul.mubr.msk.f32.gmra.mrb[96].mxu1 %vm676_vm0, %v652_v63  ;;  %1227 = vmatprep.mubr.f32.mxu0 %v9490_v7  ;;  %v2044_v63 = vld [vmem:[%s9512_s25 + $0x1a8] sm:$0xff] }
  0xf0   : > { %1676 = vmatprep.mubr.f32.mxu1 %v9490_v7  ;;  %v6422_v5 = vpack.c.bf16 %v2046_v0, %v2044_v63 }
  0xf2   : > { %5475 = vmatmul.mubr.msk.f32.gmra.mrb[98].mxu0 %vm676_vm0, %v653_v1  ;;  %6423 = vmatprep.subr.bf16.mxu0 %v6422_v5  ;;  %v2250_v5 = vld [vmem:[%s9514_s23 + $0x10] sm:$0xff] }
  0xf3   : > { %5539 = vmatmul.mubr.msk.f32.gmra.mrb[98].mxu1 %vm676_vm0, %v653_v1  ;;  %1233 = vmatprep.mubr.f32.mxu0 %v9490_v7  ;;  %v2043_v1 = vld [vmem:[%s9512_s25 + $0x1a0] sm:$0xff] }
  0xf4   : > { %1682 = vmatprep.mubr.f32.mxu1 %v9490_v7 }
  0xf6   : > { %5476 = vmatmul.mubr.msk.f32.gmra.mrb[100].mxu0 %vm676_vm0, %v654_v2 }
  0xf7   : > { %5540 = vmatmul.mubr.msk.f32.gmra.mrb[100].mxu1 %vm676_vm0, %v654_v2  ;;  %1239 = vmatprep.mubr.f32.mxu0 %v9490_v7 }
  0xf8   : > { %1688 = vmatprep.mubr.f32.mxu1 %v9490_v7 }
  0xfa   : > { %5477 = vmatmul.mubr.msk.f32.gmra.mrb[102].mxu0 %vm676_vm0, %v655_v3 }
  0xfb   : > { %5541 = vmatmul.mubr.msk.f32.gmra.mrb[102].mxu1 %vm676_vm0, %v655_v3  ;;  %1245 = vmatprep.mubr.f32.mxu0 %v9490_v7 }
  0xfc   : > { %1694 = vmatprep.mubr.f32.mxu1 %v9490_v7 }
  0xfe   : > { %5478 = vmatmul.mubr.msk.f32.gmra.mrb[104].mxu0 %vm676_vm0, %v656_v10 }
  0xff   : > { %5542 = vmatmul.mubr.msk.f32.gmra.mrb[104].mxu1 %vm676_vm0, %v656_v10  ;;  %1251 = vmatprep.mubr.f32.mxu0 %v9490_v7  ;;  %v6424_v10 = vpack.c.bf16 %v2045_v6, %v2043_v1  ;;  %v2251_v6 = vld [vmem:[%s9514_s23 + $0x18] sm:$0xff] }
 0x100   : > { %1700 = vmatprep.mubr.f32.mxu1 %v9490_v7 }
 0x101   : > { %v935_v13 = vpop.f32.mrb[0].mxu0  ;;  %6425 = vmatpush1.bf16.msra.mxu0 %v6424_v10 }
 0x102   : > { %v1384_v14 = vpop.f32.mrb[0].mxu1  ;;  %v937_v16 = vpop.f32.mrb[1].mxu0  ;;  %5479 = vmatmul.mubr.msk.f32.gmra.mrb[106].mxu0 %vm676_vm0, %v657_v12 }
 0x103   : > { %v7509_v15 = vmul.f32 %v1384_v14, %v935_v13  ;;  %v1386_v17 = vpop.f32.mrb[1].mxu1  ;;  %5543 = vmatmul.mubr.msk.f32.gmra.mrb[106].mxu1 %vm676_vm0, %v657_v12  ;;  %1257 = vmatprep.mubr.f32.mxu0 %v9490_v7 }
 0x104   : > { %v7513_v18 = vmul.f32 %v1386_v17, %v937_v16  ;;  %1706 = vmatprep.mubr.f32.mxu1 %v9490_v7 }
 0x105   : > { %v941_v20 = vpop.f32.mrb[2].mxu0 }
 0x106   : > { %v1390_v21 = vpop.f32.mrb[2].mxu1  ;;  %v943_v23 = vpop.f32.mrb[3].mxu0  ;;  %5480 = vmatmul.mubr.msk.f32.gmra.mrb[108].mxu0 %vm676_vm0, %v658_v19 }
 0x107   : > { %v7518_v22 = vmul.f32 %v1390_v21, %v941_v20  ;;  %v1392_v24 = vpop.f32.mrb[3].mxu1  ;;  %5544 = vmatmul.mubr.msk.f32.gmra.mrb[108].mxu1 %vm676_vm0, %v658_v19  ;;  %1263 = vmatprep.mubr.f32.mxu0 %v9490_v7  ;;  %v665_v19 = vld [vmem:[%s7097_s27 + $0x1e8] sm:$0xff] }
 0x108   : > { %v7522_v25 = vmul.f32 %v1392_v24, %v943_v23  ;;  %1712 = vmatprep.mubr.f32.mxu1 %v9490_v7  ;;  %v6915_v23 = vmov 0.0|0.0   ;;  %v2248_v24 = vld [vmem:[%s9513_s21] sm:$0xff]  ;;  %s5423_s21 = sshll.u32 %s594_s0, 7 }
 0x109   : > { %v947_v27 = vpop.f32.mrb[4].mxu0  ;;  %6434 = vmatprep.subr.bf16.mxu1 %v6915_v23 }
 0x10a   : > { %v1396_v28 = vpop.f32.mrb[4].mxu1  ;;  %v949_v33 = vpop.f32.mrb[5].mxu0  ;;  %5481 = vmatmul.mubr.msk.f32.gmra.mrb[110].mxu0 %vm676_vm0, %v659_v26 }
 0x10b   : > { %v7536_v32 = vmul.f32 %v1396_v28, %v947_v27  ;;  %v1398_v34 = vpop.f32.mrb[5].mxu1  ;;  %5545 = vmatmul.mubr.msk.f32.gmra.mrb[110].mxu1 %vm676_vm0, %v659_v26  ;;  %1269 = vmatprep.mubr.f32.mxu0 %v9490_v7  ;;  %v2249_v26 = vld [vmem:[%s9514_s23 + $0x8] sm:$0xff] }
 0x10c   : > { %v7543_v37 = vmul.f32 %v1398_v34, %v949_v33  ;;  %1718 = vmatprep.mubr.f32.mxu1 %v9490_v7  ;;  %v6435_v30 = vpack.c.bf16 %v2249_v26, %v2248_v24  ;;  %v666_v33 = vld [vmem:[%s7097_s27 + $0x1f0] sm:$0xff] }
 0x10d   : > { %v953_v40 = vpop.f32.mrb[6].mxu0 }
 0x10e   : > { %v1402_v41 = vpop.f32.mrb[6].mxu1  ;;  %v955_v43 = vpop.f32.mrb[7].mxu0  ;;  %5482 = vmatmul.mubr.msk.f32.gmra.mrb[112].mxu0 %vm676_vm0, %v660_v38  ;;  %6436 = vmatpush1.bf16.msra.mxu1 %v6435_v30  ;;  %v2052_v30 = vld [vmem:[%s9512_s25 + $0x1e8] sm:$0xff] }
 0x10f   : > { %v7548_v42 = vmul.f32 %v1402_v41, %v953_v40  ;;  %v1404_v44 = vpop.f32.mrb[7].mxu1  ;;  %5546 = vmatmul.mubr.msk.f32.gmra.mrb[112].mxu1 %vm676_vm0, %v660_v38  ;;  %1275 = vmatprep.mubr.f32.mxu0 %v9490_v7  ;;  %v667_v41 = vld [vmem:[%s7097_s27 + $0x1f8] sm:$0xff]  ;;  %s9389_s27 = scalar_lea.vmem [#allocation2], %s5423_s21  ;;  %s6854_s21 = sshll.u32 %s6916_s26, 4  ;;  %s6855_s21 = int_to_ptr.vmem [resolvable:$false] %s6854_s21 }
 0x110   : > { %v7552_v45 = vmul.f32 %v1404_v44, %v955_v43  ;;  %1724 = vmatprep.mubr.f32.mxu1 %v9490_v7  ;;  %6437 = vmatprep.subr.bf16.mxu1 %v6915_v23  ;;  %s5357_s20 = sshll.u32 %s9389_s27, 4  ;;  %s6856_s24 = scalar_lea.vmem %s6855_s21, 4096  ;;  %s9414_s20 = int_to_ptr.vmem [resolvable:$true] %s5357_s20 }
 0x111   : > { %v959_v47 = vpop.f32.mrb[8].mxu0  ;;  %s6850_s1 = scalar_lea.vmem %s9414_s20, 2048  ;;  %p6857_p0 = scmp.lt.s32.totalorder %s9414_s20, %s6855_s21 }
 0x112   : > { %v1408_v48 = vpop.f32.mrb[8].mxu1  ;;  %v961_v50 = vpop.f32.mrb[9].mxu0  ;;  %5483 = vmatmul.mubr.msk.f32.gmra.mrb[114].mxu0 %vm676_vm0, %v661_v46  ;;  %p6851_p11 = scmp.ne.s32.totalorder %s9414_s20, %s6850_s1  ;;  %p6858_p1 = scmp.lt.s32.totalorder %s6856_s24, %s6850_s1 }
 0x113   : > { %v7557_v49 = vmul.f32 %v1408_v48, %v959_v47  ;;  %v1410_v51 = vpop.f32.mrb[9].mxu1  ;;  %5547 = vmatmul.mubr.msk.f32.gmra.mrb[114].mxu1 %vm676_vm0, %v661_v46  ;;  %1281 = vmatprep.mubr.f32.mxu0 %v9490_v7  ;;  %v2048_v46 = vld [vmem:[%s9512_s25 + $0x1c8] sm:$0xff]  ;;  %v2050_v47 = vld [vmem:[%s9512_s25 + $0x1d8] sm:$0xff]  ;;  %v2047_v48 = vld [vmem:[%s9512_s25 + $0x1c0] sm:$0xff] }
 0x114   : > { %v7561_v52 = vmul.f32 %v1410_v51, %v961_v50  ;;  %1730 = vmatprep.mubr.f32.mxu1 %v9490_v7  ;;  %p6852_p12 = pnand %p6851_p11, %p7057_p5  ;;  %p6859_p2 = por %p6858_p1, %p6857_p0 }
 0x115   : > { %v965_v54 = vpop.f32.mrb[10].mxu0 }
 0x116   : > { %v1414_v55 = vpop.f32.mrb[10].mxu1  ;;  %v967_v57 = vpop.f32.mrb[11].mxu0  ;;  %5484 = vmatmul.mubr.msk.f32.gmra.mrb[116].mxu0 %vm676_vm0, %v662_v53  ;;  %p6853_p13 = pneg %p6852_p12 }
 0x117   : > { %v7566_v56 = vmul.f32 %v1414_v55, %v965_v54  ;;  %v1416_v58 = vpop.f32.mrb[11].mxu1  ;;  %5548 = vmatmul.mubr.msk.f32.gmra.mrb[116].mxu1 %vm676_vm0, %v662_v53  ;;  %1287 = vmatprep.mubr.f32.mxu0 %v9490_v7  ;;  %v6426_v54 = vpack.c.bf16 %v2050_v47, %v2048_v46  ;;  %v2049_v55 = vld [vmem:[%s9512_s25 + $0x1d0] sm:$0xff] }
 0x118   : > { %v7570_v59 = vmul.f32 %v1416_v58, %v967_v57  ;;  %1736 = vmatprep.mubr.f32.mxu1 %v9490_v7  ;;  %v6428_v58 = vpack.c.bf16 %v2049_v55, %v2047_v48  ;;  %p6860_p3 = pnand %p6859_p2, %p6853_p13 }
 0x119   : > { %v971_v61 = vpop.f32.mrb[12].mxu0  ;;  %6427 = vmatprep.subr.bf16.mxu0 %v6426_v54 }
 0x11a   : > { %v1420_v62 = vpop.f32.mrb[12].mxu1  ;;  %v973_v3 = vpop.f32.mrb[13].mxu0  ;;  %5485 = vmatmul.mubr.msk.f32.gmra.mrb[118].mxu0 %vm676_vm0, %v663_v60 }
 0x11b   : > { %v7584_v2 = vmul.f32 %v1420_v62, %v971_v61  ;;  %v1422_v4 = vpop.f32.mrb[13].mxu1  ;;  %5549 = vmatmul.mubr.msk.f32.gmra.mrb[118].mxu1 %vm676_vm0, %v663_v60  ;;  %1293 = vmatprep.mubr.f32.mxu0 %v9490_v7 }
 0x11c   : > { %v7591_v8 = vmul.f32 %v1422_v4, %v973_v3  ;;  %1742 = vmatprep.mubr.f32.mxu1 %v9490_v7  ;;  %6429 = vmatpush1.bf16.msra.mxu0 %v6428_v58 }
 0x11d   : > { %v977_v11 = vpop.f32.mrb[14].mxu0 }
 0x11e   : > { %v1426_v12 = vpop.f32.mrb[14].mxu1  ;;  %v979_v14 = vpop.f32.mrb[15].mxu0  ;;  %5486 = vmatmul.mubr.msk.f32.gmra.mrb[120].mxu0 %vm676_vm0, %v664_v9 }
 0x11f   : > { %v7596_v13 = vmul.f32 %v1426_v12, %v977_v11  ;;  %v1428_v16 = vpop.f32.mrb[15].mxu1  ;;  %5550 = vmatmul.mubr.msk.f32.gmra.mrb[120].mxu1 %vm676_vm0, %v664_v9  ;;  %1299 = vmatprep.mubr.f32.mxu0 %v9490_v7  ;;  %v6438_v12 = vpack.c.bf16 %v2251_v6, %v2250_v5 }
 0x120   : > { %v7600_v17 = vmul.f32 %v1428_v16, %v979_v14  ;;  %1748 = vmatprep.mubr.f32.mxu1 %v9490_v7 }
 0x121   : > { %v983_v20 = vpop.f32.mrb[16].mxu0  ;;  %6439 = vmatpush1.bf16.msra.mxu1 %v6438_v12 }
 0x122   : > { %v1432_v21 = vpop.f32.mrb[16].mxu1  ;;  %v985_v28 = vpop.f32.mrb[17].mxu0  ;;  %5487 = vmatmul.mubr.msk.f32.gmra.mrb[122].mxu0 %vm676_vm0, %v665_v19  ;;  %6440 = vmatprep.subr.bf16.mxu1 %v6915_v23 }
 0x123   : > { %v7612_v27 = vmul.f32 %v1432_v21, %v983_v20  ;;  %v1434_v29 = vpop.f32.mrb[17].mxu1  ;;  %5551 = vmatmul.mubr.msk.f32.gmra.mrb[122].mxu1 %vm676_vm0, %v665_v19  ;;  %1305 = vmatprep.mubr.f32.mxu0 %v9490_v7 }
 0x124   : > { %v7616_v31 = vmul.f32 %v1434_v29, %v985_v28  ;;  %1754 = vmatprep.mubr.f32.mxu1 %v9490_v7 }
 0x125   : > { %v989_v34 = vpop.f32.mrb[18].mxu0 }
 0x126   : > { %v1438_v35 = vpop.f32.mrb[18].mxu1  ;;  %v991_v38 = vpop.f32.mrb[19].mxu0  ;;  %5488 = vmatmul.mubr.msk.f32.gmra.mrb[124].mxu0 %vm676_vm0, %v666_v33 }
 0x127   : > { %v7622_v36 = vmul.f32 %v1438_v35, %v989_v34  ;;  %v1440_v39 = vpop.f32.mrb[19].mxu1  ;;  %5552 = vmatmul.mubr.msk.f32.gmra.mrb[124].mxu1 %vm676_vm0, %v666_v33  ;;  %1311 = vmatprep.mubr.f32.mxu0 %v9490_v7  ;;  %v2054_v33 = vld [vmem:[%s9512_s25 + $0x1f8] sm:$0xff]  ;;  %v2051_v34 = vld [vmem:[%s9512_s25 + $0x1e0] sm:$0xff] }
 0x128   : > { %v7626_v40 = vmul.f32 %v1440_v39, %v991_v38  ;;  %1760 = vmatprep.mubr.f32.mxu1 %v9490_v7 }
 0x129   : > { %v995_v43 = vpop.f32.mrb[20].mxu0 }
 0x12a   : > { %v1444_v44 = vpop.f32.mrb[20].mxu1  ;;  %v997_v51 = vpop.f32.mrb[21].mxu0  ;;  %5489 = vmatmul.mubr.msk.f32.gmra.mrb[126].mxu0 %vm676_vm0, %v667_v41 }
 0x12b   : > { %v7640_v50 = vmul.f32 %v1444_v44, %v995_v43  ;;  %v1446_v53 = vpop.f32.mrb[21].mxu1  ;;  %5553 = vmatmul.mubr.msk.f32.gmra.mrb[126].mxu1 %vm676_vm0, %v667_v41  ;;  %v6430_v41 = vpack.c.bf16 %v2054_v33, %v2052_v30  ;;  %v2053_v43 = vld [vmem:[%s9512_s25 + $0x1f0] sm:$0xff] }
 0x12c   : > { %v7647_v57 = vmul.f32 %v1446_v53, %v997_v51  ;;  %v6432_v46 = vpack.c.bf16 %v2053_v43, %v2051_v34 }
 0x12d   : > { %v1001_v60 = vpop.f32.mrb[22].mxu0  ;;  %6431 = vmatprep.subr.bf16.mxu0 %v6430_v41 }
 0x12e   : > { %v1450_v61 = vpop.f32.mrb[22].mxu1  ;;  %v1003_v63 = vpop.f32.mrb[23].mxu0  ;;  %6433 = vmatpush1.bf16.msra.mxu0 %v6432_v46 }
 0x12f   : > { %v7649_v62 = vmul.f32 %v1450_v61, %v1001_v60  ;;  %v1452_v0 = vpop.f32.mrb[23].mxu1  ;;  %v2252_v61 = vld [vmem:[%s9514_s23 + $0x20] sm:$0xff] }
 0x130   : > { %v7651_v1 = vmul.f32 %v1452_v0, %v1003_v63  ;;  %v2253_v63 = vld [vmem:[%s9514_s23 + $0x28] sm:$0xff] }
 0x131   : > { %v1007_v3 = vpop.f32.mrb[24].mxu0  ;;  %v6441_v5 = vpack.c.bf16 %v2253_v63, %v2252_v61 }
 0x132   : > { %v1456_v4 = vpop.f32.mrb[24].mxu1  ;;  %v1009_v10 = vpop.f32.mrb[25].mxu0 }
 0x133   : > { %v7659_v9 = vmul.f32 %v1456_v4, %v1007_v3  ;;  %v1458_v11 = vpop.f32.mrb[25].mxu1  ;;  %6442 = vmatpush1.bf16.msra.mxu1 %v6441_v5 }
 0x134   : > { %v7661_v14 = vmul.f32 %v1458_v11, %v1009_v10  ;;  %6443 = vmatprep.subr.bf16.mxu1 %v6915_v23 }
 0x135   : > { %v1013_v16 = vpop.f32.mrb[26].mxu0 }
 0x136   : > { %v1462_v19 = vpop.f32.mrb[26].mxu1  ;;  %v1015_v21 = vpop.f32.mrb[27].mxu0 }
 0x137   : > { %v7664_v20 = vmul.f32 %v1462_v19, %v1013_v16  ;;  %v1464_v24 = vpop.f32.mrb[27].mxu1 }
 0x138   : > { %v7666_v26 = vmul.f32 %v1464_v24, %v1015_v21 }
 0x139   : > { %v1019_v28 = vpop.f32.mrb[28].mxu0 }
 0x13a   : > { %v1468_v29 = vpop.f32.mrb[28].mxu1  ;;  %v1021_v38 = vpop.f32.mrb[29].mxu0 }
 0x13b   : > { %v7677_v35 = vmul.f32 %v1468_v29, %v1019_v28  ;;  %v1470_v39 = vpop.f32.mrb[29].mxu1 }
 0x13c   : > { %v7682_v44 = vmul.f32 %v1470_v39, %v1021_v38 }
 0x13d   : > { %v1025_v47 = vpop.f32.mrb[30].mxu0 }
 0x13e   : > { %v1474_v48 = vpop.f32.mrb[30].mxu1  ;;  %v1027_v53 = vpop.f32.mrb[31].mxu0 }
 0x13f   : > { %v7684_v51 = vmul.f32 %v1474_v48, %v1025_v47  ;;  %v1476_v54 = vpop.f32.mrb[31].mxu1 }
 0x140   : > { %v7686_v55 = vmul.f32 %v1476_v54, %v1027_v53 }
 0x141   : > { %v1031_v58 = vpop.f32.mrb[32].mxu0 }
 0x142   : > { %v1480_v60 = vpop.f32.mrb[32].mxu1  ;;  %v1033_v3 = vpop.f32.mrb[33].mxu0 }
 0x143   : > { %v1799_v0 = vmul.f32 %v1480_v60, %v1031_v58  ;;  %v1482_v4 = vpop.f32.mrb[33].mxu1 }
 0x144   : > { %v1800_v6 = vmul.f32 %v1482_v4, %v1033_v3 }
 0x145   : > { %v7695_v10 = vadd.f32 %v1799_v0, %v7509_v15  ;;  %v1037_v11 = vpop.f32.mrb[34].mxu0 }
 0x146   : > { %v1486_v12 = vpop.f32.mrb[34].mxu1  ;;  %v7698_v16 = vadd.f32 %v1800_v6, %v7513_v18  ;;  %v1039_v21 = vpop.f32.mrb[35].mxu0 }
 0x147   : > { %v1801_v19 = vmul.f32 %v1486_v12, %v1037_v11  ;;  %v1488_v24 = vpop.f32.mrb[35].mxu1 }
 0x148   : > { %v1802_v28 = vmul.f32 %v1488_v24, %v1039_v21 }
 0x149   : > { %v7702_v29 = vadd.f32 %v1801_v19, %v7518_v22  ;;  %v1043_v30 = vpop.f32.mrb[36].mxu0 }
 0x14a   : > { %v1492_v33 = vpop.f32.mrb[36].mxu1  ;;  %v7705_v15 = vadd.f32 %v1802_v28, %v7522_v25  ;;  %v1045_v38 = vpop.f32.mrb[37].mxu0 }
 0x14b   : > { %v1803_v34 = vmul.f32 %v1492_v33, %v1043_v30  ;;  %v1494_v39 = vpop.f32.mrb[37].mxu1 }
 0x14c   : > { %v1804_v41 = vmul.f32 %v1494_v39, %v1045_v38 }
 0x14d   : > { %v7708_v18 = vadd.f32 %v1803_v34, %v7536_v32  ;;  %v1049_v43 = vpop.f32.mrb[38].mxu0  ;;  %v2254_v32 = vld [vmem:[%s9514_s23 + $0x30] sm:$0xff] }
 0x14e   : > { %v1498_v46 = vpop.f32.mrb[38].mxu1  ;;  %v7711_v47 = vadd.f32 %v1804_v41, %v7543_v37  ;;  %v1051_v22 = vpop.f32.mrb[39].mxu0  ;;  %v2255_v37 = vld [vmem:[%s9514_s23 + $0x38] sm:$0xff] }
 0x14f   : > { %v1805_v48 = vmul.f32 %v1498_v46, %v1049_v43  ;;  %v1500_v53 = vpop.f32.mrb[39].mxu1  ;;  %v6444_v4 = vpack.c.bf16 %v2255_v37, %v2254_v32 }
 0x150   : > { %v1806_v54 = vmul.f32 %v1500_v53, %v1051_v22 }
 0x151   : > { %v7714_v58 = vadd.f32 %v1805_v48, %v7548_v42  ;;  %v1055_v25 = vpop.f32.mrb[40].mxu0  ;;  %6445 = vmatpush1.bf16.msra.mxu1 %v6444_v4 }
 0x152   : > { %v1504_v60 = vpop.f32.mrb[40].mxu1  ;;  %v7717_v61 = vadd.f32 %v1806_v54, %v7552_v45  ;;  %v1057_v0 = vpop.f32.mrb[41].mxu0  ;;  %6446 = vmatprep.subr.bf16.mxu1 %v6915_v23 }
 0x153   : > { %v1807_v63 = vmul.f32 %v1504_v60, %v1055_v25  ;;  %v1506_v3 = vpop.f32.mrb[41].mxu1 }
 0x154   : > { %v1808_v5 = vmul.f32 %v1506_v3, %v1057_v0 }
 0x155   : > { %v7726_v42 = vadd.f32 %v1807_v63, %v7557_v49  ;;  %v1061_v6 = vpop.f32.mrb[42].mxu0 }
 0x156   : > { %v1510_v45 = vpop.f32.mrb[42].mxu1  ;;  %v7729_v11 = vadd.f32 %v1808_v5, %v7561_v52  ;;  %v1063_v19 = vpop.f32.mrb[43].mxu0 }
 0x157   : > { %v1809_v12 = vmul.f32 %v1510_v45, %v1061_v6  ;;  %v1512_v21 = vpop.f32.mrb[43].mxu1 }
 0x158   : > { %v1810_v24 = vmul.f32 %v1512_v21, %v1063_v19 }
 0x159   : > { %v7733_v28 = vadd.f32 %v1809_v12, %v7566_v56  ;;  %v1067_v30 = vpop.f32.mrb[44].mxu0 }
 0x15a   : > { %v1516_v33 = vpop.f32.mrb[44].mxu1  ;;  %v7736_v49 = vadd.f32 %v1810_v24, %v7570_v59  ;;  %v1069_v38 = vpop.f32.mrb[45].mxu0 }
 0x15b   : > { %v1811_v34 = vmul.f32 %v1516_v33, %v1067_v30  ;;  %v1518_v39 = vpop.f32.mrb[45].mxu1 }
 0x15c   : > { %v1812_v41 = vmul.f32 %v1518_v39, %v1069_v38 }
 0x15d   : > { %v7739_v52 = vadd.f32 %v1811_v34, %v7584_v2  ;;  %v1073_v43 = vpop.f32.mrb[46].mxu0  ;;  %v2256_v2 = vld [vmem:[%s9514_s23 + $0x40] sm:$0xff] }
 0x15e   : > { %v1522_v46 = vpop.f32.mrb[46].mxu1  ;;  %v7742_v48 = vadd.f32 %v1812_v41, %v7591_v8  ;;  %v1075_v56 = vpop.f32.mrb[47].mxu0  ;;  %v2257_v8 = vld [vmem:[%s9514_s23 + $0x48] sm:$0xff] }
 0x15f   : > { %v1813_v22 = vmul.f32 %v1522_v46, %v1073_v43  ;;  %v1524_v53 = vpop.f32.mrb[47].mxu1  ;;  %v6447_v3 = vpack.c.bf16 %v2257_v8, %v2256_v2 }
 0x160   : > { %v1814_v54 = vmul.f32 %v1524_v53, %v1075_v56 }
 0x161   : > { %v7745_v25 = vadd.f32 %v1813_v22, %v7596_v13  ;;  %v1079_v59 = vpop.f32.mrb[48].mxu0  ;;  %6448 = vmatpush1.bf16.msra.mxu1 %v6447_v3 }
 0x162   : > { %v1528_v60 = vpop.f32.mrb[48].mxu1  ;;  %v7748_v32 = vadd.f32 %v1814_v54, %v7600_v17  ;;  %v1081_v63 = vpop.f32.mrb[49].mxu0  ;;  %6449 = vmatprep.subr.bf16.mxu1 %v6915_v23 }
 0x163   : > { %v1815_v37 = vmul.f32 %v1528_v60, %v1079_v59  ;;  %v1530_v0 = vpop.f32.mrb[49].mxu1 }
 0x164   : > { %v1816_v4 = vmul.f32 %v1530_v0, %v1081_v63 }
 0x165   : > { %v7757_v13 = vadd.f32 %v1815_v37, %v7612_v27  ;;  %v1085_v5 = vpop.f32.mrb[50].mxu0 }
 0x166   : > { %v7760_v17 = vadd.f32 %v1816_v4, %v7616_v31  ;;  %v1534_v6 = vpop.f32.mrb[50].mxu1  ;;  %v1087_v12 = vpop.f32.mrb[51].mxu0 }
 0x167   : > { %v1817_v45 = vmul.f32 %v1534_v6, %v1085_v5  ;;  %v1536_v19 = vpop.f32.mrb[51].mxu1 }
 0x168   : > { %v1818_v21 = vmul.f32 %v1536_v19, %v1087_v12 }
 0x169   : > { %v7764_v24 = vadd.f32 %v1817_v45, %v7622_v36  ;;  %v1091_v27 = vpop.f32.mrb[52].mxu0 }
 0x16a   : > { %v7767_v30 = vadd.f32 %v1818_v21, %v7626_v40  ;;  %v1540_v33 = vpop.f32.mrb[52].mxu1  ;;  %v1093_v38 = vpop.f32.mrb[53].mxu0 }
 0x16b   : > { %v1819_v34 = vmul.f32 %v1540_v33, %v1091_v27  ;;  %v1542_v31 = vpop.f32.mrb[53].mxu1 }
 0x16c   : > { %v1820_v39 = vmul.f32 %v1542_v31, %v1093_v38 }
 0x16d   : > { %v7770_v41 = vadd.f32 %v1819_v34, %v7640_v50  ;;  %v1097_v46 = vpop.f32.mrb[54].mxu0  ;;  %v2258_v50 = vld [vmem:[%s9514_s23 + $0x50] sm:$0xff] }
 0x16e   : > { %v7773_v43 = vadd.f32 %v1820_v39, %v7647_v57  ;;  %v1546_v22 = vpop.f32.mrb[54].mxu1  ;;  %v1099_v36 = vpop.f32.mrb[55].mxu0  ;;  %v2259_v57 = vld [vmem:[%s9514_s23 + $0x58] sm:$0xff] }
 0x16f   : > { %v1821_v56 = vmul.f32 %v1546_v22, %v1097_v46  ;;  %v1548_v53 = vpop.f32.mrb[55].mxu1  ;;  %v6450_v0 = vpack.c.bf16 %v2259_v57, %v2258_v50 }
 0x170   : > { %v1822_v54 = vmul.f32 %v1548_v53, %v1099_v36 }
 0x171   : > { %v7776_v40 = vadd.f32 %v1821_v56, %v7649_v62  ;;  %v1103_v60 = vpop.f32.mrb[56].mxu0  ;;  %6451 = vmatpush1.bf16.msra.mxu1 %v6450_v0 }
 0x172   : > { %v7779_v59 = vadd.f32 %v1822_v54, %v7651_v1  ;;  %v1552_v2 = vpop.f32.mrb[56].mxu1  ;;  %v1105_v37 = vpop.f32.mrb[57].mxu0  ;;  %6452 = vmatprep.subr.bf16.mxu1 %v6915_v23 }
 0x173   : > { %v1823_v8 = vmul.f32 %v1552_v2, %v1103_v60  ;;  %v1554_v63 = vpop.f32.mrb[57].mxu1 }
 0x174   : > { %v1824_v3 = vmul.f32 %v1554_v63, %v1105_v37 }
 0x175   : > { %v7788_v62 = vadd.f32 %v1823_v8, %v7659_v9  ;;  %v1109_v4 = vpop.f32.mrb[58].mxu0 }
 0x176   : > { %v7791_v1 = vadd.f32 %v1824_v3, %v7661_v14  ;;  %v1558_v5 = vpop.f32.mrb[58].mxu1  ;;  %v1111_v45 = vpop.f32.mrb[59].mxu0  ;;  %v2263_v3 = vld [vmem:[%s9514_s23 + $0x78] sm:$0xff] }
 0x177   : > { %v1825_v6 = vmul.f32 %v1558_v5, %v1109_v4  ;;  %v1560_v12 = vpop.f32.mrb[59].mxu1 }
 0x178   : > { %v1826_v19 = vmul.f32 %v1560_v12, %v1111_v45  ;;  %v2265_v12 = vld [vmem:[%s9514_s23 + $0x88] sm:$0xff] }
 0x179   : > { %v7795_v21 = vadd.f32 %v1825_v6, %v7664_v20  ;;  %v1115_v9 = vpop.f32.mrb[60].mxu0 }
 0x17a   : > { %v7798_v27 = vadd.f32 %v1826_v19, %v7666_v26  ;;  %v1564_v33 = vpop.f32.mrb[60].mxu1  ;;  %v1117_v38 = vpop.f32.mrb[61].mxu0 }
 0x17b   : > { %v1827_v34 = vmul.f32 %v1564_v33, %v1115_v9  ;;  %v1566_v14 = vpop.f32.mrb[61].mxu1 }
 0x17c   : > { %v1828_v31 = vmul.f32 %v1566_v14, %v1117_v38 }
 0x17d   : > { %v7801_v39 = vadd.f32 %v1827_v34, %v7677_v35  ;;  %v1121_v22 = vpop.f32.mrb[62].mxu0  ;;  %v2260_v35 = vld [vmem:[%s9514_s23 + $0x60] sm:$0xff] }
 0x17e   : > { %v7804_v46 = vadd.f32 %v1828_v31, %v7682_v44  ;;  %v1570_v56 = vpop.f32.mrb[62].mxu1  ;;  %v1123_v20 = vpop.f32.mrb[63].mxu0  ;;  %v2261_v44 = vld [vmem:[%s9514_s23 + $0x68] sm:$0xff] }
 0x17f   : > { %v1829_v36 = vmul.f32 %v1570_v56, %v1121_v22  ;;  %v1572_v53 = vpop.f32.mrb[63].mxu1  ;;  %v6453_v63 = vpack.c.bf16 %v2261_v44, %v2260_v35  ;;  %v2266_v56 = vld [vmem:[%s9514_s23 + $0x90] sm:$0xff] }
 0x180   : > { %v1830_v54 = vmul.f32 %v1572_v53, %v1123_v20 }
 0x181   : > { %v7807_v26 = vadd.f32 %v1829_v36, %v7684_v51  ;;  %v1127_v2 = vpop.f32.mrb[64].mxu0  ;;  %6454 = vmatpush1.bf16.msra.mxu1 %v6453_v63  ;;  %v2267_v36 = vld [vmem:[%s9514_s23 + $0x98] sm:$0xff] }
 0x182   : > { %v7810_v60 = vadd.f32 %v1830_v54, %v7686_v55  ;;  %v1576_v50 = vpop.f32.mrb[64].mxu1  ;;  %v1129_v8 = vpop.f32.mrb[65].mxu0  ;;  %v2262_v55 = vld [vmem:[%s9514_s23 + $0x70] sm:$0xff]  ;;  %6455 = vmatprep.subr.bf16.mxu1 %v6915_v23 }
 0x183   : > { %v1831_v57 = vmul.f32 %v1576_v50, %v1127_v2  ;;  %v1578_v37 = vpop.f32.mrb[65].mxu1  ;;  %v6456_v45 = vpack.c.bf16 %v2263_v3, %v2262_v55 }
 0x184   : > { %v1832_v0 = vmul.f32 %v1578_v37, %v1129_v8  ;;  %v2269_v8 = vld [vmem:[%s9514_s23 + $0xa8] sm:$0xff] }
 0x185   : > { %v7819_v51 = vadd.f32 %v7695_v10, %v1831_v57  ;;  %v1133_v5 = vpop.f32.mrb[66].mxu0  ;;  %v2264_v10 = vld [vmem:[%s9514_s23 + $0x80] sm:$0xff]  ;;  %6457 = vmatpush1.bf16.msra.mxu1 %v6456_v45  ;;  %v2270_v45 = vld [vmem:[%s9514_s23 + $0xb0] sm:$0xff] }
 0x186   : > { %v7828_v4 = vadd.f32 %v7698_v16, %v1832_v0  ;;  %v1582_v6 = vpop.f32.mrb[66].mxu1  ;;  %v1135_v9 = vpop.f32.mrb[67].mxu0  ;;  %v6459_v38 = vpack.c.bf16 %v2265_v12, %v2264_v10  ;;  %6458 = vmatprep.subr.bf16.mxu1 %v6915_v23  ;;  %v2268_v57 = vld [vmem:[%s9514_s23 + $0xa0] sm:$0xff]  ;;  %v2271_v10 = vld [vmem:[%s9514_s23 + $0xb8] sm:$0xff] }
 0x187   : > { %v1833_v19 = vmul.f32 %v1582_v6, %v1133_v5  ;;  %v1584_v33 = vpop.f32.mrb[67].mxu1 }
 0x188   : > { %v1834_v34 = vmul.f32 %v1584_v33, %v1135_v9 }
 0x189   : > { %v7838_v16 = vadd.f32 %v7702_v29, %v1833_v19  ;;  %v1139_v31 = vpop.f32.mrb[68].mxu0  ;;  %6460 = vmatpush1.bf16.msra.mxu1 %v6459_v38 }
 0x18a   : > { %v7841_v14 = vadd.f32 %v7705_v15, %v1834_v34  ;;  %v1588_v22 = vpop.f32.mrb[68].mxu1  ;;  %v1141_v29 = vpop.f32.mrb[69].mxu0  ;;  %v6462_v15 = vpack.c.bf16 %v2267_v36, %v2266_v56  ;;  %6461 = vmatprep.subr.bf16.mxu1 %v6915_v23  ;;  %v2273_v56 = vld [vmem:[%s9514_s23 + $0xc8] sm:$0xff] }
 0x18b   : > { %v1835_v20 = vmul.f32 %v1588_v22, %v1139_v31  ;;  %v1590_v53 = vpop.f32.mrb[69].mxu1  ;;  %v2272_v22 = vld [vmem:[%s9514_s23 + $0xc0] sm:$0xff] }
 0x18c   : > { %v1836_v54 = vmul.f32 %v1590_v53, %v1141_v29 }
 0x18d   : > { %v7851_v2 = vadd.f32 %v7708_v18, %v1835_v20  ;;  %v1145_v35 = vpop.f32.mrb[70].mxu0  ;;  %6463 = vmatpush1.bf16.msra.mxu1 %v6462_v15 }
 0x18e   : > { %v7854_v50 = vadd.f32 %v7711_v47, %v1836_v54  ;;  %v1594_v44 = vpop.f32.mrb[70].mxu1  ;;  %v1147_v18 = vpop.f32.mrb[71].mxu0  ;;  %v6465_v47 = vpack.c.bf16 %v2269_v8, %v2268_v57  ;;  %6464 = vmatprep.subr.bf16.mxu1 %v6915_v23  ;;  %v2275_v57 = vld [vmem:[%s9514_s23 + $0xd8] sm:$0xff] }
 0x18f   : > { %v1837_v37 = vmul.f32 %v1594_v44, %v1145_v35  ;;  %v1596_v63 = vpop.f32.mrb[71].mxu1  ;;  %v2274_v44 = vld [vmem:[%s9514_s23 + $0xd0] sm:$0xff] }
 0x190   : > { %v1838_v0 = vmul.f32 %v1596_v63, %v1147_v18 }
 0x191   : > { %v7864_v55 = vadd.f32 %v7714_v58, %v1837_v37  ;;  %v1151_v5 = vpop.f32.mrb[72].mxu0  ;;  %6466 = vmatpush1.bf16.msra.mxu1 %v6465_v47 }
 0x192   : > { %v7867_v3 = vadd.f32 %v7717_v61, %v1838_v0  ;;  %v1600_v6 = vpop.f32.mrb[72].mxu1  ;;  %v1153_v58 = vpop.f32.mrb[73].mxu0  ;;  %v6468_v61 = vpack.c.bf16 %v2271_v10, %v2270_v45  ;;  %6467 = vmatprep.subr.bf16.mxu1 %v6915_v23  ;;  %v2277_v45 = vld [vmem:[%s9514_s23 + $0xe8] sm:$0xff] }
 0x193   : > { %v1839_v12 = vmul.f32 %v1600_v6, %v1151_v5  ;;  %v1602_v19 = vpop.f32.mrb[73].mxu1  ;;  %v2276_v6 = vld [vmem:[%s9514_s23 + $0xe0] sm:$0xff] }
 0x194   : > { %v1840_v9 = vmul.f32 %v1602_v19, %v1153_v58 }
 0x195   : > { %v7877_v33 = vadd.f32 %v7726_v42, %v1839_v12  ;;  %v1157_v38 = vpop.f32.mrb[74].mxu0  ;;  %6469 = vmatpush1.bf16.msra.mxu1 %v6468_v61 }
 0x196   : > { %v7880_v34 = vadd.f32 %v7729_v11, %v1840_v9  ;;  %v1606_v31 = vpop.f32.mrb[74].mxu1  ;;  %v1159_v42 = vpop.f32.mrb[75].mxu0  ;;  %v6471_v11 = vpack.c.bf16 %v2273_v56, %v2272_v22  ;;  %6470 = vmatprep.subr.bf16.mxu1 %v6915_v23  ;;  %v2279_v22 = vld [vmem:[%s9514_s23 + $0xf8] sm:$0xff] }
 0x197   : > { %v1841_v36 = vmul.f32 %v1606_v31, %v1157_v38  ;;  %v1608_v20 = vpop.f32.mrb[75].mxu1  ;;  %v2278_v31 = vld [vmem:[%s9514_s23 + $0xf0] sm:$0xff] }
 0x198   : > { %v1842_v29 = vmul.f32 %v1608_v20, %v1159_v42 }
 0x199   : > { %v7890_v53 = vadd.f32 %v7733_v28, %v1841_v36  ;;  %v1163_v15 = vpop.f32.mrb[76].mxu0  ;;  %6472 = vmatpush1.bf16.msra.mxu1 %v6471_v11 }
 0x19a   : > { %v7893_v54 = vadd.f32 %v7736_v49, %v1842_v29  ;;  %v1612_v35 = vpop.f32.mrb[76].mxu1  ;;  %v1165_v28 = vpop.f32.mrb[77].mxu0  ;;  %v6474_v49 = vpack.c.bf16 %v2275_v57, %v2274_v44  ;;  %6473 = vmatprep.subr.bf16.mxu1 %v6915_v23 }
 0x19b   : > { %v1843_v8 = vmul.f32 %v1612_v35, %v1163_v15  ;;  %v1614_v37 = vpop.f32.mrb[77].mxu1 }
 0x19c   : > { %v1844_v18 = vmul.f32 %v1614_v37, %v1165_v28 }
 0x19d   : > { %v7903_v63 = vadd.f32 %v7739_v52, %v1843_v8  ;;  %v1169_v47 = vpop.f32.mrb[78].mxu0  ;;  %6475 = vmatpush1.bf16.msra.mxu1 %v6474_v49 }
 0x19e   : > { %v7906_v0 = vadd.f32 %v7742_v48, %v1844_v18  ;;  %v1618_v5 = vpop.f32.mrb[78].mxu1  ;;  %v1171_v52 = vpop.f32.mrb[79].mxu0  ;;  %v6477_v48 = vpack.c.bf16 %v2277_v45, %v2276_v6  ;;  %6476 = vmatprep.subr.bf16.mxu1 %v6915_v23 }
 0x19f   : > { %v1845_v10 = vmul.f32 %v1618_v5, %v1169_v47  ;;  %v1620_v12 = vpop.f32.mrb[79].mxu1 }
 0x1a0   : > { %v1846_v58 = vmul.f32 %v1620_v12, %v1171_v52 }
 0x1a1   : > { %v7916_v19 = vadd.f32 %v7745_v25, %v1845_v10  ;;  %v1175_v61 = vpop.f32.mrb[80].mxu0  ;;  %6478 = vmatpush1.bf16.msra.mxu1 %v6477_v48 }
 0x1a2   : > { %v7919_v9 = vadd.f32 %v7748_v32, %v1846_v58  ;;  %v1624_v38 = vpop.f32.mrb[80].mxu1  ;;  %v1177_v25 = vpop.f32.mrb[81].mxu0  ;;  %v6480_v32 = vpack.c.bf16 %v2279_v22, %v2278_v31  ;;  %6479 = vmatprep.subr.bf16.mxu1 %v6915_v23 }
 0x1a3   : > { %v1847_v56 = vmul.f32 %v1624_v38, %v1175_v61  ;;  %v1626_v36 = vpop.f32.mrb[81].mxu1 }
 0x1a4   : > { %v1848_v42 = vmul.f32 %v1626_v36, %v1177_v25 }
 0x1a5   : > { %v7929_v20 = vadd.f32 %v7757_v13, %v1847_v56  ;;  %v1181_v11 = vpop.f32.mrb[82].mxu0  ;;  %6481 = vmatpush1.bf16.msra.mxu1 %v6480_v32 }
 0x1a6   : > { %v7932_v29 = vadd.f32 %v7760_v17, %v1848_v42  ;;  %v1630_v15 = vpop.f32.mrb[82].mxu1  ;;  %v1183_v44 = vpop.f32.mrb[83].mxu0 }
 0x1a7   : > { %v1849_v35 = vmul.f32 %v1630_v15, %v1181_v11  ;;  %v1632_v57 = vpop.f32.mrb[83].mxu1 }
 0x1a8   : > { %v1850_v8 = vmul.f32 %v1632_v57, %v1183_v44 }
 0x1a9   : > { %v7936_v28 = vadd.f32 %v7764_v24, %v1849_v35  ;;  %v1187_v37 = vpop.f32.mrb[84].mxu0 }
 0x1aa   : > { %v7939_v13 = vadd.f32 %v7767_v30, %v1850_v8  ;;  %v1636_v18 = vpop.f32.mrb[84].mxu1  ;;  %v1189_v17 = vpop.f32.mrb[85].mxu0 }
 0x1ab   : > { %v1851_v49 = vmul.f32 %v1636_v18, %v1187_v37  ;;  %v1638_v47 = vpop.f32.mrb[85].mxu1 }
 0x1ac   : > { %v1852_v5 = vmul.f32 %v1638_v47, %v1189_v17 }
 0x1ad   : > { %v7942_v6 = vadd.f32 %v7770_v41, %v1851_v49  ;;  %v1193_v45 = vpop.f32.mrb[86].mxu0 }
 0x1ae   : > { %v7945_v23 = vadd.f32 %v7773_v43, %v1852_v5  ;;  %v1642_v10 = vpop.f32.mrb[86].mxu1  ;;  %v1195_v52 = vpop.f32.mrb[87].mxu0 }
 0x1af   : > { %v1853_v24 = vmul.f32 %v1642_v10, %v1193_v45  ;;  %v1644_v12 = vpop.f32.mrb[87].mxu1 }
 0x1b0   : > { %v1854_v58 = vmul.f32 %v1644_v12, %v1195_v52 }
 0x1b1   : > { %v7948_v30 = vadd.f32 %v7776_v40, %v1853_v24  ;;  %v1199_v61 = vpop.f32.mrb[88].mxu0 }
 0x1b2   : > { %v7951_v48 = vadd.f32 %v7779_v59, %v1854_v58  ;;  %v1648_v38 = vpop.f32.mrb[88].mxu1  ;;  %v1201_v41 = vpop.f32.mrb[89].mxu0 }
 0x1b3   : > { %v1855_v31 = vmul.f32 %v1648_v38, %v1199_v61  ;;  %v1650_v22 = vpop.f32.mrb[89].mxu1 }
 0x1b4   : > { %v1856_v56 = vmul.f32 %v1650_v22, %v1201_v41 }
 0x1b5   : > { %v7954_v43 = vadd.f32 %v7788_v62, %v1855_v31  ;;  %v1205_v36 = vpop.f32.mrb[90].mxu0 }
 0x1b6   : > { %v7957_v25 = vadd.f32 %v7791_v1, %v1856_v56  ;;  %v1654_v42 = vpop.f32.mrb[90].mxu1  ;;  %v1207_v40 = vpop.f32.mrb[91].mxu0 }
 0x1b7   : > { %v1857_v32 = vmul.f32 %v1654_v42, %v1205_v36  ;;  %v1656_v11 = vpop.f32.mrb[91].mxu1 }
 0x1b8   : > { %v1858_v15 = vmul.f32 %v1656_v11, %v1207_v40 }
 0x1b9   : > { %v7960_v59 = vadd.f32 %v7795_v21, %v1857_v32  ;;  %v1211_v44 = vpop.f32.mrb[92].mxu0 }
 0x1ba   : > { %v7963_v35 = vadd.f32 %v7798_v27, %v1858_v15  ;;  %v1660_v57 = vpop.f32.mrb[92].mxu1  ;;  %v1213_v62 = vpop.f32.mrb[93].mxu0 }
 0x1bb   : > { %v1859_v8 = vmul.f32 %v1660_v57, %v1211_v44  ;;  %v1662_v37 = vpop.f32.mrb[93].mxu1 }
 0x1bc   : > { %v1860_v18 = vmul.f32 %v1662_v37, %v1213_v62 }
 0x1bd   : > { %v7966_v1 = vadd.f32 %v7801_v39, %v1859_v8  ;;  %v1217_v17 = vpop.f32.mrb[94].mxu0 }
 0x1be   : > { %v7969_v49 = vadd.f32 %v7804_v46, %v1860_v18  ;;  %v1666_v47 = vpop.f32.mrb[94].mxu1  ;;  %v1219_v21 = vpop.f32.mrb[95].mxu0 }
 0x1bf   : > { %v1861_v5 = vmul.f32 %v1666_v47, %v1217_v17  ;;  %v1668_v45 = vpop.f32.mrb[95].mxu1 }
 0x1c0   : > { %v1862_v10 = vmul.f32 %v1668_v45, %v1219_v21 }
 0x1c1   : > { %v7972_v27 = vadd.f32 %v7807_v26, %v1861_v5  ;;  %v1223_v52 = vpop.f32.mrb[96].mxu0 }
 0x1c2   : > { %v7975_v24 = vadd.f32 %v7810_v60, %v1862_v10  ;;  %v1672_v12 = vpop.f32.mrb[96].mxu1  ;;  %v1225_v39 = vpop.f32.mrb[97].mxu0 }
 0x1c3   : > { %v1863_v58 = vmul.f32 %v1672_v12, %v1223_v52  ;;  %v1674_v61 = vpop.f32.mrb[97].mxu1 }
 0x1c4   : > { %v1864_v38 = vmul.f32 %v1674_v61, %v1225_v39 }
 0x1c5   : > { %v1959_v46 = vadd.f32 %v7819_v51, %v1863_v58  ;;  %v1229_v41 = vpop.f32.mrb[98].mxu0 }
 0x1c6   : > { %v1960_v31 = vadd.f32 %v7828_v4, %v1864_v38  ;;  %v1678_v22 = vpop.f32.mrb[98].mxu1  ;;  %v1231_v36 = vpop.f32.mrb[99].mxu0 }
 0x1c7   : > { %v1865_v56 = vmul.f32 %v1678_v22, %v1229_v41  ;;  %v1680_v42 = vpop.f32.mrb[99].mxu1 }
 0x1c8   : > { %v1866_v26 = vmul.f32 %v1680_v42, %v1231_v36  ;;  %2119 = vmatprep.mubr.f32.mxu0 %v1960_v31 }
 0x1c9   : > { %v1961_v60 = vadd.f32 %v7838_v16, %v1865_v56  ;;  %2120 = vmatmul.mubr.f32.vlgmr.msra.gmra.mrb[128].mxu0 %v1959_v46  ;;  %v1235_v40 = vpop.f32.mrb[100].mxu0 }
 0x1ca   : > { %v1962_v32 = vadd.f32 %v7841_v14, %v1866_v26  ;;  %v1684_v11 = vpop.f32.mrb[100].mxu1  ;;  %v1237_v44 = vpop.f32.mrb[101].mxu0 }
 0x1cb   : > { %v1867_v15 = vmul.f32 %v1684_v11, %v1235_v40  ;;  %v1686_v57 = vpop.f32.mrb[101].mxu1 }
 0x1cc   : > { %v1868_v51 = vmul.f32 %v1686_v57, %v1237_v44  ;;  %2125 = vmatprep.mubr.f32.mxu0 %v1962_v32 }
 0x1cd   : > { %v1963_v4 = vadd.f32 %v7851_v2, %v1867_v15  ;;  %2126 = vmatmul.mubr.f32.gmra.mrb[130].mxu0 %v1961_v60  ;;  %v1241_v62 = vpop.f32.mrb[102].mxu0 }
 0x1ce   : > { %v1964_v8 = vadd.f32 %v7854_v50, %v1868_v51  ;;  %v1690_v37 = vpop.f32.mrb[102].mxu1  ;;  %v1243_v17 = vpop.f32.mrb[103].mxu0 }
 0x1cf   : > { %v1869_v18 = vmul.f32 %v1690_v37, %v1241_v62  ;;  %v1692_v16 = vpop.f32.mrb[103].mxu1 }
 0x1d0   : > { %v1870_v47 = vmul.f32 %v1692_v16, %v1243_v17  ;;  %2131 = vmatprep.mubr.f32.mxu0 %v1964_v8 }
 0x1d1   : > { %v1965_v14 = vadd.f32 %v7864_v55, %v1869_v18  ;;  %2132 = vmatmul.mubr.f32.gmra.mrb[132].mxu0 %v1963_v4  ;;  %v1247_v21 = vpop.f32.mrb[104].mxu0 }
 0x1d2   : > { %v1966_v5 = vadd.f32 %v7867_v3, %v1870_v47  ;;  %v1696_v45 = vpop.f32.mrb[104].mxu1  ;;  %v1249_v52 = vpop.f32.mrb[105].mxu0 }
 0x1d3   : > { %v1871_v10 = vmul.f32 %v1696_v45, %v1247_v21  ;;  %v1698_v2 = vpop.f32.mrb[105].mxu1 }
 0x1d4   : > { %v1872_v12 = vmul.f32 %v1698_v2, %v1249_v52  ;;  %2137 = vmatprep.mubr.f32.mxu0 %v1966_v5 }
 0x1d5   : > { %v1967_v50 = vadd.f32 %v7877_v33, %v1871_v10  ;;  %2138 = vmatmul.mubr.f32.gmra.mrb[134].mxu0 %v1965_v14  ;;  %v1253_v39 = vpop.f32.mrb[106].mxu0 }
 0x1d6   : > { %v1968_v58 = vadd.f32 %v7880_v34, %v1872_v12  ;;  %v1702_v61 = vpop.f32.mrb[106].mxu1  ;;  %v1255_v46 = vpop.f32.mrb[107].mxu0 }
 0x1d7   : > { %v1873_v38 = vmul.f32 %v1702_v61, %v1253_v39  ;;  %v1704_v55 = vpop.f32.mrb[107].mxu1 }
 0x1d8   : > { %v1874_v31 = vmul.f32 %v1704_v55, %v1255_v46  ;;  %2143 = vmatprep.mubr.f32.mxu0 %v1968_v58 }
 0x1d9   : > { %v1969_v3 = vadd.f32 %v7890_v53, %v1873_v38  ;;  %2144 = vmatmul.mubr.f32.gmra.mrb[136].mxu0 %v1967_v50  ;;  %v1259_v22 = vpop.f32.mrb[108].mxu0 }
 0x1da   : > { %v1970_v41 = vadd.f32 %v7893_v54, %v1874_v31  ;;  %v1708_v56 = vpop.f32.mrb[108].mxu1  ;;  %v1261_v42 = vpop.f32.mrb[109].mxu0 }
 0x1db   : > { %v1875_v36 = vmul.f32 %v1708_v56, %v1259_v22  ;;  %v1710_v33 = vpop.f32.mrb[109].mxu1 }
 0x1dc   : > { %v1876_v26 = vmul.f32 %v1710_v33, %v1261_v42  ;;  %2149 = vmatprep.mubr.f32.mxu0 %v1970_v41 }
 0x1dd   : > { %v1971_v34 = vadd.f32 %v7903_v63, %v1875_v36  ;;  %2150 = vmatmul.mubr.f32.gmra.mrb[138].mxu0 %v1969_v3  ;;  %v1265_v32 = vpop.f32.mrb[110].mxu0 }
 0x1de   : > { %v1972_v60 = vadd.f32 %v7906_v0, %v1876_v26  ;;  %v1714_v40 = vpop.f32.mrb[110].mxu1  ;;  %v1267_v15 = vpop.f32.mrb[111].mxu0 }
 0x1df   : > { %v1877_v11 = vmul.f32 %v1714_v40, %v1265_v32  ;;  %v1716_v53 = vpop.f32.mrb[111].mxu1 }
 0x1e0   : > { %v1878_v44 = vmul.f32 %v1716_v53, %v1267_v15  ;;  %2155 = vmatprep.mubr.f32.mxu0 %v1972_v60 }
 0x1e1   : > { %v1973_v54 = vadd.f32 %v7916_v19, %v1877_v11  ;;  %2156 = vmatmul.mubr.f32.gmra.mrb[140].mxu0 %v1971_v34  ;;  %v1271_v51 = vpop.f32.mrb[112].mxu0 }
 0x1e2   : > { %v1974_v57 = vadd.f32 %v7919_v9, %v1878_v44  ;;  %v1720_v4 = vpop.f32.mrb[112].mxu1  ;;  %v1273_v62 = vpop.f32.mrb[113].mxu0 }
 0x1e3   : > { %v1879_v8 = vmul.f32 %v1720_v4, %v1271_v51  ;;  %v1722_v63 = vpop.f32.mrb[113].mxu1 }
 0x1e4   : > { %v1880_v37 = vmul.f32 %v1722_v63, %v1273_v62  ;;  %2161 = vmatprep.mubr.f32.mxu0 %v1974_v57 }
 0x1e5   : > { %v1975_v0 = vadd.f32 %v7929_v20, %v1879_v8  ;;  %2162 = vmatmul.mubr.f32.gmra.mrb[142].mxu0 %v1973_v54  ;;  %v1277_v17 = vpop.f32.mrb[114].mxu0 }
 0x1e6   : > { %v1976_v18 = vadd.f32 %v7932_v29, %v1880_v37  ;;  %v1726_v16 = vpop.f32.mrb[114].mxu1  ;;  %v1279_v14 = vpop.f32.mrb[115].mxu0 }
 0x1e7   : > { %v1881_v47 = vmul.f32 %v1726_v16, %v1277_v17  ;;  %v1728_v19 = vpop.f32.mrb[115].mxu1 }
 0x1e8   : > { %v1882_v5 = vmul.f32 %v1728_v19, %v1279_v14  ;;  %2167 = vmatprep.mubr.f32.mxu0 %v1976_v18 }
 0x1e9   : > { %v1977_v9 = vadd.f32 %v7936_v28, %v1881_v47  ;;  %2168 = vmatmul.mubr.f32.gmra.mrb[144].mxu0 %v1975_v0  ;;  %v1283_v45 = vpop.f32.mrb[116].mxu0 }
 0x1ea   : > { %v1978_v21 = vadd.f32 %v7939_v13, %v1882_v5  ;;  %v1732_v10 = vpop.f32.mrb[116].mxu1  ;;  %v1285_v2 = vpop.f32.mrb[117].mxu0 }
 0x1eb   : > { %v1883_v52 = vmul.f32 %v1732_v10, %v1283_v45  ;;  %v1734_v20 = vpop.f32.mrb[117].mxu1 }
 0x1ec   : > { %v1884_v12 = vmul.f32 %v1734_v20, %v1285_v2  ;;  %2173 = vmatprep.mubr.f32.mxu0 %v1978_v21 }
 0x1ed   : > { %v1979_v29 = vadd.f32 %v7942_v6, %v1883_v52  ;;  %2174 = vmatmul.mubr.f32.gmra.mrb[146].mxu0 %v1977_v9  ;;  %v1289_v58 = vpop.f32.mrb[118].mxu0 }
 0x1ee   : > { %v1980_v50 = vadd.f32 %v7945_v23, %v1884_v12  ;;  %v1738_v39 = vpop.f32.mrb[118].mxu1  ;;  %v1291_v38 = vpop.f32.mrb[119].mxu0 }
 0x1ef   : > { %v1885_v61 = vmul.f32 %v1738_v39, %v1289_v58  ;;  %v1740_v28 = vpop.f32.mrb[119].mxu1 }
 0x1f0   : > { %v1886_v46 = vmul.f32 %v1740_v28, %v1291_v38  ;;  %2179 = vmatprep.mubr.f32.mxu0 %v1980_v50 }
 0x1f1   : > { %v1981_v13 = vadd.f32 %v7948_v30, %v1885_v61  ;;  %2180 = vmatmul.mubr.f32.gmra.mrb[148].mxu0 %v1979_v29  ;;  %v1295_v31 = vpop.f32.mrb[120].mxu0 }
 0x1f2   : > { %v1982_v55 = vadd.f32 %v7951_v48, %v1886_v46  ;;  %v1744_v3 = vpop.f32.mrb[120].mxu1  ;;  %v1297_v22 = vpop.f32.mrb[121].mxu0 }
 0x1f3   : > { %v1887_v41 = vmul.f32 %v1744_v3, %v1295_v31  ;;  %v1746_v6 = vpop.f32.mrb[121].mxu1 }
 0x1f4   : > { %v1888_v56 = vmul.f32 %v1746_v6, %v1297_v22  ;;  %2185 = vmatprep.mubr.f32.mxu0 %v1982_v55 }
 0x1f5   : > { %v1983_v23 = vadd.f32 %v7954_v43, %v1887_v41  ;;  %2186 = vmatmul.mubr.f32.gmra.mrb[150].mxu0 %v1981_v13  ;;  %v1301_v42 = vpop.f32.mrb[122].mxu0 }
 0x1f6   : > { %v1984_v36 = vadd.f32 %v7957_v25, %v1888_v56  ;;  %v1750_v33 = vpop.f32.mrb[122].mxu1  ;;  %v1303_v34 = vpop.f32.mrb[123].mxu0 }
 0x1f7   : > { %v1889_v26 = vmul.f32 %v1750_v33, %v1301_v42  ;;  %v1752_v30 = vpop.f32.mrb[123].mxu1 }
 0x1f8   : > { %v1890_v60 = vmul.f32 %v1752_v30, %v1303_v34  ;;  %2191 = vmatprep.mubr.f32.mxu0 %v1984_v36 }
 0x1f9   : > { %v1985_v48 = vadd.f32 %v7960_v59, %v1889_v26  ;;  %2192 = vmatmul.mubr.f32.gmra.mrb[152].mxu0 %v1983_v23  ;;  %v1307_v40 = vpop.f32.mrb[124].mxu0 }
 0x1fa   : > { %v1986_v32 = vadd.f32 %v7963_v35, %v1890_v60  ;;  %v1756_v11 = vpop.f32.mrb[124].mxu1  ;;  %v1309_v53 = vpop.f32.mrb[125].mxu0 }
 0x1fb   : > { %v1891_v15 = vmul.f32 %v1756_v11, %v1307_v40  ;;  %v1758_v43 = vpop.f32.mrb[125].mxu1 }
 0x1fc   : > { %v1892_v44 = vmul.f32 %v1758_v43, %v1309_v53  ;;  %2197 = vmatprep.mubr.f32.mxu0 %v1986_v32 }
 0x1fd   : > { %v1987_v25 = vadd.f32 %v7966_v1, %v1891_v15  ;;  %2198 = vmatmul.mubr.f32.gmra.mrb[154].mxu0 %v1985_v48  ;;  %v1313_v57 = vpop.f32.mrb[126].mxu0 }
 0x1fe   : > { %v1988_v54 = vadd.f32 %v7969_v49, %v1892_v44  ;;  %v1762_v51 = vpop.f32.mrb[126].mxu1  ;;  %v1315_v8 = vpop.f32.mrb[127].mxu0 }
 0x1ff   : > { %v1893_v4 = vmul.f32 %v1762_v51, %v1313_v57  ;;  %v1764_v59 = vpop.f32.mrb[127].mxu1 }
 0x200   : > { %v1894_v62 = vmul.f32 %v1764_v59, %v1315_v8  ;;  %2203 = vmatprep.mubr.f32.mxu0 %v1988_v54 }
 0x201   : > { %v1989_v35 = vadd.f32 %v7972_v27, %v1893_v4  ;;  %2204 = vmatmul.mubr.f32.gmra.mrb[156].mxu0 %v1987_v25  ;;  %v2631_v25 = vld [vmem:[%s9519_s4] sm:$0xff]  ;;  %s9420_s4 = scalar_lea.sflag [#allocation3], %s594_s0 }
 0x202   : > { %v1990_v63 = vadd.f32 %v7975_v24, %v1894_v62  ;;  %v2633_v54 = vcombine.high %v2631_v25, %v2631_v25 }
 0x204   : > { %2209 = vmatprep.mubr.f32.mxu0 %v1990_v63  ;;  %5556 = vmatprep.subr.msk.mxu0 %vm2731_vm1, %v2633_v54 }
 0x205   : > { %2210 = vmatmul.mubr.f32.gmra.mrb[158].mxu0 %v1989_v35 }
 0x206   : > { %2800 = vmatprep.mubr.f32.mxu0 %v9490_v7  ;;  %5557 = vmatpush1.msk.msra.mxu0 %vm2731_vm1, %v2631_v25 }
 0x29c   : > { %v8010_v1 = vpop.f32.mrb[128].mxu0 }
 0x29d   : > { %v8012_v37 = vpop.f32.mrb[129].mxu0  ;;  %v2216_v41 = vmul.f32 %v8010_v1, %v8010_v1 }
 0x29e   : > { %2344 = vmatprep.mubr.f32.mxu1 %v8012_v37  ;;  %v2217_v3 = vmul.f32 %v8012_v37, %v8012_v37 }
 0x29f   : > { %2345 = vmatmul.mubr.f32.vlgmr.msra.gmra.mrb[128].mxu1 %v8010_v1 }
 0x2a0   : > { %v8016_v49 = vpop.f32.mrb[130].mxu0 }
 0x2a1   : > { %v8018_v0 = vpop.f32.mrb[131].mxu0  ;;  %v2218_v6 = vmul.f32 %v8016_v49, %v8016_v49 }
 0x2a2   : > { %2349 = vmatprep.mubr.f32.mxu1 %v8018_v0  ;;  %v2219_v22 = vmul.f32 %v8018_v0, %v8018_v0 }
 0x2a3   : > { %2350 = vmatmul.mubr.f32.gmra.mrb[130].mxu1 %v8016_v49 }
 0x2a4   : > { %v8022_v27 = vpop.f32.mrb[132].mxu0 }
 0x2a5   : > { %v8024_v24 = vpop.f32.mrb[133].mxu0  ;;  %v2220_v23 = vmul.f32 %v8022_v27, %v8022_v27 }
 0x2a6   : > { %2354 = vmatprep.mubr.f32.mxu1 %v8024_v24  ;;  %v2221_v56 = vmul.f32 %v8024_v24, %v8024_v24 }
 0x2a7   : > { %2355 = vmatmul.mubr.f32.gmra.mrb[132].mxu1 %v8022_v27 }
 0x2a8   : > { %v8028_v18 = vpop.f32.mrb[134].mxu0 }
 0x2a9   : > { %v8030_v17 = vpop.f32.mrb[135].mxu0  ;;  %v2222_v42 = vmul.f32 %v8028_v18, %v8028_v18 }
 0x2aa   : > { %2359 = vmatprep.mubr.f32.mxu1 %v8030_v17  ;;  %v2223_v36 = vmul.f32 %v8030_v17, %v8030_v17 }
 0x2ab   : > { %2360 = vmatmul.mubr.f32.gmra.mrb[134].mxu1 %v8028_v18 }
 0x2ac   : > { %v8034_v16 = vpop.f32.mrb[136].mxu0 }
 0x2ad   : > { %v8036_v47 = vpop.f32.mrb[137].mxu0  ;;  %v2224_v26 = vmul.f32 %v8034_v16, %v8034_v16 }
 0x2ae   : > { %2364 = vmatprep.mubr.f32.mxu1 %v8036_v47  ;;  %v2225_v33 = vmul.f32 %v8036_v47, %v8036_v47 }
 0x2af   : > { %2365 = vmatmul.mubr.f32.gmra.mrb[136].mxu1 %v8034_v16 }
 0x2b0   : > { %v8040_v14 = vpop.f32.mrb[138].mxu0 }
 0x2b1   : > { %v8042_v19 = vpop.f32.mrb[139].mxu0  ;;  %v2226_v30 = vmul.f32 %v8040_v14, %v8040_v14 }
 0x2b2   : > { %2369 = vmatprep.mubr.f32.mxu1 %v8042_v19  ;;  %v2227_v34 = vmul.f32 %v8042_v19, %v8042_v19 }
 0x2b3   : > { %2370 = vmatmul.mubr.f32.gmra.mrb[138].mxu1 %v8040_v14 }
 0x2b4   : > { %v8046_v5 = vpop.f32.mrb[140].mxu0 }
 0x2b5   : > { %v8048_v9 = vpop.f32.mrb[141].mxu0  ;;  %v2228_v48 = vmul.f32 %v8046_v5, %v8046_v5 }
 0x2b6   : > { %2374 = vmatprep.mubr.f32.mxu1 %v8048_v9  ;;  %v2229_v60 = vmul.f32 %v8048_v9, %v8048_v9 }
 0x2b7   : > { %2375 = vmatmul.mubr.f32.gmra.mrb[140].mxu1 %v8046_v5 }
 0x2b8   : > { %v8052_v21 = vpop.f32.mrb[142].mxu0 }
 0x2b9   : > { %v8054_v45 = vpop.f32.mrb[143].mxu0  ;;  %v2230_v40 = vmul.f32 %v8052_v21, %v8052_v21 }
 0x2ba   : > { %2379 = vmatprep.mubr.f32.mxu1 %v8054_v45  ;;  %v2231_v32 = vmul.f32 %v8054_v45, %v8054_v45 }
 0x2bb   : > { %2380 = vmatmul.mubr.f32.gmra.mrb[142].mxu1 %v8052_v21 }
 0x2bc   : > { %v8058_v10 = vpop.f32.mrb[144].mxu0 }
 0x2bd   : > { %v8060_v52 = vpop.f32.mrb[145].mxu0  ;;  %v2232_v15 = vmul.f32 %v8058_v10, %v8058_v10 }
 0x2be   : > { %2384 = vmatprep.mubr.f32.mxu1 %v8060_v52  ;;  %v2233_v11 = vmul.f32 %v8060_v52, %v8060_v52 }
 0x2bf   : > { %2385 = vmatmul.mubr.f32.gmra.mrb[144].mxu1 %v8058_v10 }
 0x2c0   : > { %v8064_v2 = vpop.f32.mrb[146].mxu0 }
 0x2c1   : > { %v8066_v20 = vpop.f32.mrb[147].mxu0  ;;  %v2234_v43 = vmul.f32 %v8064_v2, %v8064_v2 }
 0x2c2   : > { %2389 = vmatprep.mubr.f32.mxu1 %v8066_v20  ;;  %v2235_v53 = vmul.f32 %v8066_v20, %v8066_v20 }
 0x2c3   : > { %2390 = vmatmul.mubr.f32.gmra.mrb[146].mxu1 %v8064_v2 }
 0x2c4   : > { %v8070_v12 = vpop.f32.mrb[148].mxu0 }
 0x2c5   : > { %v8072_v29 = vpop.f32.mrb[149].mxu0  ;;  %v2236_v57 = vmul.f32 %v8070_v12, %v8070_v12 }
 0x2c6   : > { %2394 = vmatprep.mubr.f32.mxu1 %v8072_v29  ;;  %v2237_v44 = vmul.f32 %v8072_v29, %v8072_v29 }
 0x2c7   : > { %2395 = vmatmul.mubr.f32.gmra.mrb[148].mxu1 %v8070_v12 }
 0x2c8   : > { %v8076_v50 = vpop.f32.mrb[150].mxu0 }
 0x2c9   : > { %v8078_v58 = vpop.f32.mrb[151].mxu0  ;;  %v2238_v4 = vmul.f32 %v8076_v50, %v8076_v50 }
 0x2ca   : > { %2399 = vmatprep.mubr.f32.mxu1 %v8078_v58  ;;  %v2239_v51 = vmul.f32 %v8078_v58, %v8078_v58 }
 0x2cb   : > { %2400 = vmatmul.mubr.f32.gmra.mrb[150].mxu1 %v8076_v50 }
 0x2cc   : > { %v8082_v39 = vpop.f32.mrb[152].mxu0 }
 0x2cd   : > { %v8084_v61 = vpop.f32.mrb[153].mxu0  ;;  %v2240_v59 = vmul.f32 %v8082_v39, %v8082_v39 }
 0x2ce   : > { %2404 = vmatprep.mubr.f32.mxu1 %v8084_v61  ;;  %v2241_v8 = vmul.f32 %v8084_v61, %v8084_v61 }
 0x2cf   : > { %2405 = vmatmul.mubr.f32.gmra.mrb[152].mxu1 %v8082_v39 }
 0x2d0   : > { %v8088_v38 = vpop.f32.mrb[154].mxu0 }
 0x2d1   : > { %v8090_v28 = vpop.f32.mrb[155].mxu0  ;;  %v2242_v35 = vmul.f32 %v8088_v38, %v8088_v38 }
 0x2d2   : > { %2409 = vmatprep.mubr.f32.mxu1 %v8090_v28  ;;  %v2243_v62 = vmul.f32 %v8090_v28, %v8090_v28 }
 0x2d3   : > { %2410 = vmatmul.mubr.f32.gmra.mrb[154].mxu1 %v8088_v38 }
 0x2d4   : > { %v8094_v46 = vpop.f32.mrb[156].mxu0 }
 0x2d5   : > { %9515 = vst [vmem:[#allocation11_spill] sm:$0xff] %v8094_v46  ;;  %v8096_v13 = vpop.f32.mrb[157].mxu0 }
 0x2d6   : > { %9516 = vst [vmem:[#allocation12_spill] sm:$0xff] %v8096_v13  ;;  %2414 = vmatprep.mubr.f32.mxu1 %v8096_v13  ;;  %v2245_v63 = vmul.f32 %v8096_v13, %v8096_v13 }
 0x2d7   : > { %2415 = vmatmul.mubr.f32.gmra.mrb[156].mxu1 %v8094_v46 }
 0x2d8   : > { %v8100_v55 = vpop.f32.mrb[158].mxu0 }
 0x2d9   : > { %9517 = vst [vmem:[#allocation13_spill] sm:$0xff] %v8100_v55  ;;  %v8102_v31 = vpop.f32.mrb[159].mxu0 }
 0x2da   : > { %9518 = vst [vmem:[#allocation14_spill] sm:$0xff] %v8102_v31  ;;  %2419 = vmatprep.mubr.f32.mxu1 %v8102_v31 }
 0x2db   : > { %2420 = vmatmul.mubr.f32.gmra.mrb[158].mxu1 %v8100_v55 }
 0x2dc   : > { %2424 = vmatprep.mubr.f32.mxu1 %v2217_v3  ;;  %v2244_v3 = vmul.f32 %v8094_v46, %v8094_v46 }
 0x2df   : > { %2425 = vmatmul.mubr.f32.gmra.mrb[160].mxu1 %v2216_v41  ;;  %v2247_v41 = vmul.f32 %v8102_v31, %v8102_v31 }
 0x2e0   : > { %2429 = vmatprep.mubr.f32.mxu1 %v2219_v22  ;;  %v2246_v22 = vmul.f32 %v8100_v55, %v8100_v55 }
 0x2e3   : > { %2430 = vmatmul.mubr.f32.gmra.mrb[162].mxu1 %v2218_v6 }
 0x2e4   : > { %2434 = vmatprep.mubr.f32.mxu1 %v2221_v56 }
 0x2e7   : > { %2435 = vmatmul.mubr.f32.gmra.mrb[164].mxu1 %v2220_v23 }
 0x2e8   : > { %2439 = vmatprep.mubr.f32.mxu1 %v2223_v36 }
 0x2eb   : > { %2440 = vmatmul.mubr.f32.gmra.mrb[166].mxu1 %v2222_v42 }
 0x2ec   : > { %2444 = vmatprep.mubr.f32.mxu1 %v2225_v33 }
 0x2ef   : > { %2445 = vmatmul.mubr.f32.gmra.mrb[168].mxu1 %v2224_v26 }
 0x2f0   : > { %2449 = vmatprep.mubr.f32.mxu1 %v2227_v34 }
 0x2f3   : > { %2450 = vmatmul.mubr.f32.gmra.mrb[170].mxu1 %v2226_v30 }
 0x2f4   : > { %2454 = vmatprep.mubr.f32.mxu1 %v2229_v60 }
 0x2f7   : > { %2455 = vmatmul.mubr.f32.gmra.mrb[172].mxu1 %v2228_v48 }
 0x2f8   : > { %2459 = vmatprep.mubr.f32.mxu1 %v2231_v32 }
 0x2fb   : > { %2460 = vmatmul.mubr.f32.gmra.mrb[174].mxu1 %v2230_v40 }
 0x2fc   : > { %2464 = vmatprep.mubr.f32.mxu1 %v2233_v11 }
 0x2ff   : > { %2465 = vmatmul.mubr.f32.gmra.mrb[176].mxu1 %v2232_v15 }
 0x300   : > { %2469 = vmatprep.mubr.f32.mxu1 %v2235_v53 }
 0x303   : > { %2470 = vmatmul.mubr.f32.gmra.mrb[178].mxu1 %v2234_v43 }
 0x304   : > { %2474 = vmatprep.mubr.f32.mxu1 %v2237_v44 }
 0x307   : > { %2475 = vmatmul.mubr.f32.gmra.mrb[180].mxu1 %v2236_v57 }
 0x308   : > { %2479 = vmatprep.mubr.f32.mxu1 %v2239_v51 }
 0x30b   : > { %2480 = vmatmul.mubr.f32.gmra.mrb[182].mxu1 %v2238_v4 }
 0x30c   : > { %2484 = vmatprep.mubr.f32.mxu1 %v2241_v8 }
 0x30f   : > { %2485 = vmatmul.mubr.f32.gmra.mrb[184].mxu1 %v2240_v59 }
 0x310   : > { %2489 = vmatprep.mubr.f32.mxu1 %v2243_v62 }
 0x313   : > { %2490 = vmatmul.mubr.f32.gmra.mrb[186].mxu1 %v2242_v35 }
 0x314   : > { %2494 = vmatprep.mubr.f32.mxu1 %v2245_v63 }
 0x317   : > { %2495 = vmatmul.mubr.f32.gmra.mrb[188].mxu1 %v2244_v3 }
 0x318   : > { %2499 = vmatprep.mubr.f32.mxu1 %v2247_v41 }
 0x31b   : > { %2500 = vmatmul.mubr.f32.gmra.mrb[190].mxu1 %v2246_v22 }
 0x372   : > { %v8173_v6 = vpop.f32.mrb[128].mxu1 }
 0x373   : > { %v2348_v56 = vpop.f32.mrb[129].mxu1 }
 0x376   : > { %v8175_v23 = vpop.f32.mrb[130].mxu1 }
 0x377   : > { %v2353_v36 = vpop.f32.mrb[131].mxu1 }
 0x378   : > { %v2505_v36 = vmul.f32 %v8173_v6, %v8173_v6 }
 0x37a   : > { %v8177_v42 = vpop.f32.mrb[132].mxu1 }
 0x37b   : > { %v2358_v33 = vpop.f32.mrb[133].mxu1 }
 0x37e   : > { %v8179_v26 = vpop.f32.mrb[134].mxu1 }
 0x37f   : > { %v2363_v34 = vpop.f32.mrb[135].mxu1 }
 0x382   : > { %v8181_v30 = vpop.f32.mrb[136].mxu1 }
 0x383   : > { %v2368_v60 = vpop.f32.mrb[137].mxu1 }
 0x386   : > { %v8183_v48 = vpop.f32.mrb[138].mxu1 }
 0x387   : > { %v2373_v32 = vpop.f32.mrb[139].mxu1 }
 0x388   : > { %v2506_v32 = vmul.f32 %v8175_v23, %v8175_v23 }
 0x38a   : > { %v8185_v40 = vpop.f32.mrb[140].mxu1 }
 0x38b   : > { %v2378_v11 = vpop.f32.mrb[141].mxu1 }
 0x38e   : > { %v8187_v15 = vpop.f32.mrb[142].mxu1 }
 0x38f   : > { %v2383_v53 = vpop.f32.mrb[143].mxu1 }
 0x392   : > { %v8189_v43 = vpop.f32.mrb[144].mxu1 }
 0x393   : > { %v2388_v44 = vpop.f32.mrb[145].mxu1 }
 0x396   : > { %v8191_v25 = vpop.f32.mrb[146].mxu1 }
 0x397   : > { %v2393_v54 = vpop.f32.mrb[147].mxu1 }
 0x39a   : > { %v8193_v57 = vpop.f32.mrb[148].mxu1 }
 0x39b   : > { %v2398_v51 = vpop.f32.mrb[149].mxu1 }
 0x39c   : > { %v2507_v51 = vmul.f32 %v8177_v42, %v8177_v42 }
 0x39e   : > { %v8195_v4 = vpop.f32.mrb[150].mxu1 }
 0x39f   : > { %v2403_v8 = vpop.f32.mrb[151].mxu1 }
 0x3a2   : > { %v8197_v59 = vpop.f32.mrb[152].mxu1 }
 0x3a3   : > { %v2408_v62 = vpop.f32.mrb[153].mxu1 }
 0x3a6   : > { %v8199_v35 = vpop.f32.mrb[154].mxu1 }
 0x3a7   : > { %v2413_v63 = vpop.f32.mrb[155].mxu1 }
 0x3aa   : > { %v8201_v3 = vpop.f32.mrb[156].mxu1 }
 0x3ab   : > { %v2418_v41 = vpop.f32.mrb[157].mxu1 }
 0x3ae   : > { %v8203_v22 = vpop.f32.mrb[158].mxu1 }
 0x3af   : > { %v2423_v56 = vpop.f32.mrb[159].mxu1 }
 0x3b0   : > { %v2508_v56 = vmul.f32 %v8179_v26, %v8179_v26 }
 0x3b2   : > { %v2426_v33 = vpop.f32.mrb[160].mxu1 }
 0x3b3   : > { %v2521_v34 = vsub.f32 %v2426_v33, %v2505_v36  ;;  %v2428_v60 = vpop.f32.mrb[161].mxu1 }
 0x3b5   : > { %v2537_v11 = vadd.f32 1e-05, %v2521_v34  ;;  %v8216_v34 = vld [vmem:[%s9520_s5] ss:$0 sm:$0xff] }
 0x3b6   : > { %v2431_v53 = vpop.f32.mrb[162].mxu1 }
 0x3b7   : > { %6690 = vrsqrt.f32 %v2537_v11  ;;  %v2522_v44 = vsub.f32 %v2431_v53, %v2506_v32  ;;  %v2433_v54 = vpop.f32.mrb[163].mxu1  ;;  %v3169_v11 = vld [vmem:[%s9468_s7 + $0x80] sm:$0xff]  ;;  %v3170_v53 = vld [vmem:[%s9468_s7 + $0x88] sm:$0xff] }
 0x3b9   : > { %v2538_v8 = vadd.f32 1e-05, %v2522_v44  ;;  %v3153_v44 = vld [vmem:[%s9468_s7] sm:$0xff] }
 0x3ba   : > { %v2436_v62 = vpop.f32.mrb[164].mxu1 }
 0x3bb   : > { %6692 = vrsqrt.f32 %v2538_v8  ;;  %v2523_v63 = vsub.f32 %v2436_v62, %v2507_v51  ;;  %v2438_v41 = vpop.f32.mrb[165].mxu1  ;;  %v2509_v51 = vmul.f32 %v8181_v30, %v8181_v30  ;;  %v6482_v62 = vpack.c.bf16 %v3170_v53, %v3169_v11  ;;  %v3156_v11 = vld [vmem:[%s9468_s7 + $0x18] sm:$0xff]  ;;  %v3173_v53 = vld [vmem:[%s9468_s7 + $0xa0] sm:$0xff] }
 0x3bc   : > { %v3171_v41 = vld [vmem:[%s9468_s7 + $0x90] sm:$0xff] }
 0x3bd   : > { %v2539_v36 = vadd.f32 1e-05, %v2523_v63  ;;  %v3154_v63 = vld [vmem:[%s9468_s7 + $0x8] sm:$0xff]  ;;  %6483 = vmatprep.subr.bf16.mxu1 %v6482_v62 }
 0x3be   : > { %v2441_v33 = vpop.f32.mrb[166].mxu1 }
 0x3bf   : > { %6694 = vrsqrt.f32 %v2539_v36  ;;  %v2524_v60 = vsub.f32 %v2441_v33, %v2508_v56  ;;  %v2443_v32 = vpop.f32.mrb[167].mxu1  ;;  %v3172_v56 = vld [vmem:[%s9468_s7 + $0x98] sm:$0xff] }
 0x3c0   : > { %v6484_v32 = vpack.c.bf16 %v3154_v63, %v3153_v44  ;;  %v6486_v7 = vpack.c.bf16 %v3172_v56, %v3171_v41  ;;  %v3174_v44 = vld [vmem:[%s9468_s7 + $0xa8] sm:$0xff]  ;;  %v2510_v56 = vmul.f32 %v8183_v48, %v8183_v48 }
 0x3c1   : > { %v6691_v54 = vpop.eup %6690  ;;  %v2540_v8 = vadd.f32 1e-05, %v2524_v60  ;;  %v3155_v60 = vld [vmem:[%s9468_s7 + $0x10] sm:$0xff] }
 0x3c2   : > { %v2576_v36 = vmul.f32 %v6691_v54, %v8216_v34  ;;  %v2446_v33 = vpop.f32.mrb[168].mxu1  ;;  %6485 = vmatpush3.bf16.msra.mxu1 %v6484_v32  ;;  %v6488_v63 = vpack.c.bf16 %v3156_v11, %v3155_v60 }
 0x3c3   : > { %6696 = vrsqrt.f32 %v2540_v8  ;;  %v2525_v31 = vsub.f32 %v2446_v33, %v2509_v51  ;;  %v2448_v55 = vpop.f32.mrb[169].mxu1  ;;  %v9521_v8 = vmov 0.0   ;;  %6487 = vmatprep.subr.bf16.mxu1 %v6486_v7  ;;  %v3157_v51 = vld [vmem:[%s9468_s7 + $0x20] sm:$0xff]  ;;  %v3175_v33 = vld [vmem:[%s9468_s7 + $0xb0] sm:$0xff]  ;;  %v3176_v7 = vld [vmem:[%s9468_s7 + $0xb8] sm:$0xff] }
 0x3c4   : > { %5558 = vmatmul.mubr.msk.f32.vlgmr.msra.gmra.mrb[160].mxu0 %vm2634_vm2, %v2576_v36  ;;  %v8253_v54 = vmul.f32 %v2576_v36, %v8173_v6  ;;  %v6490_v55 = vpack.c.bf16 %v3174_v44, %v3173_v53  ;;  %v3158_v6 = vld [vmem:[%s9468_s7 + $0x28] sm:$0xff]  ;;  %v2511_v44 = vmul.f32 %v8185_v40, %v8185_v40  ;;  %v6494_v46 = vpack.c.bf16 %v3176_v7, %v3175_v33 }
 0x3c5   : > { %v6693_v41 = vpop.eup %6692  ;;  %v2541_v13 = vadd.f32 1e-05, %v2525_v31  ;;  %2806 = vmatprep.mubr.f32.mxu0 %v9521_v8  ;;  %v6492_v11 = vpack.c.bf16 %v3158_v6, %v3157_v51  ;;  %v2512_v33 = vmul.f32 %v8187_v15, %v8187_v15 }
 0x3c6   : > { %v2451_v62 = vpop.f32.mrb[170].mxu1  ;;  %v2577_v36 = vmul.f32 %v6693_v41, %v8216_v34  ;;  %6489 = vmatpush3.bf16.msra.mxu1 %v6488_v63 }
 0x3c7   : > { %6698 = vrsqrt.f32 %v2541_v13  ;;  %v2526_v31 = vsub.f32 %v2451_v62, %v2510_v56  ;;  %v2453_v32 = vpop.f32.mrb[171].mxu1  ;;  %6491 = vmatprep.subr.bf16.mxu1 %v6490_v55  ;;  %v3159_v13 = vld [vmem:[%s9468_s7 + $0x30] sm:$0xff] }
 0x3c8   : > { %5559 = vmatmul.mubr.msk.f32.gmra.mrb[162].mxu0 %vm2634_vm2, %v2577_v36  ;;  %v8273_v60 = vmul.f32 %v2577_v36, %v8175_v23  ;;  %v3160_v23 = vld [vmem:[%s9468_s7 + $0x38] sm:$0xff] }
 0x3c9   : > { %v6695_v53 = vpop.eup %6694  ;;  %v2542_v41 = vadd.f32 1e-05, %v2526_v31  ;;  %2812 = vmatprep.mubr.f32.mxu0 %v9521_v8  ;;  %v6496_v55 = vpack.c.bf16 %v3160_v23, %v3159_v13 }
 0x3ca   : > { %v2456_v56 = vpop.f32.mrb[172].mxu1  ;;  %v2578_v63 = vmul.f32 %v6695_v53, %v8216_v34  ;;  %6493 = vmatpush3.bf16.msra.mxu1 %v6492_v11 }
 0x3cb   : > { %6700 = vrsqrt.f32 %v2542_v41  ;;  %v2527_v51 = vsub.f32 %v2456_v56, %v2511_v44  ;;  %v2458_v6 = vpop.f32.mrb[173].mxu1  ;;  %6495 = vmatprep.subr.bf16.mxu1 %v6494_v46  ;;  %v2513_v41 = vmul.f32 %v8189_v43, %v8189_v43 }
 0x3cc   : > { %5560 = vmatmul.mubr.msk.f32.gmra.mrb[164].mxu0 %vm2634_vm2, %v2578_v63  ;;  %v8287_v62 = vmul.f32 %v2578_v63, %v8177_v42  ;;  %v2514_v6 = vmul.f32 %v8191_v25, %v8191_v25 }
 0x3cd   : > { %v6697_v36 = vpop.eup %6696  ;;  %v2543_v7 = vadd.f32 1e-05, %v2527_v51  ;;  %2818 = vmatprep.mubr.f32.mxu0 %v9521_v8 }
 0x3ce   : > { %v2461_v31 = vpop.f32.mrb[174].mxu1  ;;  %v2579_v32 = vmul.f32 %v6697_v36, %v8216_v34  ;;  %6497 = vmatpush3.bf16.msra.mxu1 %v6496_v55 }
 0x3cf   : > { %6702 = vrsqrt.f32 %v2543_v7  ;;  %v2528_v53 = vsub.f32 %v2461_v31, %v2512_v33  ;;  %v2463_v44 = vpop.f32.mrb[175].mxu1 }
 0x3d0   : > { %5561 = vmatmul.mubr.msk.f32.gmra.mrb[166].mxu0 %vm2634_vm2, %v2579_v32  ;;  %v8295_v42 = vmul.f32 %v2579_v32, %v8179_v26 }
 0x3d1   : > { %v6699_v11 = vpop.eup %6698  ;;  %v2544_v13 = vadd.f32 1e-05, %v2528_v53  ;;  %2824 = vmatprep.mubr.f32.mxu0 %v9521_v8  ;;  %v2515_v53 = vmul.f32 %v8193_v57, %v8193_v57 }
 0x3d2   : > { %v2466_v46 = vpop.f32.mrb[176].mxu1  ;;  %v2580_v23 = vmul.f32 %v6699_v11, %v8216_v34 }
 0x3d3   : > { %6704 = vrsqrt.f32 %v2544_v13  ;;  %v2529_v56 = vsub.f32 %v2466_v46, %v2513_v41  ;;  %v2468_v63 = vpop.f32.mrb[177].mxu1 }
 0x3d4   : > { %5562 = vmatmul.mubr.msk.f32.gmra.mrb[168].mxu0 %vm2634_vm2, %v2580_v23  ;;  %v8303_v51 = vmul.f32 %v2580_v23, %v8181_v30 }
 0x3d5   : > { %v6701_v26 = vpop.eup %6700  ;;  %v2545_v55 = vadd.f32 1e-05, %v2529_v56  ;;  %2830 = vmatprep.mubr.f32.mxu0 %v9521_v8  ;;  %v2516_v56 = vmul.f32 %v8195_v4, %v8195_v4 }
 0x3d6   : > { %v2471_v36 = vpop.f32.mrb[178].mxu1  ;;  %v2581_v33 = vmul.f32 %v6701_v26, %v8216_v34 }
 0x3d7   : > { %6706 = vrsqrt.f32 %v2545_v55  ;;  %v2530_v7 = vsub.f32 %v2471_v36, %v2514_v6  ;;  %v2473_v31 = vpop.f32.mrb[179].mxu1 }
 0x3d8   : > { %5563 = vmatmul.mubr.msk.f32.gmra.mrb[170].mxu0 %vm2634_vm2, %v2581_v33  ;;  %v8311_v32 = vmul.f32 %v2581_v33, %v8183_v48 }
 0x3d9   : > { %v6703_v30 = vpop.eup %6702  ;;  %v2546_v44 = vadd.f32 1e-05, %v2530_v7  ;;  %2836 = vmatprep.mubr.f32.mxu0 %v9521_v8  ;;  %v2517_v7 = vmul.f32 %v8197_v59, %v8197_v59 }
 0x3da   : > { %v2476_v11 = vpop.f32.mrb[180].mxu1  ;;  %v2582_v41 = vmul.f32 %v6703_v30, %v8216_v34 }
 0x3db   : > { %6708 = vrsqrt.f32 %v2546_v44  ;;  %v2531_v13 = vsub.f32 %v2476_v11, %v2515_v53  ;;  %v2478_v46 = vpop.f32.mrb[181].mxu1 }
 0x3dc   : > { %5564 = vmatmul.mubr.msk.f32.gmra.mrb[172].mxu0 %vm2634_vm2, %v2582_v41  ;;  %v8319_v23 = vmul.f32 %v2582_v41, %v8185_v40 }
 0x3dd   : > { %v6705_v48 = vpop.eup %6704  ;;  %v2547_v63 = vadd.f32 1e-05, %v2531_v13  ;;  %2842 = vmatprep.mubr.f32.mxu0 %v9521_v8  ;;  %v2518_v13 = vmul.f32 %v8199_v35, %v8199_v35 }
 0x3de   : > { %v2481_v26 = vpop.f32.mrb[182].mxu1  ;;  %v2583_v6 = vmul.f32 %v6705_v48, %v8216_v34 }
 0x3df   : > { %6710 = vrsqrt.f32 %v2547_v63  ;;  %v2532_v55 = vsub.f32 %v2481_v26, %v2516_v56  ;;  %v2483_v36 = vpop.f32.mrb[183].mxu1 }
 0x3e0   : > { %5565 = vmatmul.mubr.msk.f32.gmra.mrb[174].mxu0 %vm2634_vm2, %v2583_v6  ;;  %v8327_v33 = vmul.f32 %v2583_v6, %v8187_v15 }
 0x3e1   : > { %v6707_v40 = vpop.eup %6706  ;;  %v2548_v31 = vadd.f32 1e-05, %v2532_v55  ;;  %2848 = vmatprep.mubr.f32.mxu0 %v9521_v8  ;;  %v2519_v55 = vmul.f32 %v8201_v3, %v8201_v3 }
 0x3e2   : > { %v2486_v30 = vpop.f32.mrb[184].mxu1  ;;  %v2584_v53 = vmul.f32 %v6707_v40, %v8216_v34 }
 0x3e3   : > { %6712 = vrsqrt.f32 %v2548_v31  ;;  %v2533_v44 = vsub.f32 %v2486_v30, %v2517_v7  ;;  %v2488_v11 = vpop.f32.mrb[185].mxu1 }
 0x3e4   : > { %5566 = vmatmul.mubr.msk.f32.gmra.mrb[176].mxu0 %vm2634_vm2, %v2584_v53  ;;  %v8335_v41 = vmul.f32 %v2584_v53, %v8189_v43 }
 0x3e5   : > { %v6709_v15 = vpop.eup %6708  ;;  %v2549_v46 = vadd.f32 1e-05, %v2533_v44  ;;  %2854 = vmatprep.mubr.f32.mxu0 %v9521_v8  ;;  %v2520_v44 = vmul.f32 %v8203_v22, %v8203_v22 }
 0x3e6   : > { %v2491_v48 = vpop.f32.mrb[186].mxu1  ;;  %v2585_v56 = vmul.f32 %v6709_v15, %v8216_v34 }
 0x3e7   : > { %6714 = vrsqrt.f32 %v2549_v46  ;;  %v2534_v63 = vsub.f32 %v2491_v48, %v2518_v13  ;;  %v2493_v26 = vpop.f32.mrb[187].mxu1 }
 0x3e8   : > { %5567 = vmatmul.mubr.msk.f32.gmra.mrb[178].mxu0 %vm2634_vm2, %v2585_v56  ;;  %v8343_v6 = vmul.f32 %v2585_v56, %v8191_v25 }
 0x3e9   : > { %v6711_v43 = vpop.eup %6710  ;;  %v2550_v36 = vadd.f32 1e-05, %v2534_v63  ;;  %2860 = vmatprep.mubr.f32.mxu0 %v9521_v8 }
 0x3ea   : > { %v2496_v40 = vpop.f32.mrb[188].mxu1  ;;  %v2586_v7 = vmul.f32 %v6711_v43, %v8216_v34 }
 0x3eb   : > { %6716 = vrsqrt.f32 %v2550_v36  ;;  %v2535_v31 = vsub.f32 %v2496_v40, %v2519_v55  ;;  %v2498_v30 = vpop.f32.mrb[189].mxu1 }
 0x3ec   : > { %5568 = vmatmul.mubr.msk.f32.gmra.mrb[180].mxu0 %vm2634_vm2, %v2586_v7  ;;  %v8351_v53 = vmul.f32 %v2586_v7, %v8193_v57 }
 0x3ed   : > { %v6713_v25 = vpop.eup %6712  ;;  %v2551_v11 = vadd.f32 1e-05, %v2535_v31  ;;  %2866 = vmatprep.mubr.f32.mxu0 %v9521_v8 }
 0x3ee   : > { %v2501_v15 = vpop.f32.mrb[190].mxu1  ;;  %v2587_v13 = vmul.f32 %v6713_v25, %v8216_v34 }
 0x3ef   : > { %6718 = vrsqrt.f32 %v2551_v11  ;;  %v2536_v46 = vsub.f32 %v2501_v15, %v2520_v44  ;;  %v2503_v48 = vpop.f32.mrb[191].mxu1  ;;  %v3178_v44 = vld [vmem:[%s9468_s7 + $0xc8] sm:$0xff] }
 0x3f0   : > { %5569 = vmatmul.mubr.msk.f32.gmra.mrb[182].mxu0 %vm2634_vm2, %v2587_v13  ;;  %v8359_v56 = vmul.f32 %v2587_v13, %v8195_v4  ;;  %v3162_v15 = vld [vmem:[%s9468_s7 + $0x48] sm:$0xff] }
 0x3f1   : > { %v6715_v57 = vpop.eup %6714  ;;  %v2552_v63 = vadd.f32 1e-05, %v2536_v46  ;;  %2872 = vmatprep.mubr.f32.mxu0 %v9521_v8 }
 0x3f2   : > { %v2588_v26 = vmul.f32 %v6715_v57, %v8216_v34  ;;  %v3180_v57 = vld [vmem:[%s9468_s7 + $0xd8] sm:$0xff] }
 0x3f3   : > { %6720 = vrsqrt.f32 %v2552_v63 }
 0x3f4   : > { %5570 = vmatmul.mubr.msk.f32.gmra.mrb[184].mxu0 %vm2634_vm2, %v2588_v26  ;;  %v8365_v43 = vmul.f32 %v2588_v26, %v8197_v59  ;;  %v3164_v26 = vld [vmem:[%s9468_s7 + $0x58] sm:$0xff] }
 0x3f5   : > { %v6717_v55 = vpop.eup %6716  ;;  %2878 = vmatprep.mubr.f32.mxu0 %v9521_v8 }
 0x3f6   : > { %v2589_v36 = vmul.f32 %v6717_v55, %v8216_v34 }
 0x3f8   : > { %5571 = vmatmul.mubr.msk.f32.gmra.mrb[186].mxu0 %vm2634_vm2, %v2589_v36  ;;  %v8371_v4 = vmul.f32 %v2589_v36, %v8199_v35  ;;  %v8384_v35 = vld [vmem:[%s9467_s6] ss:$0 sm:$0xff] }
 0x3f9   : > { %v6719_v40 = vpop.eup %6718  ;;  %2884 = vmatprep.mubr.f32.mxu0 %v9521_v8  ;;  %v2623_v46 = vsub.f32 %v8384_v35, %v8335_v41  ;;  %v2625_v48 = vsub.f32 %v8384_v35, %v8351_v53  ;;  %v3179_v41 = vld [vmem:[%s9468_s7 + $0xd0] sm:$0xff]  ;;  %v2627_v36 = vsub.f32 %v8384_v35, %v8365_v43  ;;  %v3181_v43 = vld [vmem:[%s9468_s7 + $0xe0] sm:$0xff] }
 0x3fa   : > { %v2590_v7 = vmul.f32 %v6719_v40, %v8216_v34  ;;  %v6502_v63 = vpack.c.bf16 %v3180_v57, %v3179_v41  ;;  %v3163_v53 = vld [vmem:[%s9468_s7 + $0x50] sm:$0xff]  ;;  %v3351_v41 = vld [vmem:[%s9469_s8 + $0x28] sm:$0xff] }
 0x3fb   : > { %v6504_v55 = vpack.c.bf16 %v3164_v26, %v3163_v53  ;;  %v3352_v53 = vld [vmem:[%s9469_s8 + $0x30] sm:$0xff]  ;;  %v3353_v26 = vld [vmem:[%s9469_s8 + $0x38] sm:$0xff] }
 0x3fc   : > { %5572 = vmatmul.mubr.msk.f32.gmra.mrb[188].mxu0 %vm2634_vm2, %v2590_v7  ;;  %v8377_v59 = vmul.f32 %v2590_v7, %v8201_v3  ;;  %v2615_v3 = vsub.f32 %v8384_v35, %v8253_v54  ;;  %v2618_v54 = vsub.f32 %v8384_v35, %v8295_v42  ;;  %v2621_v42 = vsub.f32 %v8384_v35, %v8319_v23  ;;  %v3161_v23 = vld [vmem:[%s9468_s7 + $0x40] sm:$0xff]  ;;  %v3182_v7 = vld [vmem:[%s9468_s7 + $0xe8] sm:$0xff] }
 0x3fd   : > { %v6721_v31 = vpop.eup %6720  ;;  %2890 = vmatprep.mubr.f32.mxu0 %v9521_v8  ;;  %v6500_v13 = vpack.c.bf16 %v3162_v15, %v3161_v23  ;;  %v3348_v23 = vld [vmem:[%s9469_s8 + $0x10] sm:$0xff] }
 0x3fe   : > { %v2591_v30 = vmul.f32 %v6721_v31, %v8216_v34  ;;  %v2616_v34 = vsub.f32 %v8384_v35, %v8273_v60  ;;  %v2619_v60 = vsub.f32 %v8384_v35, %v8303_v51  ;;  %v3177_v51 = vld [vmem:[%s9468_s7 + $0xc0] sm:$0xff]  ;;  %v2629_v40 = vsub.f32 %v8384_v35, %v8377_v59 }
 0x3ff   : > { %v6498_v11 = vpack.c.bf16 %v3178_v44, %v3177_v51  ;;  %v6506_v31 = vpack.c.bf16 %v3182_v7, %v3181_v43  ;;  %v3165_v59 = vld [vmem:[%s9468_s7 + $0x60] sm:$0xff]  ;;  %v3355_v43 = vld [vmem:[%s9469_s8 + $0x48] sm:$0xff] }
 0x400   : > { %5573 = vmatmul.mubr.msk.f32.gmra.mrb[190].mxu0 %vm2634_vm2, %v2591_v30  ;;  %v8388_v25 = vmul.f32 %v2591_v30, %v8203_v22  ;;  %v2617_v22 = vsub.f32 %v8384_v35, %v8287_v62  ;;  %v2620_v62 = vsub.f32 %v8384_v35, %v8311_v32  ;;  %v2622_v32 = vsub.f32 %v8384_v35, %v8327_v33 }
 0x401   : > { %2896 = vmatprep.mubr.f32.mxu0 %v9521_v8  ;;  %6499 = vmatprep.subr.bf16.mxu1 %v6498_v11  ;;  %v2624_v33 = vsub.f32 %v8384_v35, %v8343_v6  ;;  %v2626_v6 = vsub.f32 %v8384_v35, %v8359_v56  ;;  %v2628_v56 = vsub.f32 %v8384_v35, %v8371_v4  ;;  %v3347_v11 = vld [vmem:[%s9469_s8 + $0x8] sm:$0xff] }
 0x402   : > { %6501 = vmatpush3.bf16.msra.mxu1 %v6500_v13  ;;  %v2630_v4 = vsub.f32 %v8384_v35, %v8388_v25  ;;  %v3184_v35 = vld [vmem:[%s9468_s7 + $0xf8] sm:$0xff] }
 0x403   : > { %6503 = vmatprep.subr.bf16.mxu1 %v6502_v63 }
 0x404   : > { %5574 = vmatmul.mubr.msk.f32.gmra.mrb[192].mxu0 %vm2634_vm2, %v2615_v3  ;;  %v3183_v3 = vld [vmem:[%s9468_s7 + $0xf0] sm:$0xff] }
 0x405   : > { %2902 = vmatprep.mubr.f32.mxu0 %v9521_v8  ;;  %v6510_v25 = vpack.c.bf16 %v3184_v35, %v3183_v3 }
 0x406   : > { %6505 = vmatpush3.bf16.msra.mxu1 %v6504_v55 }
 0x407   : > { %6507 = vmatprep.subr.bf16.mxu1 %v6506_v31 }
 0x408   : > { %5575 = vmatmul.mubr.msk.f32.gmra.mrb[194].mxu0 %vm2634_vm2, %v2616_v34  ;;  %v3167_v34 = vld [vmem:[%s9468_s7 + $0x70] sm:$0xff] }
 0x409   : > { %2908 = vmatprep.mubr.f32.mxu0 %v9521_v8 }
 0x40c   : > { %5576 = vmatmul.mubr.msk.f32.gmra.mrb[196].mxu0 %vm2634_vm2, %v2617_v22  ;;  %v3168_v22 = vld [vmem:[%s9468_s7 + $0x78] sm:$0xff] }
 0x40d   : > { %2914 = vmatprep.mubr.f32.mxu0 %v9521_v8 }
 0x410   : > { %5577 = vmatmul.mubr.msk.f32.gmra.mrb[198].mxu0 %vm2634_vm2, %v2618_v54  ;;  %v6512_v54 = vpack.c.bf16 %v3168_v22, %v3167_v34 }
 0x411   : > { %2920 = vmatprep.mubr.f32.mxu0 %v9521_v8 }
 0x414   : > { %5578 = vmatmul.mubr.msk.f32.gmra.mrb[200].mxu0 %vm2634_vm2, %v2619_v60 }
 0x415   : > { %2926 = vmatprep.mubr.f32.mxu0 %v9521_v8 }
 0x418   : > { %5579 = vmatmul.mubr.msk.f32.gmra.mrb[202].mxu0 %vm2634_vm2, %v2620_v62 }
 0x419   : > { %2932 = vmatprep.mubr.f32.mxu0 %v9521_v8 }
 0x41c   : > { %5580 = vmatmul.mubr.msk.f32.gmra.mrb[204].mxu0 %vm2634_vm2, %v2621_v42 }
 0x41d   : > { %2938 = vmatprep.mubr.f32.mxu0 %v9521_v8 }
 0x420   : > { %5581 = vmatmul.mubr.msk.f32.gmra.mrb[206].mxu0 %vm2634_vm2, %v2622_v32  ;;  %v3346_v32 = vld [vmem:[%s9469_s8] sm:$0xff] }
 0x421   : > { %2944 = vmatprep.mubr.f32.mxu0 %v9521_v8  ;;  %v6514_v13 = vpack.c.bf16 %v3347_v11, %v3346_v32 }
 0x423   : > { %6515 = vmatprep.subr.bf16.mxu0 %v6514_v13 }
 0x424   : > { %5582 = vmatmul.mubr.msk.f32.gmra.mrb[208].mxu0 %vm2634_vm2, %v2623_v46 }
 0x425   : > { %2950 = vmatprep.mubr.f32.mxu0 %v9521_v8  ;;  %6517 = vmatpush3.bf16.msra.mxu0 %v6514_v13 }
 0x428   : > { %5583 = vmatmul.mubr.msk.f32.gmra.mrb[210].mxu0 %vm2634_vm2, %v2624_v33 }
 0x429   : > { %2956 = vmatprep.mubr.f32.mxu0 %v9521_v8 }
 0x42c   : > { %5584 = vmatmul.mubr.msk.f32.gmra.mrb[212].mxu0 %vm2634_vm2, %v2625_v48  ;;  %v3350_v48 = vld [vmem:[%s9469_s8 + $0x20] sm:$0xff] }
 0x42d   : > { %2962 = vmatprep.mubr.f32.mxu0 %v9521_v8  ;;  %v6522_v63 = vpack.c.bf16 %v3351_v41, %v3350_v48 }
 0x430   : > { %5585 = vmatmul.mubr.msk.f32.gmra.mrb[214].mxu0 %vm2634_vm2, %v2626_v6 }
 0x431   : > { %2968 = vmatprep.mubr.f32.mxu0 %v9521_v8 }
 0x434   : > { %5586 = vmatmul.mubr.msk.f32.gmra.mrb[216].mxu0 %vm2634_vm2, %v2627_v36 }
 0x435   : > { %2974 = vmatprep.mubr.f32.mxu0 %v9521_v8 }
 0x438   : > { %5587 = vmatmul.mubr.msk.f32.gmra.mrb[218].mxu0 %vm2634_vm2, %v2628_v56  ;;  %v6526_v56 = vpack.c.bf16 %v3353_v26, %v3352_v53  ;;  %v9522_v26 = vld [vmem:[#allocation11_spill] sm:$0xff] }
 0x439   : > { %2980 = vmatprep.mubr.f32.mxu0 %v9521_v8 }
 0x43c   : > { %5588 = vmatmul.mubr.msk.f32.gmra.mrb[220].mxu0 %vm2634_vm2, %v2629_v40 }
 0x43d   : > { %2986 = vmatprep.mubr.f32.mxu0 %v9521_v8  ;;  %v3166_v8 = vld [vmem:[%s9468_s7 + $0x68] sm:$0xff] }
 0x43e   : > { %v6508_v30 = vpack.c.bf16 %v3166_v8, %v3165_v59  ;;  %v3357_v8 = vld [vmem:[%s9469_s8 + $0x58] sm:$0xff] }
 0x440   : > { %5589 = vmatmul.mubr.msk.f32.gmra.mrb[222].mxu0 %vm2634_vm2, %v2630_v4  ;;  %6509 = vmatpush3.bf16.msra.mxu1 %v6508_v30 }
 0x441   : > { %6511 = vmatprep.subr.bf16.mxu1 %v6510_v25 }
 0x444   : > { %6513 = vmatpush3.bf16.msra.mxu1 %v6512_v54 }
 0x497   : > { %v2802_v60 = vpop.f32.mrb[160].mxu0 }
 0x498   : > { %v8503_v62 = vmul.f32 %v2802_v60, %v8010_v1  ;;  %v2804_v42 = vpop.f32.mrb[161].mxu0 }
 0x499   : > { %v8506_v51 = vmul.f32 %v2804_v42, %v8012_v37  ;;  %v3349_v37 = vld [vmem:[%s9469_s8 + $0x18] sm:$0xff] }
 0x49a   : > { %v6518_v33 = vpack.c.bf16 %v3349_v37, %v3348_v23 }
 0x49b   : > { %v2808_v44 = vpop.f32.mrb[162].mxu0 }
 0x49c   : > { %v8518_v1 = vmul.f32 %v2808_v44, %v8016_v49  ;;  %v2810_v15 = vpop.f32.mrb[163].mxu0  ;;  %6519 = vmatprep.subr.bf16.mxu0 %v6518_v33 }
 0x49d   : > { %v8524_v46 = vmul.f32 %v2810_v15, %v8018_v0  ;;  %6521 = vmatpush3.bf16.msra.mxu0 %v6518_v33 }
 0x49e   : > { %6523 = vmatprep.subr.bf16.mxu0 %v6522_v63 }
 0x49f   : > { %v2814_v49 = vpop.f32.mrb[164].mxu0 }
 0x4a0   : > { %v8533_v57 = vmul.f32 %v2814_v49, %v8022_v27  ;;  %v2816_v6 = vpop.f32.mrb[165].mxu0 }
 0x4a1   : > { %v8536_v0 = vmul.f32 %v2816_v6, %v8024_v24  ;;  %v3354_v24 = vld [vmem:[%s9469_s8 + $0x40] sm:$0xff]  ;;  %6525 = vmatpush3.bf16.msra.mxu0 %v6522_v63 }
 0x4a2   : > { %6527 = vmatprep.subr.bf16.mxu0 %v6526_v56  ;;  %v6530_v31 = vpack.c.bf16 %v3355_v43, %v3354_v24  ;;  %v9524_v24 = vld [vmem:[#allocation13_spill] sm:$0xff] }
 0x4a3   : > { %v2820_v55 = vpop.f32.mrb[166].mxu0 }
 0x4a4   : > { %v8545_v36 = vmul.f32 %v2820_v55, %v8028_v18  ;;  %v2822_v27 = vpop.f32.mrb[167].mxu0 }
 0x4a5   : > { %v8548_v40 = vmul.f32 %v2822_v27, %v8030_v17  ;;  %v3356_v17 = vld [vmem:[%s9469_s8 + $0x50] sm:$0xff]  ;;  %6529 = vmatpush3.bf16.msra.mxu0 %v6526_v56  ;;  %v9523_v27 = vld [vmem:[#allocation12_spill] sm:$0xff] }
 0x4a6   : > { %6531 = vmatprep.subr.bf16.mxu0 %v6530_v31  ;;  %v6534_v35 = vpack.c.bf16 %v3357_v8, %v3356_v17 }
 0x4a7   : > { %v2826_v7 = vpop.f32.mrb[168].mxu0 }
 0x4a8   : > { %v8557_v4 = vmul.f32 %v2826_v7, %v8034_v16  ;;  %v2828_v18 = vpop.f32.mrb[169].mxu0  ;;  %v9525_v7 = vld [vmem:[#allocation14_spill] sm:$0xff] }
 0x4a9   : > { %v8560_v59 = vmul.f32 %v2828_v18, %v8036_v47  ;;  %6533 = vmatpush3.bf16.msra.mxu0 %v6530_v31 }
 0x4aa   : > { %6535 = vmatprep.subr.bf16.mxu0 %v6534_v35 }
 0x4ab   : > { %v2832_v30 = vpop.f32.mrb[170].mxu0 }
 0x4ac   : > { %v8569_v3 = vmul.f32 %v2832_v30, %v8040_v14  ;;  %v2834_v16 = vpop.f32.mrb[171].mxu0 }
 0x4ad   : > { %v8572_v25 = vmul.f32 %v2834_v16, %v8042_v19  ;;  %6537 = vmatpush3.bf16.msra.mxu0 %v6534_v35 }
 0x4af   : > { %v2838_v47 = vpop.f32.mrb[172].mxu0 }
 0x4b0   : > { %v8575_v34 = vmul.f32 %v2838_v47, %v8046_v5  ;;  %v2840_v22 = vpop.f32.mrb[173].mxu0 }
 0x4b1   : > { %v8578_v54 = vmul.f32 %v2840_v22, %v8048_v9 }
 0x4b3   : > { %v2844_v60 = vpop.f32.mrb[174].mxu0 }
 0x4b4   : > { %v8581_v14 = vmul.f32 %v2844_v60, %v8052_v21  ;;  %v2846_v42 = vpop.f32.mrb[175].mxu0 }
 0x4b5   : > { %v8584_v44 = vmul.f32 %v2846_v42, %v8054_v45 }
 0x4b7   : > { %v2850_v19 = vpop.f32.mrb[176].mxu0 }
 0x4b8   : > { %v8587_v32 = vmul.f32 %v2850_v19, %v8058_v10  ;;  %v2852_v5 = vpop.f32.mrb[177].mxu0 }
 0x4b9   : > { %v8590_v11 = vmul.f32 %v2852_v5, %v8060_v52 }
 0x4bb   : > { %v2856_v23 = vpop.f32.mrb[178].mxu0 }
 0x4bc   : > { %v8593_v9 = vmul.f32 %v2856_v23, %v8064_v2  ;;  %v2858_v15 = vpop.f32.mrb[179].mxu0 }
 0x4bd   : > { %v8596_v21 = vmul.f32 %v2858_v15, %v8066_v20 }
 0x4bf   : > { %v2862_v13 = vpop.f32.mrb[180].mxu0 }
 0x4c0   : > { %v8599_v45 = vmul.f32 %v2862_v13, %v8070_v12  ;;  %v2864_v37 = vpop.f32.mrb[181].mxu0 }
 0x4c1   : > { %v8602_v10 = vmul.f32 %v2864_v37, %v8072_v29 }
 0x4c3   : > { %v2868_v33 = vpop.f32.mrb[182].mxu0 }
 0x4c4   : > { %v8605_v52 = vmul.f32 %v2868_v33, %v8076_v50  ;;  %v2870_v48 = vpop.f32.mrb[183].mxu0 }
 0x4c5   : > { %v8608_v2 = vmul.f32 %v2870_v48, %v8078_v58 }
 0x4c7   : > { %v2874_v41 = vpop.f32.mrb[184].mxu0 }
 0x4c8   : > { %v8611_v20 = vmul.f32 %v2874_v41, %v8082_v39  ;;  %v2876_v49 = vpop.f32.mrb[185].mxu0 }
 0x4c9   : > { %v8614_v12 = vmul.f32 %v2876_v49, %v8084_v61 }
 0x4cb   : > { %v2880_v6 = vpop.f32.mrb[186].mxu0 }
 0x4cc   : > { %v8617_v29 = vmul.f32 %v2880_v6, %v8088_v38  ;;  %v2882_v63 = vpop.f32.mrb[187].mxu0 }
 0x4cd   : > { %v8620_v50 = vmul.f32 %v2882_v63, %v8090_v28 }
 0x4cf   : > { %v2886_v53 = vpop.f32.mrb[188].mxu0 }
 0x4d0   : > { %v8623_v58 = vmul.f32 %v2886_v53, %v9522_v26  ;;  %v2888_v55 = vpop.f32.mrb[189].mxu0 }
 0x4d1   : > { %v8626_v39 = vmul.f32 %v2888_v55, %v9523_v27 }
 0x4d3   : > { %v2892_v56 = vpop.f32.mrb[190].mxu0 }
 0x4d4   : > { %v8629_v61 = vmul.f32 %v2892_v56, %v9524_v24  ;;  %v2894_v43 = vpop.f32.mrb[191].mxu0 }
 0x4d5   : > { %v8632_v38 = vmul.f32 %v2894_v43, %v9525_v7 }
 0x4d7   : > { %v2898_v18 = vpop.f32.mrb[192].mxu0 }
 0x4d8   : > { %v3025_v28 = vadd.f32 %v8503_v62, %v2898_v18  ;;  %v2900_v31 = vpop.f32.mrb[193].mxu0 }
 0x4d9   : > { %v3026_v17 = vadd.f32 %v8506_v51, %v2900_v31 }
 0x4da   : > { %v3089_v8 = vmul.f32 0.01, %v3025_v28  ;;  %vm3057_vm3 = vcmp.gt.f32.partialorder %v3025_v28, 0.0 }
 0x4db   : > { %v3090_v30 = vmul.f32 0.01, %v3026_v17  ;;  %v2904_v16 = vpop.f32.mrb[194].mxu0  ;;  %vm3058_vm4 = vcmp.gt.f32.partialorder %v3026_v17, 0.0 }
 0x4dc   : > { %v3027_v35 = vadd.f32 %v8518_v1, %v2904_v16  ;;  %v2906_v47 = vpop.f32.mrb[195].mxu0  ;;  %v3121_v42 = vsel %vm3057_vm3, %v3025_v28, %v3089_v8 }
 0x4dd   : > { %v3028_v22 = vadd.f32 %v8524_v46, %v2906_v47  ;;  %v3122_v60 = vsel %vm3058_vm4, %v3026_v17, %v3090_v30 }
 0x4de   : > { %v3091_v19 = vmul.f32 0.01, %v3027_v35  ;;  %3249 = vmatprep.mubr.f32.mxu1 %v3122_v60  ;;  %vm3059_vm6 = vcmp.gt.f32.partialorder %v3027_v35, 0.0 }
 0x4df   : > { %v3092_v5 = vmul.f32 0.01, %v3028_v22  ;;  %v2910_v23 = vpop.f32.mrb[196].mxu0  ;;  %3250 = vmatmul.mubr.f32.vlgmr.msra.gmra.mrb[192].mxu1 %v3121_v42  ;;  %vm3060_vm5 = vcmp.gt.f32.partialorder %v3028_v22, 0.0 }
 0x4e0   : > { %v3029_v62 = vadd.f32 %v8533_v57, %v2910_v23  ;;  %v2912_v51 = vpop.f32.mrb[197].mxu0  ;;  %v3123_v1 = vsel %vm3059_vm6, %v3027_v35, %v3091_v19 }
 0x4e1   : > { %v3030_v15 = vadd.f32 %v8536_v0, %v2912_v51  ;;  %v3124_v13 = vsel %vm3060_vm5, %v3028_v22, %v3092_v5 }
 0x4e2   : > { %v3093_v37 = vmul.f32 0.01, %v3029_v62  ;;  %3254 = vmatprep.mubr.f32.mxu1 %v3124_v13  ;;  %vm3061_vm8 = vcmp.gt.f32.partialorder %v3029_v62, 0.0 }
 0x4e3   : > { %v3094_v33 = vmul.f32 0.01, %v3030_v15  ;;  %v2916_v46 = vpop.f32.mrb[198].mxu0  ;;  %3255 = vmatmul.mubr.f32.gmra.mrb[194].mxu1 %v3123_v1  ;;  %vm3062_vm7 = vcmp.gt.f32.partialorder %v3030_v15, 0.0 }
 0x4e4   : > { %v3031_v48 = vadd.f32 %v8545_v36, %v2916_v46  ;;  %v2918_v41 = vpop.f32.mrb[199].mxu0  ;;  %v3125_v57 = vsel %vm3061_vm8, %v3029_v62, %v3093_v37 }
 0x4e5   : > { %v3032_v49 = vadd.f32 %v8548_v40, %v2918_v41  ;;  %v3126_v6 = vsel %vm3062_vm7, %v3030_v15, %v3094_v33 }
 0x4e6   : > { %v3095_v63 = vmul.f32 0.01, %v3031_v48  ;;  %3259 = vmatprep.mubr.f32.mxu1 %v3126_v6  ;;  %vm3063_vm10 = vcmp.gt.f32.partialorder %v3031_v48, 0.0 }
 0x4e7   : > { %v3096_v53 = vmul.f32 0.01, %v3032_v49  ;;  %v2922_v0 = vpop.f32.mrb[200].mxu0  ;;  %3260 = vmatmul.mubr.f32.gmra.mrb[196].mxu1 %v3125_v57  ;;  %vm3064_vm9 = vcmp.gt.f32.partialorder %v3032_v49, 0.0 }
 0x4e8   : > { %v3033_v26 = vadd.f32 %v8557_v4, %v2922_v0  ;;  %v2924_v55 = vpop.f32.mrb[201].mxu0  ;;  %v3127_v36 = vsel %vm3063_vm10, %v3031_v48, %v3095_v63 }
 0x4e9   : > { %v3034_v27 = vadd.f32 %v8560_v59, %v2924_v55  ;;  %v3128_v56 = vsel %vm3064_vm9, %v3032_v49, %v3096_v53 }
 0x4ea   : > { %v3097_v24 = vmul.f32 0.01, %v3033_v26  ;;  %3264 = vmatprep.mubr.f32.mxu1 %v3128_v56  ;;  %vm3065_vm12 = vcmp.gt.f32.partialorder %v3033_v26, 0.0 }
 0x4eb   : > { %v3098_v43 = vmul.f32 0.01, %v3034_v27  ;;  %v2928_v40 = vpop.f32.mrb[202].mxu0  ;;  %3265 = vmatmul.mubr.f32.gmra.mrb[198].mxu1 %v3127_v36  ;;  %vm3066_vm11 = vcmp.gt.f32.partialorder %v3034_v27, 0.0 }
 0x4ec   : > { %v3035_v7 = vadd.f32 %v8569_v3, %v2928_v40  ;;  %v2930_v18 = vpop.f32.mrb[203].mxu0  ;;  %v3129_v4 = vsel %vm3065_vm12, %v3033_v26, %v3097_v24 }
 0x4ed   : > { %v3036_v28 = vadd.f32 %v8572_v25, %v2930_v18  ;;  %v3130_v31 = vsel %vm3066_vm11, %v3034_v27, %v3098_v43 }
 0x4ee   : > { %v3099_v17 = vmul.f32 0.01, %v3035_v7  ;;  %3269 = vmatprep.mubr.f32.mxu1 %v3130_v31  ;;  %vm3067_vm14 = vcmp.gt.f32.partialorder %v3035_v7, 0.0 }
 0x4ef   : > { %v3100_v8 = vmul.f32 0.01, %v3036_v28  ;;  %v2934_v59 = vpop.f32.mrb[204].mxu0  ;;  %3270 = vmatmul.mubr.f32.gmra.mrb[200].mxu1 %v3129_v4  ;;  %vm3068_vm13 = vcmp.gt.f32.partialorder %v3036_v28, 0.0 }
 0x4f0   : > { %v3037_v30 = vadd.f32 %v8575_v34, %v2934_v59  ;;  %v2936_v16 = vpop.f32.mrb[205].mxu0  ;;  %v3131_v3 = vsel %vm3067_vm14, %v3035_v7, %v3099_v17 }
 0x4f1   : > { %v3038_v35 = vadd.f32 %v8578_v54, %v2936_v16  ;;  %v3132_v47 = vsel %vm3068_vm13, %v3036_v28, %v3100_v8 }
 0x4f2   : > { %v3101_v22 = vmul.f32 0.01, %v3037_v30  ;;  %3274 = vmatprep.mubr.f32.mxu1 %v3132_v47  ;;  %vm3069_vm1 = vcmp.gt.f32.partialorder %v3037_v30, 0.0 }
 0x4f3   : > { %v3102_v60 = vmul.f32 0.01, %v3038_v35  ;;  %v2940_v25 = vpop.f32.mrb[206].mxu0  ;;  %3275 = vmatmul.mubr.f32.gmra.mrb[202].mxu1 %v3131_v3  ;;  %vm3070_vm15 = vcmp.gt.f32.partialorder %v3038_v35, 0.0 }
 0x4f4   : > { %v3039_v42 = vadd.f32 %v8581_v14, %v2940_v25  ;;  %v2942_v19 = vpop.f32.mrb[207].mxu0  ;;  %v3133_v34 = vsel %vm3069_vm1, %v3037_v30, %v3101_v22 }
 0x4f5   : > { %v3040_v5 = vadd.f32 %v8584_v44, %v2942_v19  ;;  %v3134_v23 = vsel %vm3070_vm15, %v3038_v35, %v3102_v60 }
 0x4f6   : > { %v3103_v62 = vmul.f32 0.01, %v3039_v42  ;;  %3279 = vmatprep.mubr.f32.mxu1 %v3134_v23  ;;  %vm3071_vm3 = vcmp.gt.f32.partialorder %v3039_v42, 0.0 }
 0x4f7   : > { %v3104_v51 = vmul.f32 0.01, %v3040_v5  ;;  %v2946_v54 = vpop.f32.mrb[208].mxu0  ;;  %3280 = vmatmul.mubr.f32.gmra.mrb[204].mxu1 %v3133_v34  ;;  %vm3072_vm2 = vcmp.gt.f32.partialorder %v3040_v5, 0.0 }
 0x4f8   : > { %v3041_v15 = vadd.f32 %v8587_v32, %v2946_v54  ;;  %v2948_v13 = vpop.f32.mrb[209].mxu0  ;;  %v3135_v14 = vsel %vm3071_vm3, %v3039_v42, %v3103_v62 }
 0x4f9   : > { %v3042_v37 = vadd.f32 %v8590_v11, %v2948_v13  ;;  %v3136_v1 = vsel %vm3072_vm2, %v3040_v5, %v3104_v51 }
 0x4fa   : > { %v3105_v33 = vmul.f32 0.01, %v3041_v15  ;;  %3284 = vmatprep.mubr.f32.mxu1 %v3136_v1  ;;  %vm3073_vm5 = vcmp.gt.f32.partialorder %v3041_v15, 0.0  ;;  %v3358_v1 = vld [vmem:[%s9469_s8 + $0x60] sm:$0xff] }
 0x4fb   : > { %v3106_v46 = vmul.f32 0.01, %v3042_v37  ;;  %v2952_v44 = vpop.f32.mrb[210].mxu0  ;;  %3285 = vmatmul.mubr.f32.gmra.mrb[206].mxu1 %v3135_v14  ;;  %vm3074_vm4 = vcmp.gt.f32.partialorder %v3042_v37, 0.0  ;;  %v3361_v14 = vld [vmem:[%s9469_s8 + $0x78] sm:$0xff] }
 0x4fc   : > { %v3043_v48 = vadd.f32 %v8593_v9, %v2952_v44  ;;  %v2954_v41 = vpop.f32.mrb[211].mxu0  ;;  %v3137_v32 = vsel %vm3073_vm5, %v3041_v15, %v3105_v33  ;;  %v3360_v33 = vld [vmem:[%s9469_s8 + $0x70] sm:$0xff]  ;;  %vm3714_vm5 = vcmask 64512  }
 0x4fd   : > { %v3044_v49 = vadd.f32 %v8596_v21, %v2954_v41  ;;  %v3138_v6 = vsel %vm3074_vm4, %v3042_v37, %v3106_v46  ;;  %v6542_v46 = vpack.c.bf16 %v3361_v14, %v3360_v33 }
 0x4fe   : > { %v3107_v63 = vmul.f32 0.01, %v3043_v48  ;;  %3289 = vmatprep.mubr.f32.mxu1 %v3138_v6  ;;  %vm3075_vm7 = vcmp.gt.f32.partialorder %v3043_v48, 0.0 }
 0x4ff   : > { %v3108_v57 = vmul.f32 0.01, %v3044_v49  ;;  %v2958_v11 = vpop.f32.mrb[212].mxu0  ;;  %3290 = vmatmul.mubr.f32.gmra.mrb[208].mxu1 %v3137_v32  ;;  %vm3076_vm6 = vcmp.gt.f32.partialorder %v3044_v49, 0.0 }
 0x500   : > { %v3045_v53 = vadd.f32 %v8599_v45, %v2958_v11  ;;  %v2960_v0 = vpop.f32.mrb[213].mxu0  ;;  %v3139_v9 = vsel %vm3075_vm7, %v3043_v48, %v3107_v63 }
 0x501   : > { %v3046_v26 = vadd.f32 %v8602_v10, %v2960_v0  ;;  %v3140_v55 = vsel %vm3076_vm6, %v3044_v49, %v3108_v57 }
 0x502   : > { %v3109_v27 = vmul.f32 0.01, %v3045_v53  ;;  %3294 = vmatprep.mubr.f32.mxu1 %v3140_v55  ;;  %vm3077_vm9 = vcmp.gt.f32.partialorder %v3045_v53, 0.0 }
 0x503   : > { %v3110_v56 = vmul.f32 0.01, %v3046_v26  ;;  %v2964_v21 = vpop.f32.mrb[214].mxu0  ;;  %3295 = vmatmul.mubr.f32.gmra.mrb[210].mxu1 %v3139_v9  ;;  %vm3078_vm8 = vcmp.gt.f32.partialorder %v3046_v26, 0.0 }
 0x504   : > { %v3047_v24 = vadd.f32 %v8605_v52, %v2964_v21  ;;  %v2966_v36 = vpop.f32.mrb[215].mxu0  ;;  %v3141_v45 = vsel %vm3077_vm9, %v3045_v53, %v3109_v27 }
 0x505   : > { %v3048_v43 = vadd.f32 %v8608_v2, %v2966_v36  ;;  %v3142_v40 = vsel %vm3078_vm8, %v3046_v26, %v3110_v56 }
 0x506   : > { %v3111_v7 = vmul.f32 0.01, %v3047_v24  ;;  %3299 = vmatprep.mubr.f32.mxu1 %v3142_v40  ;;  %vm3079_vm11 = vcmp.gt.f32.partialorder %v3047_v24, 0.0 }
 0x507   : > { %v3112_v18 = vmul.f32 0.01, %v3048_v43  ;;  %v2970_v10 = vpop.f32.mrb[216].mxu0  ;;  %3300 = vmatmul.mubr.f32.gmra.mrb[212].mxu1 %v3141_v45  ;;  %vm3080_vm10 = vcmp.gt.f32.partialorder %v3048_v43, 0.0 }
 0x508   : > { %v3049_v28 = vadd.f32 %v8611_v20, %v2970_v10  ;;  %v2972_v31 = vpop.f32.mrb[217].mxu0  ;;  %v3143_v52 = vsel %vm3079_vm11, %v3047_v24, %v3111_v7 }
 0x509   : > { %v3050_v17 = vadd.f32 %v8614_v12, %v2972_v31  ;;  %v3144_v4 = vsel %vm3080_vm10, %v3048_v43, %v3112_v18 }
 0x50a   : > { %v3113_v8 = vmul.f32 0.01, %v3049_v28  ;;  %3304 = vmatprep.mubr.f32.mxu1 %v3144_v4  ;;  %vm3081_vm13 = vcmp.gt.f32.partialorder %v3049_v28, 0.0 }
 0x50b   : > { %v3114_v59 = vmul.f32 0.01, %v3050_v17  ;;  %v2976_v2 = vpop.f32.mrb[218].mxu0  ;;  %3305 = vmatmul.mubr.f32.gmra.mrb[214].mxu1 %v3143_v52  ;;  %vm3082_vm12 = vcmp.gt.f32.partialorder %v3050_v17, 0.0 }
 0x50c   : > { %v3051_v30 = vadd.f32 %v8617_v29, %v2976_v2  ;;  %v2978_v16 = vpop.f32.mrb[219].mxu0  ;;  %v3145_v20 = vsel %vm3081_vm13, %v3049_v28, %v3113_v8 }
 0x50d   : > { %v3052_v35 = vadd.f32 %v8620_v50, %v2978_v16  ;;  %v3146_v47 = vsel %vm3082_vm12, %v3050_v17, %v3114_v59 }
 0x50e   : > { %v3115_v22 = vmul.f32 0.01, %v3051_v30  ;;  %3309 = vmatprep.mubr.f32.mxu1 %v3146_v47  ;;  %vm3083_vm15 = vcmp.gt.f32.partialorder %v3051_v30, 0.0 }
 0x50f   : > { %v3116_v3 = vmul.f32 0.01, %v3052_v35  ;;  %v2982_v12 = vpop.f32.mrb[220].mxu0  ;;  %3310 = vmatmul.mubr.f32.gmra.mrb[216].mxu1 %v3145_v20  ;;  %vm3084_vm14 = vcmp.gt.f32.partialorder %v3052_v35, 0.0 }
 0x510   : > { %v3053_v60 = vadd.f32 %v8623_v58, %v2982_v12  ;;  %v2984_v25 = vpop.f32.mrb[221].mxu0  ;;  %v3147_v29 = vsel %vm3083_vm15, %v3051_v30, %v3115_v22 }
 0x511   : > { %v3054_v42 = vadd.f32 %v8626_v39, %v2984_v25  ;;  %v3148_v19 = vsel %vm3084_vm14, %v3052_v35, %v3116_v3 }
 0x512   : > { %v3117_v5 = vmul.f32 0.01, %v3053_v60  ;;  %3314 = vmatprep.mubr.f32.mxu1 %v3148_v19  ;;  %vm3085_vm2 = vcmp.gt.f32.partialorder %v3053_v60, 0.0 }
 0x513   : > { %v3118_v23 = vmul.f32 0.01, %v3054_v42  ;;  %v2988_v50 = vpop.f32.mrb[222].mxu0  ;;  %3315 = vmatmul.mubr.f32.gmra.mrb[218].mxu1 %v3147_v29  ;;  %vm3086_vm1 = vcmp.gt.f32.partialorder %v3054_v42, 0.0 }
 0x514   : > { %v3055_v62 = vadd.f32 %v8629_v61, %v2988_v50  ;;  %v2990_v34 = vpop.f32.mrb[223].mxu0  ;;  %v3149_v58 = vsel %vm3085_vm2, %v3053_v60, %v3117_v5  ;;  %v3359_v61 = vld [vmem:[%s9469_s8 + $0x68] sm:$0xff] }
 0x515   : > { %v3056_v51 = vadd.f32 %v8632_v38, %v2990_v34  ;;  %v3150_v54 = vsel %vm3086_vm1, %v3054_v42, %v3118_v23  ;;  %v6538_v38 = vpack.c.bf16 %v3359_v61, %v3358_v1 }
 0x516   : > { %v3119_v15 = vmul.f32 0.01, %v3055_v62  ;;  %3319 = vmatprep.mubr.f32.mxu1 %v3150_v54  ;;  %vm3087_vm4 = vcmp.gt.f32.partialorder %v3055_v62, 0.0 }
 0x517   : > { %v3120_v13 = vmul.f32 0.01, %v3056_v51  ;;  %3320 = vmatmul.mubr.f32.gmra.mrb[220].mxu1 %v3149_v58  ;;  %vm3088_vm3 = vcmp.gt.f32.partialorder %v3056_v51, 0.0  ;;  %6539 = vmatprep.subr.bf16.mxu0 %v6538_v38 }
 0x518   : > { %v3151_v37 = vsel %vm3087_vm4, %v3055_v62, %v3119_v15  ;;  %6541 = vmatpush3.bf16.msra.mxu0 %v6538_v38 }
 0x519   : > { %v3152_v39 = vsel %vm3088_vm3, %v3056_v51, %v3120_v13  ;;  %6543 = vmatprep.subr.bf16.mxu0 %v6542_v46 }
 0x51a   : > { %3324 = vmatprep.mubr.f32.mxu1 %v3152_v39 }
 0x51b   : > { %3325 = vmatmul.mubr.f32.gmra.mrb[222].mxu1 %v3151_v37 }
 0x51c   : > { %6545 = vmatpush3.bf16.msra.mxu0 %v6542_v46 }
 0x5b2   : > { %v5713_v44 = vpop.f32.mrb[192].mxu1 }
 0x5b3   : > { %v5714_v48 = vpop.f32.mrb[193].mxu1 }
 0x5b4   : > { %v8678_v41 = vadd.f32 %v5714_v48, %v5713_v44  ;;  %v3713_v44 = vld [vmem:[%s9470_s9] sm:$0xff] }
 0x5b5   : > { %6068 = vmatprep.subr.mxu1 %v3713_v44 }
 0x5b6   : > { %v5716_v49 = vpop.f32.mrb[194].mxu1  ;;  %6020 = vmatprep.mubr.f32.mxu0 %v8678_v41  ;;  %v3330_v50 = vmul.f32 %v8678_v41, %v8678_v41  ;;  %6069 = vmatpush3.msra.mxu1 %v3713_v44 }
 0x5b7   : > { %v5717_v6 = vpop.f32.mrb[195].mxu1 }
 0x5b8   : > { %v8681_v63 = vadd.f32 %v5717_v6, %v5716_v49 }
 0x5ba   : > { %v5719_v32 = vpop.f32.mrb[196].mxu1  ;;  %6021 = vmatmul.mubr.f32.vlgmr.msra.gmra.mrb[224].mxu0 %v8681_v63  ;;  %v3331_v62 = vmul.f32 %v8681_v63, %v8681_v63 }
 0x5bb   : > { %v5720_v57 = vpop.f32.mrb[197].mxu1 }
 0x5bc   : > { %v8684_v11 = vadd.f32 %v5720_v57, %v5719_v32  ;;  %v4116_v57 = vld [vmem:[%s9473_s12] sm:$0xff] }
 0x5be   : > { %v5722_v53 = vpop.f32.mrb[198].mxu1  ;;  %6023 = vmatprep.mubr.f32.mxu0 %v8684_v11  ;;  %v3332_v34 = vmul.f32 %v8684_v11, %v8684_v11 }
 0x5bf   : > { %v5723_v0 = vpop.f32.mrb[199].mxu1 }
 0x5c0   : > { %v8687_v26 = vadd.f32 %v5723_v0, %v5722_v53  ;;  %v4117_v53 = vld [vmem:[%s9473_s12 + $0x8] sm:$0xff]  ;;  %v4118_v0 = vld [vmem:[%s9473_s12 + $0x10] sm:$0xff] }
 0x5c2   : > { %v5725_v55 = vpop.f32.mrb[200].mxu1  ;;  %6024 = vmatmul.mubr.f32.gmra.mrb[226].mxu0 %v8687_v26  ;;  %v3333_v51 = vmul.f32 %v8687_v26, %v8687_v26 }
 0x5c3   : > { %v5726_v27 = vpop.f32.mrb[201].mxu1 }
 0x5c4   : > { %v8690_v9 = vadd.f32 %v5726_v27, %v5725_v55  ;;  %v6546_v55 = vpack.c.bf16 %v4117_v53, %v4116_v57  ;;  %v4119_v27 = vld [vmem:[%s9473_s12 + $0x18] sm:$0xff] }
 0x5c6   : > { %v5728_v56 = vpop.f32.mrb[202].mxu1  ;;  %6026 = vmatprep.mubr.f32.mxu0 %v8690_v9  ;;  %v3334_v54 = vmul.f32 %v8690_v9, %v8690_v9  ;;  %6547 = vmatprep.subr.bf16.mxu0 %v6546_v55 }
 0x5c7   : > { %v5729_v21 = vpop.f32.mrb[203].mxu1  ;;  %6549 = vmatpush3.bf16.msra.mxu0 %v6546_v55 }
 0x5c8   : > { %v8693_v24 = vadd.f32 %v5729_v21, %v5728_v56  ;;  %v6550_v56 = vpack.c.bf16 %v4119_v27, %v4118_v0  ;;  %v4120_v21 = vld [vmem:[%s9473_s12 + $0x20] sm:$0xff] }
 0x5ca   : > { %v5731_v36 = vpop.f32.mrb[204].mxu1  ;;  %6027 = vmatmul.mubr.f32.gmra.mrb[228].mxu0 %v8693_v24  ;;  %v3335_v15 = vmul.f32 %v8693_v24, %v8693_v24  ;;  %6551 = vmatprep.subr.bf16.mxu0 %v6550_v56 }
 0x5cb   : > { %v5732_v43 = vpop.f32.mrb[205].mxu1  ;;  %6553 = vmatpush3.bf16.msra.mxu0 %v6550_v56 }
 0x5cc   : > { %v8696_v40 = vadd.f32 %v5732_v43, %v5731_v36  ;;  %v4121_v36 = vld [vmem:[%s9473_s12 + $0x28] sm:$0xff] }
 0x5ce   : > { %v5734_v7 = vpop.f32.mrb[206].mxu1  ;;  %6029 = vmatprep.mubr.f32.mxu0 %v8696_v40  ;;  %v3336_v58 = vmul.f32 %v8696_v40, %v8696_v40 }
 0x5cf   : > { %v5735_v45 = vpop.f32.mrb[207].mxu1 }
 0x5d0   : > { %v8699_v18 = vadd.f32 %v5735_v45, %v5734_v7  ;;  %v6554_v45 = vpack.c.bf16 %v4121_v36, %v4120_v21  ;;  %v8836_v36 = vld [vmem:[%s9471_s10] ss:$0 sm:$0xff] }
 0x5d2   : > { %v5737_v10 = vpop.f32.mrb[208].mxu1  ;;  %6030 = vmatmul.mubr.f32.gmra.mrb[230].mxu0 %v8699_v18  ;;  %v3337_v13 = vmul.f32 %v8699_v18, %v8699_v18  ;;  %6555 = vmatprep.subr.bf16.mxu0 %v6554_v45 }
 0x5d3   : > { %v5738_v28 = vpop.f32.mrb[209].mxu1  ;;  %6557 = vmatpush3.bf16.msra.mxu0 %v6554_v45 }
 0x5d4   : > { %v8702_v31 = vadd.f32 %v5738_v28, %v5737_v10  ;;  %v4122_v10 = vld [vmem:[%s9473_s12 + $0x30] sm:$0xff]  ;;  %v4123_v28 = vld [vmem:[%s9473_s12 + $0x38] sm:$0xff] }
 0x5d6   : > { %v5740_v17 = vpop.f32.mrb[210].mxu1  ;;  %6032 = vmatprep.mubr.f32.mxu0 %v8702_v31  ;;  %v3338_v39 = vmul.f32 %v8702_v31, %v8702_v31 }
 0x5d7   : > { %v5741_v4 = vpop.f32.mrb[211].mxu1 }
 0x5d8   : > { %v8705_v8 = vadd.f32 %v5741_v4, %v5740_v17  ;;  %v6558_v17 = vpack.c.bf16 %v4123_v28, %v4122_v10 }
 0x5da   : > { %v5743_v52 = vpop.f32.mrb[212].mxu1  ;;  %6033 = vmatmul.mubr.f32.gmra.mrb[232].mxu0 %v8705_v8  ;;  %v3339_v37 = vmul.f32 %v8705_v8, %v8705_v8  ;;  %6559 = vmatprep.subr.bf16.mxu0 %v6558_v17 }
 0x5db   : > { %v5744_v59 = vpop.f32.mrb[213].mxu1  ;;  %6561 = vmatpush3.bf16.msra.mxu0 %v6558_v17 }
 0x5dc   : > { %v8708_v2 = vadd.f32 %v5744_v59, %v5743_v52 }
 0x5de   : > { %v5746_v30 = vpop.f32.mrb[214].mxu1  ;;  %6035 = vmatprep.mubr.f32.mxu0 %v8708_v2  ;;  %v3340_v1 = vmul.f32 %v8708_v2, %v8708_v2 }
 0x5df   : > { %v5747_v16 = vpop.f32.mrb[215].mxu1 }
 0x5e0   : > { %v8711_v35 = vadd.f32 %v5747_v16, %v5746_v30 }
 0x5e2   : > { %v5749_v47 = vpop.f32.mrb[216].mxu1  ;;  %6036 = vmatmul.mubr.f32.gmra.mrb[234].mxu0 %v8711_v35  ;;  %v3341_v61 = vmul.f32 %v8711_v35, %v8711_v35 }
 0x5e3   : > { %v5750_v22 = vpop.f32.mrb[217].mxu1 }
 0x5e4   : > { %v8714_v20 = vadd.f32 %v5750_v22, %v5749_v47 }
 0x5e6   : > { %v5752_v3 = vpop.f32.mrb[218].mxu1  ;;  %6038 = vmatprep.mubr.f32.mxu0 %v8714_v20  ;;  %v3342_v38 = vmul.f32 %v8714_v20, %v8714_v20 }
 0x5e7   : > { %v5753_v12 = vpop.f32.mrb[219].mxu1 }
 0x5e8   : > { %v8717_v60 = vadd.f32 %v5753_v12, %v5752_v3 }
 0x5ea   : > { %v5755_v25 = vpop.f32.mrb[220].mxu1  ;;  %6039 = vmatmul.mubr.f32.gmra.mrb[236].mxu0 %v8717_v60  ;;  %v3343_v33 = vmul.f32 %v8717_v60, %v8717_v60 }
 0x5eb   : > { %v5756_v42 = vpop.f32.mrb[221].mxu1 }
 0x5ec   : > { %v8720_v19 = vadd.f32 %v5756_v42, %v5755_v25 }
 0x5ee   : > { %v5758_v5 = vpop.f32.mrb[222].mxu1  ;;  %6041 = vmatprep.mubr.f32.mxu0 %v8720_v19  ;;  %v3344_v14 = vmul.f32 %v8720_v19, %v8720_v19 }
 0x5ef   : > { %v5759_v29 = vpop.f32.mrb[223].mxu1 }
 0x5f0   : > { %v8723_v23 = vadd.f32 %v5759_v29, %v5758_v5 }
 0x5f2   : > { %6042 = vmatmul.mubr.f32.gmra.mrb[238].mxu0 %v8723_v23  ;;  %v3345_v46 = vmul.f32 %v8723_v23, %v8723_v23 }
 0x5f3   : > { %6044 = vmatprep.mubr.f32.mxu0 %v3330_v50 }
 0x5f6   : > { %6045 = vmatmul.mubr.f32.gmra.mrb[240].mxu0 %v3331_v62 }
 0x5f7   : > { %6047 = vmatprep.mubr.f32.mxu0 %v3332_v34 }
 0x5fa   : > { %6048 = vmatmul.mubr.f32.gmra.mrb[242].mxu0 %v3333_v51 }
 0x5fb   : > { %6050 = vmatprep.mubr.f32.mxu0 %v3334_v54 }
 0x5fe   : > { %6051 = vmatmul.mubr.f32.gmra.mrb[244].mxu0 %v3335_v15 }
 0x5ff   : > { %6053 = vmatprep.mubr.f32.mxu0 %v3336_v58 }
 0x602   : > { %6054 = vmatmul.mubr.f32.gmra.mrb[246].mxu0 %v3337_v13 }
 0x603   : > { %6056 = vmatprep.mubr.f32.mxu0 %v3338_v39 }
 0x606   : > { %6057 = vmatmul.mubr.f32.gmra.mrb[248].mxu0 %v3339_v37 }
 0x607   : > { %6059 = vmatprep.mubr.f32.mxu0 %v3340_v1 }
 0x60a   : > { %6060 = vmatmul.mubr.f32.gmra.mrb[250].mxu0 %v3341_v61 }
 0x60b   : > { %6062 = vmatprep.mubr.f32.mxu0 %v3342_v38 }
 0x60e   : > { %6063 = vmatmul.mubr.f32.gmra.mrb[252].mxu0 %v3343_v33 }
 0x60f   : > { %6065 = vmatprep.mubr.f32.mxu0 %v3344_v14 }
 0x612   : > { %6066 = vmatmul.mubr.f32.gmra.mrb[254].mxu0 %v3345_v46 }
 0x68d   : > { %v8761_v48 = vpop.f32.mrb[224].mxu0 }
 0x68e   : > { %v8763_v49 = vpop.f32.mrb[225].mxu0  ;;  %v3588_v42 = vmul.f32 %v8761_v48, %v8761_v48 }
 0x68f   : > { %v3587_v5 = vmul.f32 %v8763_v49, %v8763_v49 }
 0x695   : > { %v8765_v6 = vpop.f32.mrb[226].mxu0 }
 0x696   : > { %v8767_v32 = vpop.f32.mrb[227].mxu0  ;;  %v3590_v51 = vmul.f32 %v8765_v6, %v8765_v6 }
 0x697   : > { %v3589_v15 = vmul.f32 %v8767_v32, %v8767_v32 }
 0x69d   : > { %v8787_v43 = vpop.f32.mrb[228].mxu0 }
 0x69e   : > { %v8789_v7 = vpop.f32.mrb[229].mxu0  ;;  %v3592_v61 = vmul.f32 %v8787_v43, %v8787_v43 }
 0x69f   : > { %v3591_v33 = vmul.f32 %v8789_v7, %v8789_v7 }
 0x6a5   : > { %v8797_v4 = vpop.f32.mrb[230].mxu0 }
 0x6a6   : > { %v8799_v52 = vpop.f32.mrb[231].mxu0  ;;  %v3594_v0 = vmul.f32 %v8797_v4, %v8797_v4 }
 0x6a7   : > { %v3593_v27 = vmul.f32 %v8799_v52, %v8799_v52 }
 0x6ad   : > { %v8801_v59 = vpop.f32.mrb[232].mxu0 }
 0x6ae   : > { %v8803_v30 = vpop.f32.mrb[233].mxu0 }
 0x6b5   : > { %v8805_v16 = vpop.f32.mrb[234].mxu0 }
 0x6b6   : > { %v8807_v47 = vpop.f32.mrb[235].mxu0 }
 0x6bd   : > { %v8809_v22 = vpop.f32.mrb[236].mxu0 }
 0x6be   : > { %v8811_v3 = vpop.f32.mrb[237].mxu0 }
 0x6c5   : > { %v8813_v12 = vpop.f32.mrb[238].mxu0 }
 0x6c6   : > { %v8815_v25 = vpop.f32.mrb[239].mxu0 }
 0x6c9   : > { %v6046_v29 = vpop.f32.mrb[240].mxu0 }
 0x6ca   : > { %v3604_v50 = vsub.f32 %v6046_v29, %v3588_v42  ;;  %v3508_v62 = vpop.f32.mrb[241].mxu0  ;;  %v3596_v42 = vmul.f32 %v8801_v59, %v8801_v59 }
 0x6cb   : > { %v3603_v34 = vsub.f32 %v3508_v62, %v3587_v5 }
 0x6cc   : > { %v3620_v54 = vadd.f32 1e-05, %v3604_v50  ;;  %v3595_v50 = vmul.f32 %v8803_v30, %v8803_v30 }
 0x6cd   : > { %v3619_v58 = vadd.f32 1e-05, %v3603_v34  ;;  %v6049_v13 = vpop.f32.mrb[242].mxu0 }
 0x6ce   : > { %6722 = vrsqrt.f32 %v3620_v54  ;;  %v3606_v39 = vsub.f32 %v6049_v13, %v3590_v51  ;;  %v3518_v37 = vpop.f32.mrb[243].mxu0 }
 0x6cf   : > { %6724 = vrsqrt.f32 %v3619_v58  ;;  %v3605_v1 = vsub.f32 %v3518_v37, %v3589_v15 }
 0x6d0   : > { %v3622_v38 = vadd.f32 1e-05, %v3606_v39 }
 0x6d1   : > { %v3621_v14 = vadd.f32 1e-05, %v3605_v1  ;;  %v6052_v46 = vpop.f32.mrb[244].mxu0  ;;  %v3598_v1 = vmul.f32 %v8805_v16, %v8805_v16 }
 0x6d2   : > { %6726 = vrsqrt.f32 %v3622_v38  ;;  %v3608_v44 = vsub.f32 %v6052_v46, %v3592_v61  ;;  %v3528_v57 = vpop.f32.mrb[245].mxu0 }
 0x6d3   : > { %6728 = vrsqrt.f32 %v3621_v14  ;;  %v3607_v53 = vsub.f32 %v3528_v57, %v3591_v33  ;;  %v3597_v14 = vmul.f32 %v8807_v47, %v8807_v47 }
 0x6d4   : > { %v3624_v55 = vadd.f32 1e-05, %v3608_v44 }
 0x6d5   : > { %v3623_v56 = vadd.f32 1e-05, %v3607_v53  ;;  %v6055_v21 = vpop.f32.mrb[246].mxu0 }
 0x6d6   : > { %6730 = vrsqrt.f32 %v3624_v55  ;;  %v3610_v45 = vsub.f32 %v6055_v21, %v3594_v0  ;;  %v3538_v10 = vpop.f32.mrb[247].mxu0 }
 0x6d7   : > { %6732 = vrsqrt.f32 %v3623_v56  ;;  %v3609_v28 = vsub.f32 %v3538_v10, %v3593_v27  ;;  %v3600_v56 = vmul.f32 %v8809_v22, %v8809_v22 }
 0x6d8   : > { %v6723_v17 = vpop.eup %6722  ;;  %v3626_v5 = vadd.f32 1e-05, %v3610_v45 }
 0x6d9   : > { %v6725_v29 = vpop.eup %6724  ;;  %v3659_v62 = vmul.f32 %v6723_v17, %v8836_v36  ;;  %v3625_v34 = vadd.f32 1e-05, %v3609_v28  ;;  %v6058_v51 = vpop.f32.mrb[248].mxu0  ;;  %v3599_v28 = vmul.f32 %v8811_v3, %v8811_v3 }
 0x6da   : > { %6734 = vrsqrt.f32 %v3626_v5  ;;  %v3612_v54 = vsub.f32 %v6058_v51, %v3596_v42  ;;  %v3548_v15 = vpop.f32.mrb[249].mxu0  ;;  %v3658_v58 = vmul.f32 %v6725_v29, %v8836_v36  ;;  %v3602_v51 = vmul.f32 %v8813_v12, %v8813_v12 }
 0x6db   : > { %6736 = vrsqrt.f32 %v3625_v34  ;;  %v3611_v13 = vsub.f32 %v3548_v15, %v3595_v50  ;;  %v8845_v39 = vmul.f32 %v8761_v48, %v3659_v62 }
 0x6dc   : > { %v6727_v37 = vpop.eup %6726  ;;  %v3628_v61 = vadd.f32 1e-05, %v3612_v54  ;;  %6070 = vmatprep.mubr.msk.f32.mxu1 %vm3714_vm5, %v3658_v58  ;;  %v8851_v38 = vmul.f32 %v3658_v58, %v8763_v49 }
 0x6dd   : > { %v6729_v33 = vpop.eup %6728  ;;  %v3627_v46 = vadd.f32 1e-05, %v3611_v13  ;;  %v6061_v44 = vpop.f32.mrb[250].mxu0  ;;  %6071 = vmatmul.mubr.msk.f32.vlgmr.msra.gmra.mrb[224].mxu1 %vm3714_vm5, %v3659_v62  ;;  %v3661_v48 = vmul.f32 %v6727_v37, %v8836_v36  ;;  %v3601_v13 = vmul.f32 %v8815_v25, %v8815_v25 }
 0x6de   : > { %6738 = vrsqrt.f32 %v3628_v61  ;;  %v3614_v57 = vsub.f32 %v6061_v44, %v3598_v1  ;;  %v3558_v53 = vpop.f32.mrb[251].mxu0  ;;  %v3660_v0 = vmul.f32 %v6729_v33, %v8836_v36 }
 0x6df   : > { %6740 = vrsqrt.f32 %v3627_v46  ;;  %v3613_v55 = vsub.f32 %v3558_v53, %v3597_v14  ;;  %v8859_v49 = vmul.f32 %v8765_v6, %v3661_v48 }
 0x6e0   : > { %v6731_v27 = vpop.eup %6730  ;;  %v3630_v21 = vadd.f32 1e-05, %v3614_v57  ;;  %6073 = vmatprep.mubr.msk.f32.mxu1 %vm3714_vm5, %v3660_v0  ;;  %v8865_v45 = vmul.f32 %v3660_v0, %v8767_v32 }
 0x6e1   : > { %v6733_v10 = vpop.eup %6732  ;;  %v3629_v17 = vadd.f32 1e-05, %v3613_v55  ;;  %v6064_v42 = vpop.f32.mrb[252].mxu0  ;;  %6074 = vmatmul.mubr.msk.f32.gmra.mrb[226].mxu1 %vm3714_vm5, %v3661_v48  ;;  %v3663_v6 = vmul.f32 %v6731_v27, %v8836_v36 }
 0x6e2   : > { %6742 = vrsqrt.f32 %v3630_v21  ;;  %v3616_v5 = vsub.f32 %v6064_v42, %v3600_v56  ;;  %v3568_v29 = vpop.f32.mrb[253].mxu0  ;;  %v3662_v50 = vmul.f32 %v6733_v10, %v8836_v36 }
 0x6e3   : > { %6744 = vrsqrt.f32 %v3629_v17  ;;  %v3615_v62 = vsub.f32 %v3568_v29, %v3599_v28  ;;  %v8873_v32 = vmul.f32 %v8787_v43, %v3663_v6 }
 0x6e4   : > { %v6735_v34 = vpop.eup %6734  ;;  %v3632_v54 = vadd.f32 1e-05, %v3616_v5  ;;  %6076 = vmatprep.mubr.msk.f32.mxu1 %vm3714_vm5, %v3662_v50  ;;  %v8879_v15 = vmul.f32 %v3662_v50, %v8789_v7 }
 0x6e5   : > { %v6737_v58 = vpop.eup %6736  ;;  %v3631_v37 = vadd.f32 1e-05, %v3615_v62  ;;  %v6067_v1 = vpop.f32.mrb[254].mxu0  ;;  %6077 = vmatmul.mubr.msk.f32.gmra.mrb[228].mxu1 %vm3714_vm5, %v3663_v6  ;;  %v3665_v43 = vmul.f32 %v6735_v34, %v8836_v36 }
 0x6e6   : > { %6746 = vrsqrt.f32 %v3632_v54  ;;  %v3618_v61 = vsub.f32 %v6067_v1, %v3602_v51  ;;  %v3578_v33 = vpop.f32.mrb[255].mxu0  ;;  %v3664_v14 = vmul.f32 %v6737_v58, %v8836_v36 }
 0x6e7   : > { %6748 = vrsqrt.f32 %v3631_v37  ;;  %v3617_v46 = vsub.f32 %v3578_v33, %v3601_v13  ;;  %v3682_v7 = vmul.f32 %v8797_v4, %v3665_v43  ;;  %v4124_v33 = vld [vmem:[%s9473_s12 + $0x40] sm:$0xff] }
 0x6e8   : > { %v6739_v44 = vpop.eup %6738  ;;  %v3634_v48 = vadd.f32 1e-05, %v3618_v61  ;;  %6079 = vmatprep.mubr.msk.f32.mxu1 %vm3714_vm5, %v3664_v14  ;;  %v3681_v57 = vmul.f32 %v3664_v14, %v8799_v52  ;;  %v4125_v14 = vld [vmem:[%s9473_s12 + $0x48] sm:$0xff] }
 0x6e9   : > { %v6741_v53 = vpop.eup %6740  ;;  %v3633_v0 = vadd.f32 1e-05, %v3617_v46  ;;  %6080 = vmatmul.mubr.msk.f32.gmra.mrb[230].mxu1 %vm3714_vm5, %v3665_v43  ;;  %v3667_v55 = vmul.f32 %v6739_v44, %v8836_v36  ;;  %v6562_v46 = vpack.c.bf16 %v4125_v14, %v4124_v33  ;;  %v4127_v44 = vld [vmem:[%s9473_s12 + $0x58] sm:$0xff] }
 0x6ea   : > { %6750 = vrsqrt.f32 %v3634_v48  ;;  %v3666_v27 = vmul.f32 %v6741_v53, %v8836_v36  ;;  %v4129_v53 = vld [vmem:[%s9473_s12 + $0x68] sm:$0xff] }
 0x6eb   : > { %6752 = vrsqrt.f32 %v3633_v0  ;;  %v3684_v56 = vmul.f32 %v8801_v59, %v3667_v55  ;;  %6563 = vmatprep.subr.bf16.mxu0 %v6562_v46 }
 0x6ec   : > { %v6743_v21 = vpop.eup %6742  ;;  %6082 = vmatprep.mubr.msk.f32.mxu1 %vm3714_vm5, %v3666_v27  ;;  %v3683_v4 = vmul.f32 %v3666_v27, %v8803_v30  ;;  %6565 = vmatpush3.bf16.msra.mxu0 %v6562_v46  ;;  %v4131_v27 = vld [vmem:[%s9473_s12 + $0x78] sm:$0xff] }
 0x6ed   : > { %v6745_v10 = vpop.eup %6744  ;;  %6083 = vmatmul.mubr.msk.f32.gmra.mrb[232].mxu1 %vm3714_vm5, %v3667_v55  ;;  %v3669_v52 = vmul.f32 %v6743_v21, %v8836_v36  ;;  %v4130_v55 = vld [vmem:[%s9473_s12 + $0x70] sm:$0xff]  ;;  %v4293_v21 = vld [vmem:[%s9474_s13] sm:$0xff] }
 0x6ee   : > { %v3668_v28 = vmul.f32 %v6745_v10, %v8836_v36  ;;  %v4295_v10 = vld [vmem:[%s9474_s13 + $0x10] sm:$0xff] }
 0x6ef   : > { %v3686_v17 = vmul.f32 %v8805_v16, %v3669_v52 }
 0x6f0   : > { %v6747_v42 = vpop.eup %6746  ;;  %6085 = vmatprep.mubr.msk.f32.mxu1 %vm3714_vm5, %v3668_v28  ;;  %v3685_v6 = vmul.f32 %v3668_v28, %v8807_v47  ;;  %v5591_v47 = vld [vmem:[%s9472_s11] ss:$0 sm:$0xff]  ;;  %v4296_v28 = vld [vmem:[%s9474_s13 + $0x18] sm:$0xff] }
 0x6f1   : > { %v6749_v59 = vpop.eup %6748  ;;  %6086 = vmatmul.mubr.msk.f32.gmra.mrb[234].mxu1 %vm3714_vm5, %v3669_v52  ;;  %v3671_v5 = vmul.f32 %v6747_v42, %v8836_v36  ;;  %v3699_v13 = vsub.f32 %v5591_v47, %v8865_v45  ;;  %v3705_v45 = vsub.f32 %v5591_v47, %v3683_v4  ;;  %v4294_v4 = vld [vmem:[%s9474_s13 + $0x8] sm:$0xff]  ;;  %v4297_v42 = vld [vmem:[%s9474_s13 + $0x20] sm:$0xff] }
 0x6f2   : > { %v3670_v30 = vmul.f32 %v6749_v59, %v8836_v36  ;;  %v3707_v37 = vsub.f32 %v5591_v47, %v3685_v6  ;;  %v6578_v52 = vpack.c.bf16 %v4294_v4, %v4293_v21  ;;  %v4298_v6 = vld [vmem:[%s9474_s13 + $0x28] sm:$0xff] }
 0x6f3   : > { %v3688_v29 = vmul.f32 %v8809_v22, %v3671_v5  ;;  %v3697_v22 = vsub.f32 %v5591_v47, %v8851_v38  ;;  %v3703_v38 = vsub.f32 %v5591_v47, %v3681_v57  ;;  %v4128_v57 = vld [vmem:[%s9473_s12 + $0x60] sm:$0xff]  ;;  %v6586_v59 = vpack.c.bf16 %v4298_v6, %v4297_v42 }
 0x6f4   : > { %v6751_v50 = vpop.eup %6750  ;;  %6088 = vmatprep.mubr.msk.f32.mxu1 %vm3714_vm5, %v3670_v30  ;;  %v3687_v62 = vmul.f32 %v3670_v30, %v8811_v3  ;;  %v3698_v3 = vsub.f32 %v5591_v47, %v8845_v39  ;;  %v3704_v39 = vsub.f32 %v5591_v47, %v3682_v7  ;;  %v4126_v7 = vld [vmem:[%s9473_s12 + $0x50] sm:$0xff]  ;;  %v6570_v0 = vpack.c.bf16 %v4129_v53, %v4128_v57  ;;  %v4300_v30 = vld [vmem:[%s9474_s13 + $0x38] sm:$0xff] }
 0x6f5   : > { %v6753_v16 = vpop.eup %6752  ;;  %6089 = vmatmul.mubr.msk.f32.gmra.mrb[236].mxu1 %vm3714_vm5, %v3671_v5  ;;  %v3673_v34 = vmul.f32 %v6751_v50, %v8836_v36  ;;  %v6566_v48 = vpack.c.bf16 %v4127_v44, %v4126_v7  ;;  %6579 = vmatprep.subr.bf16.mxu1 %v6578_v52  ;;  %v4299_v5 = vld [vmem:[%s9474_s13 + $0x30] sm:$0xff]  ;;  %v4301_v50 = vld [vmem:[%s9474_s13 + $0x40] sm:$0xff] }
 0x6f6   : > { %v3672_v51 = vmul.f32 %v6753_v16, %v8836_v36  ;;  %v3701_v36 = vsub.f32 %v5591_v47, %v8879_v15  ;;  %v3708_v15 = vsub.f32 %v5591_v47, %v3686_v17  ;;  %v3709_v1 = vsub.f32 %v5591_v47, %v3687_v62  ;;  %6581 = vmatpush3.bf16.msra.mxu1 %v6578_v52  ;;  %v4302_v62 = vld [vmem:[%s9474_s13 + $0x48] sm:$0xff] }
 0x6f7   : > { %v3690_v54 = vmul.f32 %v8813_v12, %v3673_v34  ;;  %v3700_v12 = vsub.f32 %v5591_v47, %v8859_v49  ;;  %v3706_v49 = vsub.f32 %v5591_v47, %v3684_v56  ;;  %6567 = vmatprep.subr.bf16.mxu0 %v6566_v48  ;;  %v6574_v56 = vpack.c.bf16 %v4131_v27, %v4130_v55 }
 0x6f8   : > { %6091 = vmatprep.mubr.msk.f32.mxu1 %vm3714_vm5, %v3672_v51  ;;  %v3689_v58 = vmul.f32 %v3672_v51, %v8815_v25  ;;  %v3702_v25 = vsub.f32 %v5591_v47, %v8873_v32  ;;  %v3710_v32 = vsub.f32 %v5591_v47, %v3688_v29  ;;  %6569 = vmatpush3.bf16.msra.mxu0 %v6566_v48 }
 0x6f9   : > { %6092 = vmatmul.mubr.msk.f32.gmra.mrb[238].mxu1 %vm3714_vm5, %v3673_v34  ;;  %v3712_v61 = vsub.f32 %v5591_v47, %v3690_v54  ;;  %6571 = vmatprep.subr.bf16.mxu0 %v6570_v0  ;;  %v6582_v17 = vpack.c.bf16 %v4296_v28, %v4295_v10  ;;  %v6590_v29 = vpack.c.bf16 %v4300_v30, %v4299_v5  ;;  %v4303_v34 = vld [vmem:[%s9474_s13 + $0x50] sm:$0xff]  ;;  %v4305_v54 = vld [vmem:[%s9474_s13 + $0x60] sm:$0xff] }
 0x6fa   : > { %6094 = vmatprep.mubr.msk.f32.mxu1 %vm3714_vm5, %v3697_v22  ;;  %v3711_v43 = vsub.f32 %v5591_v47, %v3689_v58  ;;  %v6594_v16 = vpack.c.bf16 %v4302_v62, %v4301_v50  ;;  %v4304_v47 = vld [vmem:[%s9474_s13 + $0x58] sm:$0xff]  ;;  %v4306_v22 = vld [vmem:[%s9474_s13 + $0x68] sm:$0xff] }
 0x6fb   : > { %6583 = vmatprep.subr.bf16.mxu1 %v6582_v17  ;;  %v6598_v51 = vpack.c.bf16 %v4304_v47, %v4303_v34  ;;  %v6602_v58 = vpack.c.bf16 %v4306_v22, %v4305_v54 }
 0x6fc   : > { %6573 = vmatpush3.bf16.msra.mxu0 %v6570_v0  ;;  %6585 = vmatpush3.bf16.msra.mxu1 %v6582_v17 }
 0x6fd   : > { %6095 = vmatmul.mubr.msk.f32.gmra.mrb[240].mxu1 %vm3714_vm5, %v3698_v3  ;;  %6575 = vmatprep.subr.bf16.mxu0 %v6574_v56  ;;  %v4307_v3 = vld [vmem:[%s9474_s13 + $0x70] sm:$0xff] }
 0x6fe   : > { %6097 = vmatprep.mubr.msk.f32.mxu1 %vm3714_vm5, %v3699_v13  ;;  %6587 = vmatprep.subr.bf16.mxu1 %v6586_v59  ;;  %v4308_v13 = vld [vmem:[%s9474_s13 + $0x78] sm:$0xff] }
 0x700   : > { %6577 = vmatpush3.bf16.msra.mxu0 %v6574_v56  ;;  %6589 = vmatpush3.bf16.msra.mxu1 %v6586_v59 }
 0x701   : > { %6098 = vmatmul.mubr.msk.f32.gmra.mrb[242].mxu1 %vm3714_vm5, %v3700_v12  ;;  %6591 = vmatprep.subr.bf16.mxu1 %v6590_v29  ;;  %v6606_v12 = vpack.c.bf16 %v4308_v13, %v4307_v3 }
 0x702   : > { %6100 = vmatprep.mubr.msk.f32.mxu1 %vm3714_vm5, %v3701_v36 }
 0x704   : > { %6593 = vmatpush3.bf16.msra.mxu1 %v6590_v29 }
 0x705   : > { %6101 = vmatmul.mubr.msk.f32.gmra.mrb[244].mxu1 %vm3714_vm5, %v3702_v25  ;;  %6595 = vmatprep.subr.bf16.mxu1 %v6594_v16 }
 0x706   : > { %6103 = vmatprep.mubr.msk.f32.mxu1 %vm3714_vm5, %v3703_v38 }
 0x708   : > { %6597 = vmatpush3.bf16.msra.mxu1 %v6594_v16 }
 0x709   : > { %6104 = vmatmul.mubr.msk.f32.gmra.mrb[246].mxu1 %vm3714_vm5, %v3704_v39  ;;  %6599 = vmatprep.subr.bf16.mxu1 %v6598_v51 }
 0x70a   : > { %6106 = vmatprep.mubr.msk.f32.mxu1 %vm3714_vm5, %v3705_v45 }
 0x70c   : > { %6601 = vmatpush3.bf16.msra.mxu1 %v6598_v51 }
 0x70d   : > { %6107 = vmatmul.mubr.msk.f32.gmra.mrb[248].mxu1 %vm3714_vm5, %v3706_v49  ;;  %6603 = vmatprep.subr.bf16.mxu1 %v6602_v58 }
 0x70e   : > { %6109 = vmatprep.mubr.msk.f32.mxu1 %vm3714_vm5, %v3707_v37 }
 0x710   : > { %6605 = vmatpush3.bf16.msra.mxu1 %v6602_v58 }
 0x711   : > { %6110 = vmatmul.mubr.msk.f32.gmra.mrb[250].mxu1 %vm3714_vm5, %v3708_v15  ;;  %6607 = vmatprep.subr.bf16.mxu1 %v6606_v12 }
 0x712   : > { %6112 = vmatprep.mubr.msk.f32.mxu1 %vm3714_vm5, %v3709_v1 }
 0x714   : > { %6609 = vmatpush3.bf16.msra.mxu1 %v6606_v12 }
 0x715   : > { %6113 = vmatmul.mubr.msk.f32.gmra.mrb[252].mxu1 %vm3714_vm5, %v3710_v32 }
 0x716   : > { %6115 = vmatprep.mubr.msk.f32.mxu1 %vm3714_vm5, %v3711_v43 }
 0x719   : > { %6116 = vmatmul.mubr.msk.f32.gmra.mrb[254].mxu1 %vm3714_vm5, %v3712_v61 }
 0x7b0   : > { %v6072_v36 = vpop.f32.mrb[224].mxu1 }
 0x7b1   : > { %v3877_v25 = vpop.f32.mrb[225].mxu1  ;;  %v4037_v44 = vmul.f32 %v6072_v36, %v8681_v63 }
 0x7b2   : > { %v4036_v48 = vmul.f32 %v8678_v41, %v3877_v25 }
 0x7b4   : > { %v6075_v38 = vpop.f32.mrb[226].mxu1 }
 0x7b5   : > { %v3887_v39 = vpop.f32.mrb[227].mxu1  ;;  %v4039_v27 = vmul.f32 %v6075_v38, %v8687_v26 }
 0x7b6   : > { %v4038_v21 = vmul.f32 %v8684_v11, %v3887_v39 }
 0x7b8   : > { %v6078_v45 = vpop.f32.mrb[228].mxu1 }
 0x7b9   : > { %v3897_v49 = vpop.f32.mrb[229].mxu1  ;;  %v4041_v63 = vmul.f32 %v6078_v45, %v8693_v24 }
 0x7ba   : > { %v4040_v59 = vmul.f32 %v8690_v9, %v3897_v49 }
 0x7bc   : > { %v6081_v37 = vpop.f32.mrb[230].mxu1 }
 0x7bd   : > { %v3907_v15 = vpop.f32.mrb[231].mxu1  ;;  %v4043_v62 = vmul.f32 %v6081_v37, %v8699_v18 }
 0x7be   : > { %v4042_v24 = vmul.f32 %v8696_v40, %v3907_v15 }
 0x7c0   : > { %v6084_v1 = vpop.f32.mrb[232].mxu1 }
 0x7c1   : > { %v3917_v32 = vpop.f32.mrb[233].mxu1  ;;  %v4045_v3 = vmul.f32 %v6084_v1, %v8705_v8 }
 0x7c2   : > { %v4044_v18 = vmul.f32 %v8702_v31, %v3917_v32 }
 0x7c4   : > { %v9011_v43 = vpop.f32.mrb[234].mxu1 }
 0x7c5   : > { %v9013_v61 = vpop.f32.mrb[235].mxu1  ;;  %v4047_v49 = vmul.f32 %v9011_v43, %v8711_v35 }
 0x7c6   : > { %v4046_v8 = vmul.f32 %v8708_v2, %v9013_v61 }
 0x7c8   : > { %v9015_v33 = vpop.f32.mrb[236].mxu1 }
 0x7c9   : > { %v9017_v14 = vpop.f32.mrb[237].mxu1 }
 0x7ca   : > { %v4048_v43 = vmul.f32 %v8714_v20, %v9017_v14 }
 0x7cc   : > { %v9019_v46 = vpop.f32.mrb[238].mxu1 }
 0x7cd   : > { %v9021_v7 = vpop.f32.mrb[239].mxu1 }
 0x7d0   : > { %v6096_v57 = vpop.f32.mrb[240].mxu1 }
 0x7d1   : > { %v4053_v53 = vadd.f32 %v6096_v57, %v4037_v44  ;;  %v3957_v0 = vpop.f32.mrb[241].mxu1 }
 0x7d2   : > { %v4052_v55 = vadd.f32 %v4036_v48, %v3957_v0 }
 0x7d3   : > { %v4085_v56 = vmul.f32 0.01, %v4053_v53  ;;  %vm4069_vm6 = vcmp.gt.f32.partialorder %v4053_v53, 0.0 }
 0x7d4   : > { %v4084_v4 = vmul.f32 0.01, %v4052_v55  ;;  %v6099_v10 = vpop.f32.mrb[242].mxu1  ;;  %vm4068_vm7 = vcmp.gt.f32.partialorder %v4052_v55, 0.0 }
 0x7d5   : > { %v4055_v52 = vadd.f32 %v6099_v10, %v4039_v27  ;;  %v3967_v28 = vpop.f32.mrb[243].mxu1  ;;  %v4101_v41 = vsel %vm4069_vm6, %v4053_v53, %v4085_v56  ;;  %v4049_v53 = vmul.f32 %v9015_v33, %v8717_v60  ;;  %v4050_v33 = vmul.f32 %v8720_v19, %v9021_v7 }
 0x7d6   : > { %v4054_v17 = vadd.f32 %v4038_v21, %v3967_v28  ;;  %v4100_v42 = vsel %vm4068_vm7, %v4052_v55, %v4084_v4  ;;  %v4051_v4 = vmul.f32 %v9019_v46, %v8723_v23 }
 0x7d7   : > { %v4087_v6 = vmul.f32 0.01, %v4055_v52  ;;  %6150 = vmatprep.mubr.f32.mxu0 %v4100_v42  ;;  %vm4071_vm8 = vcmp.gt.f32.partialorder %v4055_v52, 0.0 }
 0x7d8   : > { %v4086_v26 = vmul.f32 0.01, %v4054_v17  ;;  %v6102_v5 = vpop.f32.mrb[244].mxu1  ;;  %6151 = vmatmul.mubr.f32.vlgmr.msra.gmra.mrb[0].mxu0 %v4101_v41  ;;  %vm4070_vm9 = vcmp.gt.f32.partialorder %v4054_v17, 0.0 }
 0x7d9   : > { %v4057_v11 = vadd.f32 %v6102_v5, %v4041_v63  ;;  %v3977_v30 = vpop.f32.mrb[245].mxu1  ;;  %v4103_v16 = vsel %vm4071_vm8, %v4055_v52, %v4087_v6 }
 0x7da   : > { %v4056_v29 = vadd.f32 %v4040_v59, %v3977_v30  ;;  %v4102_v50 = vsel %vm4070_vm9, %v4054_v17, %v4086_v26 }
 0x7db   : > { %v4089_v34 = vmul.f32 0.01, %v4057_v11  ;;  %6153 = vmatprep.mubr.f32.mxu0 %v4102_v50  ;;  %vm4073_vm10 = vcmp.gt.f32.partialorder %v4057_v11, 0.0 }
 0x7dc   : > { %v4088_v47 = vmul.f32 0.01, %v4056_v29  ;;  %v6105_v51 = vpop.f32.mrb[246].mxu1  ;;  %6154 = vmatmul.mubr.f32.gmra.mrb[2].mxu0 %v4103_v16  ;;  %vm4072_vm11 = vcmp.gt.f32.partialorder %v4056_v29, 0.0 }
 0x7dd   : > { %v4059_v9 = vadd.f32 %v6105_v51, %v4043_v62  ;;  %v3987_v54 = vpop.f32.mrb[247].mxu1  ;;  %v4105_v13 = vsel %vm4073_vm10, %v4057_v11, %v4089_v34 }
 0x7de   : > { %v4058_v22 = vadd.f32 %v4042_v24, %v3987_v54  ;;  %v4104_v58 = vsel %vm4072_vm11, %v4056_v29, %v4088_v47 }
 0x7df   : > { %v4091_v12 = vmul.f32 0.01, %v4059_v9  ;;  %6156 = vmatprep.mubr.f32.mxu0 %v4104_v58  ;;  %vm4075_vm12 = vcmp.gt.f32.partialorder %v4059_v9, 0.0 }
 0x7e0   : > { %v4090_v36 = vmul.f32 0.01, %v4058_v22  ;;  %v6108_v25 = vpop.f32.mrb[248].mxu1  ;;  %6157 = vmatmul.mubr.f32.gmra.mrb[4].mxu0 %v4105_v13  ;;  %vm4074_vm13 = vcmp.gt.f32.partialorder %v4058_v22, 0.0 }
 0x7e1   : > { %v4061_v40 = vadd.f32 %v6108_v25, %v4045_v3  ;;  %v3997_v38 = vpop.f32.mrb[249].mxu1  ;;  %v4107_v37 = vsel %vm4075_vm12, %v4059_v9, %v4091_v12 }
 0x7e2   : > { %v4060_v39 = vadd.f32 %v4044_v18, %v3997_v38  ;;  %v4106_v45 = vsel %vm4074_vm13, %v4058_v22, %v4090_v36 }
 0x7e3   : > { %v4093_v15 = vmul.f32 0.01, %v4061_v40  ;;  %6159 = vmatprep.mubr.f32.mxu0 %v4106_v45  ;;  %vm4077_vm14 = vcmp.gt.f32.partialorder %v4061_v40, 0.0 }
 0x7e4   : > { %v4092_v31 = vmul.f32 0.01, %v4060_v39  ;;  %v6111_v1 = vpop.f32.mrb[250].mxu1  ;;  %6160 = vmatmul.mubr.f32.gmra.mrb[6].mxu0 %v4107_v37  ;;  %vm4076_vm15 = vcmp.gt.f32.partialorder %v4060_v39, 0.0 }
 0x7e5   : > { %v4063_v32 = vadd.f32 %v6111_v1, %v4047_v49  ;;  %v4007_v44 = vpop.f32.mrb[251].mxu1  ;;  %v4109_v0 = vsel %vm4077_vm14, %v4061_v40, %v4093_v15 }
 0x7e6   : > { %v4062_v48 = vadd.f32 %v4046_v8, %v4007_v44  ;;  %v4108_v57 = vsel %vm4076_vm15, %v4060_v39, %v4092_v31  ;;  %v4660_v8 = vld [vmem:[%s9475_s14] sm:$0xff]  ;;  %v4661_v31 = vld [vmem:[%s9475_s14 + $0x8] sm:$0xff] }
 0x7e7   : > { %v4095_v35 = vmul.f32 0.01, %v4063_v32  ;;  %6162 = vmatprep.mubr.f32.mxu0 %v4108_v57  ;;  %vm4079_vm1 = vcmp.gt.f32.partialorder %v4063_v32, 0.0  ;;  %v6610_v1 = vpack.c.bf16 %v4661_v31, %v4660_v8  ;;  %v5064_v44 = vld [vmem:[%s9478_s17 + $0x8] sm:$0xff] }
 0x7e8   : > { %v4094_v2 = vmul.f32 0.01, %v4062_v48  ;;  %v6114_v61 = vpop.f32.mrb[252].mxu1  ;;  %6163 = vmatmul.mubr.f32.gmra.mrb[8].mxu0 %v4109_v0  ;;  %vm4078_vm2 = vcmp.gt.f32.partialorder %v4062_v48, 0.0 }
 0x7e9   : > { %v4065_v55 = vadd.f32 %v6114_v61, %v4049_v53  ;;  %v4017_v27 = vpop.f32.mrb[253].mxu1  ;;  %v4111_v10 = vsel %vm4079_vm1, %v4063_v32, %v4095_v35  ;;  %6611 = vmatprep.subr.bf16.mxu0 %v6610_v1  ;;  %v5063_v32 = vld [vmem:[%s9478_s17] sm:$0xff]  ;;  %v5066_v53 = vld [vmem:[%s9478_s17 + $0x18] sm:$0xff]  ;;  %v5069_v61 = vld [vmem:[%s9478_s17 + $0x30] sm:$0xff] }
 0x7ea   : > { %v4064_v56 = vadd.f32 %v4048_v43, %v4017_v27  ;;  %v4110_v21 = vsel %vm4078_vm2, %v4062_v48, %v4094_v2  ;;  %6613 = vmatpush3.bf16.msra.mxu0 %v6610_v1  ;;  %v5065_v48 = vld [vmem:[%s9478_s17 + $0x10] sm:$0xff]  ;;  %v6614_v57 = vpack.c.bf16 %v5064_v44, %v5063_v32  ;;  %v5067_v35 = vld [vmem:[%s9478_s17 + $0x20] sm:$0xff]  ;;  %v5068_v43 = vld [vmem:[%s9478_s17 + $0x28] sm:$0xff] }
 0x7eb   : > { %v4097_v60 = vmul.f32 0.01, %v4065_v55  ;;  %6165 = vmatprep.mubr.f32.mxu0 %v4110_v21  ;;  %vm4081_vm3 = vcmp.gt.f32.partialorder %v4065_v55, 0.0  ;;  %v6618_v0 = vpack.c.bf16 %v5066_v53, %v5065_v48  ;;  %v6622_v2 = vpack.c.bf16 %v5068_v43, %v5067_v35  ;;  %v9206_v43 = vld [vmem:[%s9476_s15] ss:$0 sm:$0xff] }
 0x7ec   : > { %v4096_v20 = vmul.f32 0.01, %v4064_v56  ;;  %v6117_v14 = vpop.f32.mrb[254].mxu1  ;;  %6166 = vmatmul.mubr.f32.gmra.mrb[10].mxu0 %v4111_v10  ;;  %vm4080_vm4 = vcmp.gt.f32.partialorder %v4064_v56, 0.0  ;;  %6615 = vmatprep.subr.bf16.mxu1 %v6614_v57 }
 0x7ed   : > { %v4067_v52 = vadd.f32 %v6117_v14, %v4051_v4  ;;  %v4027_v28 = vpop.f32.mrb[255].mxu1  ;;  %v4113_v63 = vsel %vm4081_vm3, %v4065_v55, %v4097_v60  ;;  %v5070_v55 = vld [vmem:[%s9478_s17 + $0x38] sm:$0xff] }
 0x7ee   : > { %v4066_v17 = vadd.f32 %v4050_v33, %v4027_v28  ;;  %v4112_v42 = vsel %vm4080_vm4, %v4064_v56, %v4096_v20  ;;  %v6626_v27 = vpack.c.bf16 %v5070_v55, %v5069_v61 }
 0x7ef   : > { %v4099_v41 = vmul.f32 0.01, %v4067_v52  ;;  %6168 = vmatprep.mubr.f32.mxu0 %v4112_v42  ;;  %vm4083_vm5 = vcmp.gt.f32.partialorder %v4067_v52, 0.0 }
 0x7f0   : > { %v4098_v23 = vmul.f32 0.01, %v4066_v17  ;;  %6169 = vmatmul.mubr.f32.gmra.mrb[12].mxu0 %v4113_v63  ;;  %vm4082_vm6 = vcmp.gt.f32.partialorder %v4066_v17, 0.0 }
 0x7f1   : > { %v4115_v6 = vsel %vm4083_vm5, %v4067_v52, %v4099_v41 }
 0x7f2   : > { %v4114_v46 = vsel %vm4082_vm6, %v4066_v17, %v4098_v23 }
 0x7f3   : > { %6171 = vmatprep.mubr.f32.mxu0 %v4114_v46 }
 0x7f4   : > { %6172 = vmatmul.mubr.f32.gmra.mrb[14].mxu0 %v4115_v6 }
 0x8ab   : > { %v9045_v19 = vpop.f32.mrb[0].mxu0 }
 0x8ac   : > { %v9047_v7 = vpop.f32.mrb[1].mxu0  ;;  %v4278_v22 = vmul.f32 %v9045_v19, %v9045_v19 }
 0x8ad   : > { %6206 = vmatprep.mubr.f32.mxu1 %v9047_v7  ;;  %v4277_v54 = vmul.f32 %v9047_v7, %v9047_v7 }
 0x8ae   : > { %6207 = vmatmul.mubr.f32.vlgmr.msra.gmra.mrb[0].mxu1 %v9045_v19 }
 0x8af   : > { %v9051_v59 = vpop.f32.mrb[2].mxu0  ;;  %6617 = vmatpush3.bf16.msra.mxu1 %v6614_v57 }
 0x8b0   : > { %v9053_v26 = vpop.f32.mrb[3].mxu0  ;;  %v4280_v3 = vmul.f32 %v9051_v59, %v9051_v59  ;;  %6619 = vmatprep.subr.bf16.mxu1 %v6618_v0 }
 0x8b1   : > { %6209 = vmatprep.mubr.f32.mxu1 %v9053_v26  ;;  %v4279_v58 = vmul.f32 %v9053_v26, %v9053_v26 }
 0x8b2   : > { %6210 = vmatmul.mubr.f32.gmra.mrb[2].mxu1 %v9051_v59 }
 0x8b3   : > { %v9057_v5 = vpop.f32.mrb[4].mxu0  ;;  %6621 = vmatpush3.bf16.msra.mxu1 %v6618_v0 }
 0x8b4   : > { %v9059_v11 = vpop.f32.mrb[5].mxu0  ;;  %v4282_v12 = vmul.f32 %v9057_v5, %v9057_v5  ;;  %6623 = vmatprep.subr.bf16.mxu1 %v6622_v2 }
 0x8b5   : > { %6212 = vmatprep.mubr.f32.mxu1 %v9059_v11  ;;  %v4281_v13 = vmul.f32 %v9059_v11, %v9059_v11 }
 0x8b6   : > { %6213 = vmatmul.mubr.f32.gmra.mrb[4].mxu1 %v9057_v5 }
 0x8b7   : > { %v9063_v30 = vpop.f32.mrb[6].mxu0  ;;  %6625 = vmatpush3.bf16.msra.mxu1 %v6622_v2 }
 0x8b8   : > { %v9065_v29 = vpop.f32.mrb[7].mxu0  ;;  %v4284_v36 = vmul.f32 %v9063_v30, %v9063_v30  ;;  %6627 = vmatprep.subr.bf16.mxu1 %v6626_v27 }
 0x8b9   : > { %6215 = vmatprep.mubr.f32.mxu1 %v9065_v29  ;;  %v4283_v18 = vmul.f32 %v9065_v29, %v9065_v29 }
 0x8ba   : > { %6216 = vmatmul.mubr.f32.gmra.mrb[6].mxu1 %v9063_v30 }
 0x8bb   : > { %v9069_v50 = vpop.f32.mrb[8].mxu0  ;;  %6629 = vmatpush3.bf16.msra.mxu1 %v6626_v27 }
 0x8bc   : > { %v9071_v62 = vpop.f32.mrb[9].mxu0  ;;  %v4286_v40 = vmul.f32 %v9069_v50, %v9069_v50 }
 0x8bd   : > { %6218 = vmatprep.mubr.f32.mxu1 %v9071_v62  ;;  %v4285_v25 = vmul.f32 %v9071_v62, %v9071_v62 }
 0x8be   : > { %6219 = vmatmul.mubr.f32.gmra.mrb[8].mxu1 %v9069_v50 }
 0x8bf   : > { %v9075_v16 = vpop.f32.mrb[10].mxu0 }
 0x8c0   : > { %v9077_v34 = vpop.f32.mrb[11].mxu0  ;;  %v4288_v39 = vmul.f32 %v9075_v16, %v9075_v16 }
 0x8c1   : > { %6221 = vmatprep.mubr.f32.mxu1 %v9077_v34  ;;  %v4287_v38 = vmul.f32 %v9077_v34, %v9077_v34 }
 0x8c2   : > { %6222 = vmatmul.mubr.f32.gmra.mrb[10].mxu1 %v9075_v16 }
 0x8c3   : > { %v9081_v24 = vpop.f32.mrb[12].mxu0 }
 0x8c4   : > { %v9083_v47 = vpop.f32.mrb[13].mxu0  ;;  %v4290_v49 = vmul.f32 %v9081_v24, %v9081_v24 }
 0x8c5   : > { %6224 = vmatprep.mubr.f32.mxu1 %v9083_v47  ;;  %v4289_v45 = vmul.f32 %v9083_v47, %v9083_v47 }
 0x8c6   : > { %6225 = vmatmul.mubr.f32.gmra.mrb[12].mxu1 %v9081_v24 }
 0x8c7   : > { %v9087_v51 = vpop.f32.mrb[14].mxu0 }
 0x8c8   : > { %v9089_v9 = vpop.f32.mrb[15].mxu0  ;;  %v4292_v15 = vmul.f32 %v9087_v51, %v9087_v51 }
 0x8c9   : > { %6227 = vmatprep.mubr.f32.mxu1 %v9089_v9  ;;  %v4291_v37 = vmul.f32 %v9089_v9, %v9089_v9 }
 0x8ca   : > { %6228 = vmatmul.mubr.f32.gmra.mrb[14].mxu1 %v9087_v51 }
 0x8cb   : > { %6230 = vmatprep.mubr.f32.mxu1 %v4277_v54 }
 0x8ce   : > { %6231 = vmatmul.mubr.f32.gmra.mrb[16].mxu1 %v4278_v22 }
 0x8cf   : > { %6233 = vmatprep.mubr.f32.mxu1 %v4279_v58 }
 0x8d2   : > { %6234 = vmatmul.mubr.f32.gmra.mrb[18].mxu1 %v4280_v3 }
 0x8d3   : > { %6236 = vmatprep.mubr.f32.mxu1 %v4281_v13 }
 0x8d6   : > { %6237 = vmatmul.mubr.f32.gmra.mrb[20].mxu1 %v4282_v12 }
 0x8d7   : > { %6239 = vmatprep.mubr.f32.mxu1 %v4283_v18 }
 0x8da   : > { %6240 = vmatmul.mubr.f32.gmra.mrb[22].mxu1 %v4284_v36 }
 0x8db   : > { %6242 = vmatprep.mubr.f32.mxu1 %v4285_v25 }
 0x8de   : > { %6243 = vmatmul.mubr.f32.gmra.mrb[24].mxu1 %v4286_v40 }
 0x8df   : > { %6245 = vmatprep.mubr.f32.mxu1 %v4287_v38 }
 0x8e2   : > { %6246 = vmatmul.mubr.f32.gmra.mrb[26].mxu1 %v4288_v39 }
 0x8e3   : > { %6248 = vmatprep.mubr.f32.mxu1 %v4289_v45 }
 0x8e6   : > { %6249 = vmatmul.mubr.f32.gmra.mrb[28].mxu1 %v4290_v49 }
 0x8e7   : > { %6251 = vmatprep.mubr.f32.mxu1 %v4291_v37 }
 0x8ea   : > { %6252 = vmatmul.mubr.f32.gmra.mrb[30].mxu1 %v4292_v15 }
 0x981   : > { %v9155_v56 = vpop.f32.mrb[0].mxu1 }
 0x982   : > { %v9157_v21 = vpop.f32.mrb[1].mxu1  ;;  %v4535_v6 = vmul.f32 %v9155_v56, %v9155_v56 }
 0x983   : > { %v4534_v54 = vmul.f32 %v9157_v21, %v9157_v21 }
 0x985   : > { %v9159_v4 = vpop.f32.mrb[2].mxu1 }
 0x986   : > { %v9161_v10 = vpop.f32.mrb[3].mxu1  ;;  %v4537_v12 = vmul.f32 %v9159_v4, %v9159_v4 }
 0x987   : > { %v4536_v36 = vmul.f32 %v9161_v10, %v9161_v10 }
 0x989   : > { %v9163_v60 = vpop.f32.mrb[4].mxu1 }
 0x98a   : > { %v9165_v33 = vpop.f32.mrb[5].mxu1  ;;  %v4539_v49 = vmul.f32 %v9163_v60, %v9163_v60 }
 0x98b   : > { %v4538_v15 = vmul.f32 %v9165_v33, %v9165_v33 }
 0x98d   : > { %v9167_v20 = vpop.f32.mrb[6].mxu1 }
 0x98e   : > { %v9169_v14 = vpop.f32.mrb[7].mxu1  ;;  %v4541_v48 = vmul.f32 %v9167_v20, %v9167_v20 }
 0x98f   : > { %v4540_v53 = vmul.f32 %v9169_v14, %v9169_v14 }
 0x991   : > { %v9171_v52 = vpop.f32.mrb[8].mxu1 }
 0x992   : > { %v9173_v28 = vpop.f32.mrb[9].mxu1 }
 0x995   : > { %v9175_v17 = vpop.f32.mrb[10].mxu1 }
 0x996   : > { %v9177_v42 = vpop.f32.mrb[11].mxu1 }
 0x999   : > { %v9179_v63 = vpop.f32.mrb[12].mxu1 }
 0x99a   : > { %v9181_v41 = vpop.f32.mrb[13].mxu1 }
 0x99d   : > { %v9183_v23 = vpop.f32.mrb[14].mxu1 }
 0x99e   : > { %v9185_v46 = vpop.f32.mrb[15].mxu1 }
 0x9a1   : > { %v6232_v22 = vpop.f32.mrb[16].mxu1 }
 0x9a2   : > { %v4551_v58 = vsub.f32 %v6232_v22, %v4535_v6  ;;  %v4455_v3 = vpop.f32.mrb[17].mxu1  ;;  %v4543_v6 = vmul.f32 %v9171_v52, %v9171_v52 }
 0x9a3   : > { %v4550_v13 = vsub.f32 %v4455_v3, %v4534_v54 }
 0x9a4   : > { %v4567_v18 = vadd.f32 1e-05, %v4551_v58  ;;  %v4542_v58 = vmul.f32 %v9173_v28, %v9173_v28 }
 0x9a5   : > { %v4566_v25 = vadd.f32 1e-05, %v4550_v13  ;;  %v6235_v40 = vpop.f32.mrb[18].mxu1 }
 0x9a6   : > { %6754 = vrsqrt.f32 %v4567_v18  ;;  %v4553_v38 = vsub.f32 %v6235_v40, %v4537_v12  ;;  %v4465_v39 = vpop.f32.mrb[19].mxu1 }
 0x9a7   : > { %6756 = vrsqrt.f32 %v4566_v25  ;;  %v4552_v45 = vsub.f32 %v4465_v39, %v4536_v36 }
 0x9a8   : > { %v4569_v37 = vadd.f32 1e-05, %v4553_v38 }
 0x9a9   : > { %v4568_v8 = vadd.f32 1e-05, %v4552_v45  ;;  %v6238_v31 = vpop.f32.mrb[20].mxu1  ;;  %v4545_v45 = vmul.f32 %v9175_v17, %v9175_v17 }
 0x9aa   : > { %6758 = vrsqrt.f32 %v4569_v37  ;;  %v4555_v1 = vsub.f32 %v6238_v31, %v4539_v49  ;;  %v4475_v32 = vpop.f32.mrb[21].mxu1 }
 0x9ab   : > { %6760 = vrsqrt.f32 %v4568_v8  ;;  %v4554_v44 = vsub.f32 %v4475_v32, %v4538_v15  ;;  %v4544_v8 = vmul.f32 %v9177_v42, %v9177_v42 }
 0x9ac   : > { %v4571_v57 = vadd.f32 1e-05, %v4555_v1 }
 0x9ad   : > { %v4570_v0 = vadd.f32 1e-05, %v4554_v44  ;;  %v6241_v35 = vpop.f32.mrb[22].mxu1 }
 0x9ae   : > { %6762 = vrsqrt.f32 %v4571_v57  ;;  %v4557_v2 = vsub.f32 %v6241_v35, %v4541_v48  ;;  %v4485_v61 = vpop.f32.mrb[23].mxu1 }
 0x9af   : > { %6764 = vrsqrt.f32 %v4570_v0  ;;  %v4556_v55 = vsub.f32 %v4485_v61, %v4540_v53  ;;  %v4547_v0 = vmul.f32 %v9179_v63, %v9179_v63 }
 0x9b0   : > { %v6755_v27 = vpop.eup %6754  ;;  %v4573_v54 = vadd.f32 1e-05, %v4557_v2 }
 0x9b1   : > { %v6757_v22 = vpop.eup %6756  ;;  %v4606_v3 = vmul.f32 %v6755_v27, %v9206_v43  ;;  %v4572_v13 = vadd.f32 1e-05, %v4556_v55  ;;  %v6244_v12 = vpop.f32.mrb[24].mxu1  ;;  %v4546_v55 = vmul.f32 %v9181_v41, %v9181_v41 }
 0x9b2   : > { %6766 = vrsqrt.f32 %v4573_v54  ;;  %v4559_v18 = vsub.f32 %v6244_v12, %v4543_v6  ;;  %v4495_v36 = vpop.f32.mrb[25].mxu1  ;;  %v4605_v25 = vmul.f32 %v6757_v22, %v9206_v43  ;;  %v4549_v12 = vmul.f32 %v9183_v23, %v9183_v23 }
 0x9b3   : > { %v9215_v40 = vmul.f32 %v9155_v56, %v4606_v3  ;;  %6768 = vrsqrt.f32 %v4572_v13  ;;  %v4558_v38 = vsub.f32 %v4495_v36, %v4542_v58 }
 0x9b4   : > { %v6759_v39 = vpop.eup %6758  ;;  %v4575_v49 = vadd.f32 1e-05, %v4559_v18  ;;  %6258 = vmatprep.mubr.msk.f32.mxu0 %vm676_vm0, %v4605_v25  ;;  %v9221_v37 = vmul.f32 %v4605_v25, %v9157_v21 }
 0x9b5   : > { %v6761_v15 = vpop.eup %6760  ;;  %v4608_v31 = vmul.f32 %v6759_v39, %v9206_v43  ;;  %v4574_v56 = vadd.f32 1e-05, %v4558_v38  ;;  %v6247_v1 = vpop.f32.mrb[26].mxu1  ;;  %6259 = vmatmul.mubr.msk.f32.vlgmr.msra.gmra.mrb[16].mxu0 %vm676_vm0, %v4606_v3  ;;  %v4548_v38 = vmul.f32 %v9185_v46, %v9185_v46 }
 0x9b6   : > { %6770 = vrsqrt.f32 %v4575_v49  ;;  %v4561_v32 = vsub.f32 %v6247_v1, %v4545_v45  ;;  %v4505_v44 = vpop.f32.mrb[27].mxu1  ;;  %v4607_v48 = vmul.f32 %v6761_v15, %v9206_v43 }
 0x9b7   : > { %v9229_v57 = vmul.f32 %v9159_v4, %v4608_v31  ;;  %6772 = vrsqrt.f32 %v4574_v56  ;;  %v4560_v21 = vsub.f32 %v4505_v44, %v4544_v8 }
 0x9b8   : > { %v6763_v53 = vpop.eup %6762  ;;  %v4577_v35 = vadd.f32 1e-05, %v4561_v32  ;;  %6261 = vmatprep.mubr.msk.f32.mxu0 %vm676_vm0, %v4607_v48  ;;  %v9235_v2 = vmul.f32 %v4607_v48, %v9161_v10 }
 0x9b9   : > { %v6765_v61 = vpop.eup %6764  ;;  %v4610_v27 = vmul.f32 %v6763_v53, %v9206_v43  ;;  %v4576_v4 = vadd.f32 1e-05, %v4560_v21  ;;  %v6250_v6 = vpop.f32.mrb[28].mxu1  ;;  %6262 = vmatmul.mubr.msk.f32.gmra.mrb[18].mxu0 %vm676_vm0, %v4608_v31 }
 0x9ba   : > { %6774 = vrsqrt.f32 %v4577_v35  ;;  %v4563_v54 = vsub.f32 %v6250_v6, %v4547_v0  ;;  %v4515_v22 = vpop.f32.mrb[29].mxu1  ;;  %v4609_v58 = vmul.f32 %v6765_v61, %v9206_v43 }
 0x9bb   : > { %v9243_v3 = vmul.f32 %v9163_v60, %v4610_v27  ;;  %6776 = vrsqrt.f32 %v4576_v4  ;;  %v4562_v10 = vsub.f32 %v4515_v22, %v4546_v55 }
 0x9bc   : > { %v6767_v13 = vpop.eup %6766  ;;  %v4579_v18 = vadd.f32 1e-05, %v4563_v54  ;;  %6264 = vmatprep.mubr.msk.f32.mxu0 %vm676_vm0, %v4609_v58  ;;  %v9249_v36 = vmul.f32 %v4609_v58, %v9165_v33 }
 0x9bd   : > { %v6769_v25 = vpop.eup %6768  ;;  %v4612_v39 = vmul.f32 %v6767_v13, %v9206_v43  ;;  %v4578_v60 = vadd.f32 1e-05, %v4562_v10  ;;  %v6253_v45 = vpop.f32.mrb[30].mxu1  ;;  %6265 = vmatmul.mubr.msk.f32.gmra.mrb[20].mxu0 %vm676_vm0, %v4610_v27  ;;  %v5625_v13 = vld [vmem:[%s9477_s16] ss:$0 sm:$0xff] }
 0x9be   : > { %6778 = vrsqrt.f32 %v4579_v18  ;;  %v4565_v49 = vsub.f32 %v6253_v45, %v4549_v12  ;;  %v4525_v15 = vpop.f32.mrb[31].mxu1  ;;  %v4611_v8 = vmul.f32 %v6769_v25, %v9206_v43 }
 0x9bf   : > { %v4629_v31 = vmul.f32 %v9167_v20, %v4612_v39  ;;  %6780 = vrsqrt.f32 %v4578_v60  ;;  %v4564_v33 = vsub.f32 %v4525_v15, %v4548_v38  ;;  %v4646_v38 = vsub.f32 %v5625_v13, %v9235_v2  ;;  %v5071_v15 = vld [vmem:[%s9478_s17 + $0x40] sm:$0xff] }
 0x9c0   : > { %v6771_v56 = vpop.eup %6770  ;;  %v4581_v1 = vadd.f32 1e-05, %v4565_v49  ;;  %6267 = vmatprep.mubr.msk.f32.mxu0 %vm676_vm0, %v4611_v8  ;;  %v4628_v32 = vmul.f32 %v4611_v8, %v9169_v14  ;;  %v5072_v8 = vld [vmem:[%s9478_s17 + $0x48] sm:$0xff] }
 0x9c1   : > { %v6773_v44 = vpop.eup %6772  ;;  %v4614_v48 = vmul.f32 %v6771_v56, %v9206_v43  ;;  %v4580_v21 = vadd.f32 1e-05, %v4564_v33  ;;  %6268 = vmatmul.mubr.msk.f32.gmra.mrb[22].mxu0 %vm676_vm0, %v4612_v39  ;;  %v5073_v33 = vld [vmem:[%s9478_s17 + $0x50] sm:$0xff]  ;;  %v5074_v56 = vld [vmem:[%s9478_s17 + $0x58] sm:$0xff] }
 0x9c2   : > { %6782 = vrsqrt.f32 %v4581_v1  ;;  %v4613_v53 = vmul.f32 %v6773_v44, %v9206_v43  ;;  %v6634_v1 = vpack.c.bf16 %v5074_v56, %v5073_v33  ;;  %v5076_v44 = vld [vmem:[%s9478_s17 + $0x68] sm:$0xff] }
 0x9c3   : > { %v4631_v0 = vmul.f32 %v9171_v52, %v4614_v48  ;;  %6784 = vrsqrt.f32 %v4580_v21  ;;  %v5077_v21 = vld [vmem:[%s9478_s17 + $0x70] sm:$0xff] }
 0x9c4   : > { %v6775_v20 = vpop.eup %6774  ;;  %6270 = vmatprep.mubr.msk.f32.mxu0 %vm676_vm0, %v4613_v53  ;;  %v4630_v35 = vmul.f32 %v4613_v53, %v9173_v28  ;;  %v5078_v53 = vld [vmem:[%s9478_s17 + $0x78] sm:$0xff] }
 0x9c5   : > { %v6777_v61 = vpop.eup %6776  ;;  %v4616_v14 = vmul.f32 %v6775_v20, %v9206_v43  ;;  %6271 = vmatmul.mubr.msk.f32.gmra.mrb[24].mxu0 %vm676_vm0, %v4614_v48 }
 0x9c6   : > { %v4615_v55 = vmul.f32 %v6777_v61, %v9206_v43  ;;  %v4652_v2 = vsub.f32 %v5625_v13, %v4630_v35 }
 0x9c7   : > { %v4633_v27 = vmul.f32 %v9175_v17, %v4616_v14 }
 0x9c8   : > { %v6779_v4 = vpop.eup %6778  ;;  %6273 = vmatprep.mubr.msk.f32.mxu0 %vm676_vm0, %v4615_v55  ;;  %v4632_v52 = vmul.f32 %v4615_v55, %v9177_v42 }
 0x9c9   : > { %v6781_v6 = vpop.eup %6780  ;;  %v4618_v54 = vmul.f32 %v6779_v4, %v9206_v43  ;;  %6274 = vmatmul.mubr.msk.f32.gmra.mrb[26].mxu0 %vm676_vm0, %v4616_v14 }
 0x9ca   : > { %v4617_v28 = vmul.f32 %v6781_v6, %v9206_v43  ;;  %v4654_v39 = vsub.f32 %v5625_v13, %v4632_v52 }
 0x9cb   : > { %v4635_v22 = vmul.f32 %v9179_v63, %v4618_v54  ;;  %v4644_v63 = vsub.f32 %v5625_v13, %v9221_v37  ;;  %v4650_v37 = vsub.f32 %v5625_v13, %v4628_v32  ;;  %v5075_v32 = vld [vmem:[%s9478_s17 + $0x60] sm:$0xff] }
 0x9cc   : > { %v6783_v58 = vpop.eup %6782  ;;  %6276 = vmatprep.mubr.msk.f32.mxu0 %vm676_vm0, %v4617_v28  ;;  %v4634_v10 = vmul.f32 %v4617_v28, %v9181_v41  ;;  %v4645_v41 = vsub.f32 %v5625_v13, %v9215_v40  ;;  %v4651_v40 = vsub.f32 %v5625_v13, %v4629_v31  ;;  %v6630_v31 = vpack.c.bf16 %v5072_v8, %v5071_v15 }
 0x9cd   : > { %v6785_v17 = vpop.eup %6784  ;;  %v4620_v42 = vmul.f32 %v6783_v58, %v9206_v43  ;;  %6277 = vmatmul.mubr.msk.f32.gmra.mrb[28].mxu0 %vm676_vm0, %v4618_v54  ;;  %v6638_v48 = vpack.c.bf16 %v5076_v44, %v5075_v32 }
 0x9ce   : > { %v4619_v12 = vmul.f32 %v6785_v17, %v9206_v43  ;;  %v4648_v43 = vsub.f32 %v5625_v13, %v9249_v36  ;;  %v4655_v36 = vsub.f32 %v5625_v13, %v4633_v27  ;;  %v4656_v60 = vsub.f32 %v5625_v13, %v4634_v10  ;;  %6631 = vmatprep.subr.bf16.mxu1 %v6630_v31 }
 0x9cf   : > { %v4637_v18 = vmul.f32 %v9183_v23, %v4620_v42  ;;  %v4647_v23 = vsub.f32 %v5625_v13, %v9229_v57  ;;  %v4653_v57 = vsub.f32 %v5625_v13, %v4631_v0  ;;  %6633 = vmatpush3.bf16.msra.mxu1 %v6630_v31  ;;  %v6642_v0 = vpack.c.bf16 %v5078_v53, %v5077_v21 }
 0x9d0   : > { %6279 = vmatprep.mubr.msk.f32.mxu0 %vm676_vm0, %v4619_v12  ;;  %v4636_v25 = vmul.f32 %v4619_v12, %v9185_v46  ;;  %v4649_v46 = vsub.f32 %v5625_v13, %v9243_v3  ;;  %v4657_v3 = vsub.f32 %v5625_v13, %v4635_v22  ;;  %6635 = vmatprep.subr.bf16.mxu1 %v6634_v1 }
 0x9d1   : > { %6280 = vmatmul.mubr.msk.f32.gmra.mrb[30].mxu0 %vm676_vm0, %v4620_v42  ;;  %v4659_v49 = vsub.f32 %v5625_v13, %v4637_v18 }
 0x9d2   : > { %6282 = vmatprep.mubr.msk.f32.mxu0 %vm676_vm0, %v4644_v63  ;;  %v4658_v45 = vsub.f32 %v5625_v13, %v4636_v25 }
 0x9d3   : > { %6637 = vmatpush3.bf16.msra.mxu1 %v6634_v1 }
 0x9d4   : > { %6639 = vmatprep.subr.bf16.mxu1 %v6638_v48 }
 0x9d5   : > { %6283 = vmatmul.mubr.msk.f32.gmra.mrb[32].mxu0 %vm676_vm0, %v4645_v41 }
 0x9d6   : > { %6285 = vmatprep.mubr.msk.f32.mxu0 %vm676_vm0, %v4646_v38 }
 0x9d7   : > { %6641 = vmatpush3.bf16.msra.mxu1 %v6638_v48 }
 0x9d8   : > { %6643 = vmatprep.subr.bf16.mxu1 %v6642_v0 }
 0x9d9   : > { %6286 = vmatmul.mubr.msk.f32.gmra.mrb[34].mxu0 %vm676_vm0, %v4647_v23 }
 0x9da   : > { %6288 = vmatprep.mubr.msk.f32.mxu0 %vm676_vm0, %v4648_v43 }
 0x9db   : > { %6645 = vmatpush3.bf16.msra.mxu1 %v6642_v0 }
 0x9dd   : > { %6289 = vmatmul.mubr.msk.f32.gmra.mrb[36].mxu0 %vm676_vm0, %v4649_v46 }
 0x9de   : > { %6291 = vmatprep.mubr.msk.f32.mxu0 %vm676_vm0, %v4650_v37 }
 0x9e1   : > { %6292 = vmatmul.mubr.msk.f32.gmra.mrb[38].mxu0 %vm676_vm0, %v4651_v40 }
 0x9e2   : > { %6294 = vmatprep.mubr.msk.f32.mxu0 %vm676_vm0, %v4652_v2 }
 0x9e5   : > { %6295 = vmatmul.mubr.msk.f32.gmra.mrb[40].mxu0 %vm676_vm0, %v4653_v57 }
 0x9e6   : > { %6297 = vmatprep.mubr.msk.f32.mxu0 %vm676_vm0, %v4654_v39 }
 0x9e9   : > { %6298 = vmatmul.mubr.msk.f32.gmra.mrb[42].mxu0 %vm676_vm0, %v4655_v36 }
 0x9ea   : > { %6300 = vmatprep.mubr.msk.f32.mxu0 %vm676_vm0, %v4656_v60 }
 0x9ed   : > { %6301 = vmatmul.mubr.msk.f32.gmra.mrb[44].mxu0 %vm676_vm0, %v4657_v3 }
 0x9ee   : > { %6303 = vmatprep.mubr.msk.f32.mxu0 %vm676_vm0, %v4658_v45 }
 0x9f1   : > { %6304 = vmatmul.mubr.msk.f32.gmra.mrb[46].mxu0 %vm676_vm0, %v4659_v49 }
 0xa88   : > { %v6260_v20 = vpop.f32.mrb[16].mxu0 }
 0xa89   : > { %v4984_v35 = vmul.f32 %v6260_v20, %v9045_v19  ;;  %v4824_v61 = vpop.f32.mrb[17].mxu0 }
 0xa8a   : > { %v4983_v14 = vmul.f32 %v4824_v61, %v9047_v7 }
 0xa8c   : > { %v6263_v55 = vpop.f32.mrb[18].mxu0 }
 0xa8d   : > { %v4986_v27 = vmul.f32 %v6263_v55, %v9051_v59  ;;  %v4834_v4 = vpop.f32.mrb[19].mxu0 }
 0xa8e   : > { %v4985_v52 = vmul.f32 %v4834_v4, %v9053_v26 }
 0xa90   : > { %v6266_v6 = vpop.f32.mrb[20].mxu0 }
 0xa91   : > { %v4988_v54 = vmul.f32 %v6266_v6, %v9057_v5  ;;  %v4844_v28 = vpop.f32.mrb[21].mxu0 }
 0xa92   : > { %v4987_v22 = vmul.f32 %v4844_v28, %v9059_v11 }
 0xa94   : > { %v6269_v58 = vpop.f32.mrb[22].mxu0 }
 0xa95   : > { %v4990_v10 = vmul.f32 %v6269_v58, %v9063_v30  ;;  %v4854_v17 = vpop.f32.mrb[23].mxu0 }
 0xa96   : > { %v4989_v19 = vmul.f32 %v4854_v17, %v9065_v29 }
 0xa98   : > { %v6272_v13 = vpop.f32.mrb[24].mxu0 }
 0xa99   : > { %v4992_v7 = vmul.f32 %v6272_v13, %v9069_v50  ;;  %v4864_v42 = vpop.f32.mrb[25].mxu0 }
 0xa9a   : > { %v4991_v59 = vmul.f32 %v4864_v42, %v9071_v62 }
 0xa9c   : > { %v6275_v12 = vpop.f32.mrb[26].mxu0 }
 0xa9d   : > { %v9344_v26 = vmul.f32 %v6275_v12, %v9075_v16  ;;  %v4874_v5 = vpop.f32.mrb[27].mxu0 }
 0xa9e   : > { %v9347_v18 = vmul.f32 %v4874_v5, %v9077_v34 }
 0xaa0   : > { %v6278_v11 = vpop.f32.mrb[28].mxu0 }
 0xaa1   : > { %v9350_v30 = vmul.f32 %v6278_v11, %v9081_v24  ;;  %v4884_v63 = vpop.f32.mrb[29].mxu0 }
 0xaa2   : > { %v9353_v29 = vmul.f32 %v4884_v63, %v9083_v47 }
 0xaa4   : > { %v6281_v50 = vpop.f32.mrb[30].mxu0 }
 0xaa5   : > { %v9356_v25 = vmul.f32 %v6281_v50, %v9087_v51  ;;  %v4894_v62 = vpop.f32.mrb[31].mxu0 }
 0xaa6   : > { %v9359_v16 = vmul.f32 %v4894_v62, %v9089_v9 }
 0xaa8   : > { %v6284_v41 = vpop.f32.mrb[32].mxu0 }
 0xaa9   : > { %v5000_v38 = vadd.f32 %v6284_v41, %v4984_v35  ;;  %v4904_v34 = vpop.f32.mrb[33].mxu0 }
 0xaaa   : > { %v4999_v23 = vadd.f32 %v4983_v14, %v4904_v34  ;;  %v9370_v34 = vld [vmem:[%s9479_s18] ss:$0 sm:$0xff] }
 0xaab   : > { %v5032_v43 = vmul.f32 0.01, %v5000_v38  ;;  %vm5016_vm0 = vcmp.gt.f32.partialorder %v5000_v38, 0.0 }
 0xaac   : > { %v5031_v24 = vmul.f32 0.01, %v4999_v23  ;;  %v6287_v46 = vpop.f32.mrb[34].mxu0  ;;  %vm5015_vm7 = vcmp.gt.f32.partialorder %v4999_v23, 0.0 }
 0xaad   : > { %v5002_v37 = vadd.f32 %v6287_v46, %v4986_v27  ;;  %v4914_v47 = vpop.f32.mrb[35].mxu0  ;;  %v5048_v57 = vsel %vm5016_vm0, %v5000_v38, %v5032_v43 }
 0xaae   : > { %v5001_v40 = vadd.f32 %v4985_v52, %v4914_v47  ;;  %v5047_v2 = vsel %vm5015_vm7, %v4999_v23, %v5031_v24 }
 0xaaf   : > { %v5034_v51 = vmul.f32 0.01, %v5002_v37  ;;  %6338 = vmatprep.mubr.f32.mxu1 %v5047_v2  ;;  %vm5018_vm8 = vcmp.gt.f32.partialorder %v5002_v37, 0.0 }
 0xab0   : > { %v5033_v39 = vmul.f32 0.01, %v5001_v40  ;;  %v6290_v9 = vpop.f32.mrb[36].mxu0  ;;  %6339 = vmatmul.mubr.f32.vlgmr.msra.gmra.mrb[32].mxu1 %v5048_v57  ;;  %vm5017_vm9 = vcmp.gt.f32.partialorder %v5001_v40, 0.0 }
 0xab1   : > { %v5004_v36 = vadd.f32 %v6290_v9, %v4988_v54  ;;  %v4924_v60 = vpop.f32.mrb[37].mxu0  ;;  %v5050_v49 = vsel %vm5018_vm8, %v5002_v37, %v5034_v51 }
 0xab2   : > { %v5003_v3 = vadd.f32 %v4987_v22, %v4924_v60  ;;  %v5049_v45 = vsel %vm5017_vm9, %v5001_v40, %v5033_v39 }
 0xab3   : > { %v5036_v15 = vmul.f32 0.01, %v5004_v36  ;;  %6341 = vmatprep.mubr.f32.mxu1 %v5049_v45  ;;  %vm5020_vm10 = vcmp.gt.f32.partialorder %v5004_v36, 0.0 }
 0xab4   : > { %v5035_v8 = vmul.f32 0.01, %v5003_v3  ;;  %v6293_v31 = vpop.f32.mrb[38].mxu0  ;;  %6342 = vmatmul.mubr.f32.gmra.mrb[34].mxu1 %v5050_v49  ;;  %vm5019_vm11 = vcmp.gt.f32.partialorder %v5003_v3, 0.0 }
 0xab5   : > { %v5006_v33 = vadd.f32 %v6293_v31, %v4990_v10  ;;  %v4934_v56 = vpop.f32.mrb[39].mxu0  ;;  %v5052_v44 = vsel %vm5020_vm10, %v5004_v36, %v5036_v15 }
 0xab6   : > { %v5005_v1 = vadd.f32 %v4989_v19, %v4934_v56  ;;  %v5051_v32 = vsel %vm5019_vm11, %v5003_v3, %v5035_v8 }
 0xab7   : > { %v5038_v48 = vmul.f32 0.01, %v5006_v33  ;;  %6344 = vmatprep.mubr.f32.mxu1 %v5051_v32  ;;  %vm5022_vm12 = vcmp.gt.f32.partialorder %v5006_v33, 0.0 }
 0xab8   : > { %v5037_v21 = vmul.f32 0.01, %v5005_v1  ;;  %v6296_v53 = vpop.f32.mrb[40].mxu0  ;;  %6345 = vmatmul.mubr.f32.gmra.mrb[36].mxu1 %v5052_v44  ;;  %vm5021_vm13 = vcmp.gt.f32.partialorder %v5005_v1, 0.0 }
 0xab9   : > { %v5008_v0 = vadd.f32 %v6296_v53, %v4992_v7  ;;  %v4944_v20 = vpop.f32.mrb[41].mxu0  ;;  %v5054_v14 = vsel %vm5022_vm12, %v5006_v33, %v5038_v48 }
 0xaba   : > { %v5007_v35 = vadd.f32 %v4991_v59, %v4944_v20  ;;  %v5053_v61 = vsel %vm5021_vm13, %v5005_v1, %v5037_v21 }
 0xabb   : > { %v5040_v55 = vmul.f32 0.01, %v5008_v0  ;;  %6347 = vmatprep.mubr.f32.mxu1 %v5053_v61  ;;  %vm5024_vm14 = vcmp.gt.f32.partialorder %v5008_v0, 0.0 }
 0xabc   : > { %v5039_v27 = vmul.f32 0.01, %v5007_v35  ;;  %v6299_v4 = vpop.f32.mrb[42].mxu0  ;;  %6348 = vmatmul.mubr.f32.gmra.mrb[38].mxu1 %v5054_v14  ;;  %vm5023_vm15 = vcmp.gt.f32.partialorder %v5007_v35, 0.0 }
 0xabd   : > { %v5010_v52 = vadd.f32 %v6299_v4, %v9344_v26  ;;  %v4954_v6 = vpop.f32.mrb[43].mxu0  ;;  %v5056_v22 = vsel %vm5024_vm14, %v5008_v0, %v5040_v55 }
 0xabe   : > { %v5009_v54 = vadd.f32 %v9347_v18, %v4954_v6  ;;  %v5055_v28 = vsel %vm5023_vm15, %v5007_v35, %v5039_v27 }
 0xabf   : > { %v5042_v58 = vmul.f32 0.01, %v5010_v52  ;;  %6350 = vmatprep.mubr.f32.mxu1 %v5055_v28  ;;  %vm5026_vm1 = vcmp.gt.f32.partialorder %v5010_v52, 0.0 }
 0xac0   : > { %v5041_v10 = vmul.f32 0.01, %v5009_v54  ;;  %v6302_v17 = vpop.f32.mrb[44].mxu0  ;;  %6351 = vmatmul.mubr.f32.gmra.mrb[40].mxu1 %v5056_v22  ;;  %vm5025_vm2 = vcmp.gt.f32.partialorder %v5009_v54, 0.0 }
 0xac1   : > { %v5012_v19 = vadd.f32 %v6302_v17, %v9350_v30  ;;  %v4964_v13 = vpop.f32.mrb[45].mxu0  ;;  %v5058_v59 = vsel %vm5026_vm1, %v5010_v52, %v5042_v58 }
 0xac2   : > { %v5011_v7 = vadd.f32 %v9353_v29, %v4964_v13  ;;  %v5057_v42 = vsel %vm5025_vm2, %v5009_v54, %v5041_v10 }
 0xac3   : > { %v5044_v12 = vmul.f32 0.01, %v5012_v19  ;;  %6353 = vmatprep.mubr.f32.mxu1 %v5057_v42  ;;  %vm5028_vm3 = vcmp.gt.f32.partialorder %v5012_v19, 0.0 }
 0xac4   : > { %v5043_v26 = vmul.f32 0.01, %v5011_v7  ;;  %v6305_v5 = vpop.f32.mrb[46].mxu0  ;;  %6354 = vmatmul.mubr.f32.gmra.mrb[42].mxu1 %v5058_v59  ;;  %vm5027_vm4 = vcmp.gt.f32.partialorder %v5011_v7, 0.0 }
 0xac5   : > { %v5014_v18 = vadd.f32 %v6305_v5, %v9356_v25  ;;  %v4974_v11 = vpop.f32.mrb[47].mxu0  ;;  %v5060_v62 = vsel %vm5028_vm3, %v5012_v19, %v5044_v12 }
 0xac6   : > { %v5013_v63 = vadd.f32 %v9359_v16, %v4974_v11  ;;  %v5059_v50 = vsel %vm5027_vm4, %v5011_v7, %v5043_v26 }
 0xac7   : > { %v5046_v30 = vmul.f32 0.01, %v5014_v18  ;;  %6356 = vmatprep.mubr.f32.mxu1 %v5059_v50  ;;  %vm5030_vm5 = vcmp.gt.f32.partialorder %v5014_v18, 0.0 }
 0xac8   : > { %v5045_v29 = vmul.f32 0.01, %v5013_v63  ;;  %6357 = vmatmul.mubr.f32.gmra.mrb[44].mxu1 %v5060_v62  ;;  %vm5029_vm6 = vcmp.gt.f32.partialorder %v5013_v63, 0.0 }
 0xac9   : > { %v5062_v38 = vsel %vm5030_vm5, %v5014_v18, %v5046_v30 }
 0xaca   : > { %v5061_v41 = vsel %vm5029_vm6, %v5013_v63, %v5045_v29 }
 0xacb   : > { %6359 = vmatprep.mubr.f32.mxu1 %v5061_v41 }
 0xacc   : > { %6360 = vmatmul.mubr.f32.gmra.mrb[46].mxu1 %v5062_v38 }
 0xb83   : > { %v6340_v25 = vpop.f32.mrb[32].mxu1 }
 0xb84   : > { %v5158_v16 = vadd.f32 %v6340_v25, %v9370_v34  ;;  %v5152_v23 = vpop.f32.mrb[33].mxu1 }
 0xb85   : > { %v5153_v43 = vadd.f32 %v9370_v34, %v5152_v23 }
 0xb86   : > { %v5660_v24 = vmul.f32 -1.442695, %v5158_v16 }
 0xb87   : > { %v5659_v46 = vmul.f32 -1.442695, %v5153_v43  ;;  %v6343_v37 = vpop.f32.mrb[34].mxu1 }
 0xb88   : > { %6786 = vpow2.f32 %v5660_v24  ;;  %v5168_v47 = vadd.f32 %v6343_v37, %v9370_v34  ;;  %v5162_v40 = vpop.f32.mrb[35].mxu1 }
 0xb89   : > { %6788 = vpow2.f32 %v5659_v46  ;;  %v5163_v2 = vadd.f32 %v9370_v34, %v5162_v40 }
 0xb8a   : > { %v5662_v57 = vmul.f32 -1.442695, %v5168_v47 }
 0xb8b   : > { %v5661_v51 = vmul.f32 -1.442695, %v5163_v2  ;;  %v6346_v39 = vpop.f32.mrb[36].mxu1 }
 0xb8c   : > { %6790 = vpow2.f32 %v5662_v57  ;;  %v5178_v9 = vadd.f32 %v6346_v39, %v9370_v34  ;;  %v5172_v36 = vpop.f32.mrb[37].mxu1 }
 0xb8d   : > { %6792 = vpow2.f32 %v5661_v51  ;;  %v5173_v60 = vadd.f32 %v9370_v34, %v5172_v36 }
 0xb8e   : > { %v5664_v3 = vmul.f32 -1.442695, %v5178_v9 }
 0xb8f   : > { %v5663_v45 = vmul.f32 -1.442695, %v5173_v60  ;;  %v6349_v49 = vpop.f32.mrb[38].mxu1 }
 0xb90   : > { %6794 = vpow2.f32 %v5664_v3  ;;  %v5188_v15 = vadd.f32 %v6349_v49, %v9370_v34  ;;  %v5182_v8 = vpop.f32.mrb[39].mxu1 }
 0xb91   : > { %6796 = vpow2.f32 %v5663_v45  ;;  %v5183_v31 = vadd.f32 %v9370_v34, %v5182_v8 }
 0xb92   : > { %v6787_v33 = vpop.eup %6786  ;;  %v5666_v56 = vmul.f32 -1.442695, %v5188_v15 }
 0xb93   : > { %v6789_v1 = vpop.eup %6788  ;;  %v5280_v32 = vadd.f32 1.0, %v6787_v33  ;;  %v5665_v44 = vmul.f32 -1.442695, %v5183_v31  ;;  %v6352_v48 = vpop.f32.mrb[40].mxu1 }
 0xb94   : > { %v5279_v21 = vadd.f32 1.0, %v6789_v1  ;;  %6798 = vpow2.f32 %v5666_v56  ;;  %v5198_v53 = vadd.f32 %v6352_v48, %v9370_v34  ;;  %v5192_v0 = vpop.f32.mrb[41].mxu1 }
 0xb95   : > { %6800 = vrcp.f32 %v5280_v32  ;;  %v5193_v20 = vadd.f32 %v9370_v34, %v5192_v0 }
 0xb96   : > { %v6791_v35 = vpop.eup %6790  ;;  %6802 = vrcp.f32 %v5279_v21  ;;  %v5668_v61 = vmul.f32 -1.442695, %v5198_v53 }
 0xb97   : > { %v6793_v14 = vpop.eup %6792  ;;  %v5282_v55 = vadd.f32 1.0, %v6791_v35  ;;  %6804 = vpow2.f32 %v5665_v44  ;;  %v5667_v27 = vmul.f32 -1.442695, %v5193_v20  ;;  %v6355_v4 = vpop.f32.mrb[42].mxu1 }
 0xb98   : > { %v5281_v52 = vadd.f32 1.0, %v6793_v14  ;;  %6806 = vpow2.f32 %v5668_v61  ;;  %v5208_v6 = vadd.f32 %v6355_v4, %v9370_v34  ;;  %v5202_v54 = vpop.f32.mrb[43].mxu1 }
 0xb99   : > { %6808 = vrcp.f32 %v5282_v55  ;;  %v5203_v28 = vadd.f32 %v9370_v34, %v5202_v54 }
 0xb9a   : > { %v6795_v22 = vpop.eup %6794  ;;  %6810 = vrcp.f32 %v5281_v52  ;;  %v5670_v58 = vmul.f32 -1.442695, %v5208_v6 }
 0xb9b   : > { %v6797_v10 = vpop.eup %6796  ;;  %v5284_v17 = vadd.f32 1.0, %v6795_v22  ;;  %6812 = vpow2.f32 %v5667_v27  ;;  %v5669_v19 = vmul.f32 -1.442695, %v5203_v28  ;;  %v6358_v13 = vpop.f32.mrb[44].mxu1 }
 0xb9c   : > { %v5283_v7 = vadd.f32 1.0, %v6797_v10  ;;  %6814 = vpow2.f32 %v5670_v58  ;;  %v5218_v42 = vadd.f32 %v6358_v13, %v9370_v34  ;;  %v5212_v59 = vpop.f32.mrb[45].mxu1 }
 0xb9d   : > { %6816 = vrcp.f32 %v5284_v17  ;;  %v5213_v12 = vadd.f32 %v9370_v34, %v5212_v59 }
 0xb9e   : > { %v6799_v26 = vpop.eup %6798  ;;  %6818 = vrcp.f32 %v5283_v7  ;;  %v5672_v5 = vmul.f32 -1.442695, %v5218_v42 }
 0xb9f   : > { %v6801_v18 = vpop.eup %6800  ;;  %v5286_v11 = vadd.f32 1.0, %v6799_v26  ;;  %6820 = vpow2.f32 %v5669_v19  ;;  %v5671_v63 = vmul.f32 -1.442695, %v5213_v12  ;;  %v6361_v50 = vpop.f32.mrb[46].mxu1 }
 0xba0   : > { %v6803_v62 = vpop.eup %6802  ;;  %5328 = vst [vmem:[%s9389_s27 + $0x8] sm:$0xff] %v6801_v18  ;;  %6822 = vpow2.f32 %v5672_v5  ;;  %v5228_v30 = vadd.f32 %v6361_v50, %v9370_v34  ;;  %v5222_v29 = vpop.f32.mrb[47].mxu1 }
 0xba1   : > { %v6805_v41 = vpop.eup %6804  ;;  %5327 = vst [vmem:[%s9389_s27] sm:$0xff] %v6803_v62  ;;  %6824 = vrcp.f32 %v5286_v11  ;;  %v5223_v38 = vadd.f32 %v9370_v34, %v5222_v29 }
 0xba2   : > { %v6807_v25 = vpop.eup %6806  ;;  %v5285_v16 = vadd.f32 1.0, %v6805_v41  ;;  %6826 = vpow2.f32 %v5671_v63  ;;  %v5674_v23 = vmul.f32 -1.442695, %v5228_v30 }
 0xba3   : > { %v6809_v43 = vpop.eup %6808  ;;  %v5288_v24 = vadd.f32 1.0, %v6807_v25  ;;  %v5673_v46 = vmul.f32 -1.442695, %v5223_v38 }
 0xba4   : > { %v6811_v37 = vpop.eup %6810  ;;  %5330 = vst [vmem:[%s9389_s27 + $0x18] sm:$0xff] %v6809_v43  ;;  %6828 = vrcp.f32 %v5285_v16 }
 0xba5   : > { %v6813_v47 = vpop.eup %6812  ;;  %5329 = vst [vmem:[%s9389_s27 + $0x10] sm:$0xff] %v6811_v37  ;;  %6830 = vrcp.f32 %v5288_v24 }
 0xba6   : > { %v6815_v40 = vpop.eup %6814  ;;  %v5287_v2 = vadd.f32 1.0, %v6813_v47  ;;  %6832 = vpow2.f32 %v5674_v23 }
 0xba7   : > { %v6817_v34 = vpop.eup %6816  ;;  %v5290_v57 = vadd.f32 1.0, %v6815_v40  ;;  %6834 = vpow2.f32 %v5673_v46 }
 0xba8   : > { %v6819_v51 = vpop.eup %6818  ;;  %5332 = vst [vmem:[%s9389_s27 + $0x28] sm:$0xff] %v6817_v34  ;;  %6836 = vrcp.f32 %v5287_v2 }
 0xba9   : > { %v6821_v39 = vpop.eup %6820  ;;  %5331 = vst [vmem:[%s9389_s27 + $0x20] sm:$0xff] %v6819_v51  ;;  %6838 = vrcp.f32 %v5290_v57 }
 0xbaa   : > { %v6823_v9 = vpop.eup %6822  ;;  %v5289_v36 = vadd.f32 1.0, %v6821_v39 }
 0xbab   : > { %v6825_v60 = vpop.eup %6824  ;;  %v5292_v3 = vadd.f32 1.0, %v6823_v9 }
 0xbac   : > { %v6827_v45 = vpop.eup %6826  ;;  %5334 = vst [vmem:[%s9389_s27 + $0x38] sm:$0xff] %v6825_v60  ;;  %6840 = vrcp.f32 %v5289_v36 }
 0xbad   : > { %6842 = vrcp.f32 %v5292_v3  ;;  %v5291_v49 = vadd.f32 1.0, %v6827_v45 }
 0xbae   : > { %v6829_v15 = vpop.eup %6828 }
 0xbaf   : > { %v6831_v8 = vpop.eup %6830  ;;  %5333 = vst [vmem:[%s9389_s27 + $0x30] sm:$0xff] %v6829_v15  ;;  %6844 = vrcp.f32 %v5291_v49 }
 0xbb0   : > { %v6833_v31 = vpop.eup %6832  ;;  %5336 = vst [vmem:[%s9389_s27 + $0x48] sm:$0xff] %v6831_v8 }
 0xbb1   : > { %v6835_v33 = vpop.eup %6834  ;;  %v5294_v56 = vadd.f32 1.0, %v6833_v31 }
 0xbb2   : > { %v6837_v1 = vpop.eup %6836  ;;  %v5293_v32 = vadd.f32 1.0, %v6835_v33 }
 0xbb3   : > { %v6839_v44 = vpop.eup %6838  ;;  %5335 = vst [vmem:[%s9389_s27 + $0x40] sm:$0xff] %v6837_v1  ;;  %6846 = vrcp.f32 %v5294_v56 }
 0xbb4   : > { %5338 = vst [vmem:[%s9389_s27 + $0x58] sm:$0xff] %v6839_v44  ;;  %6848 = vrcp.f32 %v5293_v32 }
 0xbb6   : > { %v6841_v48 = vpop.eup %6840 }
 0xbb7   : > { %v6843_v21 = vpop.eup %6842  ;;  %5337 = vst [vmem:[%s9389_s27 + $0x50] sm:$0xff] %v6841_v48 }
 0xbb8   : > { %5340 = vst [vmem:[%s9389_s27 + $0x68] sm:$0xff] %v6843_v21 }
 0xbb9   : > { %v6845_v53 = vpop.eup %6844 }
 0xbba   : > { %5339 = vst [vmem:[%s9389_s27 + $0x60] sm:$0xff] %v6845_v53 }
 0xbbd   : > { %v6847_v0 = vpop.eup %6846 }
 0xbbe   : > { %v6849_v20 = vpop.eup %6848  ;;  %5342 = vst [vmem:[%s9389_s27 + $0x78] sm:$0xff] %v6847_v0 }
 0xbbf   : > { %5341 = vst [vmem:[%s9389_s27 + $0x70] sm:$0xff] %v6849_v20 }
 0xbc0   : > { %6863 = shalt.err (!%p6860_p3)
}
 0xbc1   : > { %s6864_s0 = scalar_lea.hbm %s9412_s2, 2048  ;;  %s6868_s22 = scalar_lea.hbm %s9480_s19, 4096 }
 0xbc2   : > { %p6865_p4 = scmp.ne.s32.totalorder %s9412_s2, %s6864_s0  ;;  %p6869_p9 = scmp.lt.u32.totalorder %s9412_s2, %s9480_s19 }
 0xbc3   : > { %p6870_p10 = scmp.lt.u32.totalorder %s6868_s22, %s6864_s0  ;;  %p6872_p12 = scmp.lt.u32.totalorder %s6864_s0, %s9412_s2 }
 0xbc4   : > { %p6866_p7 = pnand %p6865_p4, %p7057_p5 }
 0xbc5   : > { %p6871_p11 = por %p6870_p10, %p6869_p9 }
 0xbc6   : > { %p6867_p8 = pneg %p6866_p7 }
 0xbc7   : > { %p6873_p13 = por %p6872_p12, %p6871_p11 }
 0xbc9   : > { %p6874_p0 = pnand %p6873_p13, %p6867_p8 }
 0xbcb   : > { %6877 = shalt.err (!%p6874_p0)
}
 0xbcc   : > { %s6917_s1 = smov 128   ;;  %s6918_s24 = smov 8  }
 0xbcd   : > { %6646 = dma.vmem_to_hbm [thread:$0]  (%p7057_p5), %s9414_s20, 2048, %s9412_s2, %s9420_s4, %s6917_s1, %s6917_s1, %s6918_s24  }
 0xbce PF: > { %s9526_s27 = sld [smem:[#allocation7_spill]]  ;;  %s9527_s28 = sld [smem:[#allocation5_spill]] }
 0xbd4   : > { %p6652_p1 = scmp.ge.s32.totalorder %s9526_s27, 2  ;;  %s5372_s26 = sand.u32 1, %s9527_s28  }
 0xbd5   : > { %s5373_s0 = scalar_lea.sflag [#allocation3], %s5372_s26 }
 0xbd6   : > { %p6649_p2 = pnand %p6652_p1, %p7061_p6 }
 0xbd8   : > { %6895 = dma.done.wait (!%p6649_p2), %s5373_s0, 2048  }
 0xbd9   : > { %6897 = vsyncadd (!%p6649_p2), %s5373_s0, 4294965248  ;;  %s9529_s21 = sld [smem:[#allocation8_spill]]  ;;  %s9530_s22 = sld [smem:[#allocation6_spill]] }
 0xbda   : > { %s9531_s20 = sld [smem:[#allocation9_spill]]  ;;  %s9532_s0 = smov %s6904_s30 }
 0xbdf   : > { %p29_p3 = scmp.ge.s32.totalorder %s9529_s21, 4   ;;  %s9533_s30 = smov %s9530_s22 }
 0xbe1   :  { %31 = sbr.rel (!%p29_p3) target bundleno = 10 (0xa), region = 131 }
 0xbe8   :  { %5378 = vsyncpa [#allocation3], 1 }
 0xbe9   :  { %5380 = vsyncpa [#allocation3 + $0x1], 1 }

</bundles_post_ra>
